<compile_context>
chip_gen: v6e
topology: v6e:2x2x1
jax: 0.10.0
libtpu: 0.0.40
codegen_flags: <defaults>
</compile_context>

<pallas_src>
import jax
import jax.numpy as jnp
from jax.experimental import pallas as pl
from jax.experimental.pallas import tpu as pltpu

LN_EPS = 1e-5
_SQRT1_2 = 0.7071067811865476


def _erf_poly(z):
    """erf via Abramowitz & Stegun 7.1.26 (|err| <= 1.5e-7).

    Built only from abs / exp / mul / add / where so it is guaranteed to
    lower inside a Mosaic kernel.
    """
    a1, a2, a3, a4, a5 = (0.254829592, -0.284496736, 1.421413741,
                          -1.453152027, 1.061405429)
    pp = 0.3275911
    az = jnp.abs(z)
    t = 1.0 / (1.0 + pp * az)
    poly = ((((a5 * t + a4) * t + a3) * t + a2) * t + a1) * t
    pos = 1.0 - poly * jnp.exp(-az * az)
    return jnp.where(z >= 0, pos, -pos)


def _gelu_exact_kernel(x):
    # PyTorch nn.GELU default = exact erf formulation (polynomial erf in-kernel).
    return 0.5 * x * (1.0 + _erf_poly(x * _SQRT1_2))


def _gelu_exact_ref(x):
    return 0.5 * x * (1.0 + jax.lax.erf(x * _SQRT1_2))


def _make_kernel(block_b, N, C, num_heads):
    head_dim = C // num_heads
    M = block_b * N  # merged token rows per grid step

    def kernel(x_ref, wqkv_ref, bqkv_ref, wd_qkv_ref, bd_qkv_ref, wu_ref,
               wp_ref, bp_ref, wd_o_ref, bd_o_ref, wu_o_ref, bu_o_ref, o_ref):
        x = x_ref[...]                                   # (M, C) bf16 streamed
        xf = x.astype(jnp.float32)

        # Shared LayerNorm statistics for the q/k/v adapters (gamma/beta are
        # folded into the adapter down-projections host-side).
        mu = jnp.mean(xf, axis=-1, keepdims=True)
        var = jnp.mean(jnp.square(xf - mu), axis=-1, keepdims=True)
        xhat = ((xf - mu) * jax.lax.rsqrt(var + LN_EPS)).astype(jnp.bfloat16)

        # Fused q/k/v adapter down-projection + GELU: one (C, 3r) matmul.
        h = jnp.dot(xhat, wd_qkv_ref[...],
                    preferred_element_type=jnp.float32) + bd_qkv_ref[...]
        h = _gelu_exact_kernel(h).astype(jnp.bfloat16)   # (M, 3r)

        # q/k/v: column-blocked projections (no (M, 3C) f32 temporary).
        # Attention scale + adapter scaling are folded into weights/biases;
        # the adapter up-projection is a zero-padded (3r, C) block so the
        # tiny h tensor needs no narrow lane slicing.
        def project(i):
            t = jnp.dot(x, wqkv_ref[i], preferred_element_type=jnp.float32)
            t = t + jnp.dot(h, wu_ref[i], preferred_element_type=jnp.float32)
            t = t + bqkv_ref[i]
            return t.astype(jnp.bfloat16).reshape(block_b, N, C)

        q3 = project(0)   # q already scaled by head_dim**-0.5
        k3 = project(1)
        v3 = project(2)

        # Attention: batched over block_b (single batch dim dot_general),
        # small static loop over heads.  The head merge is folded into the
        # output projection: per-head (M, hd) @ (hd, C) accumulated into a
        # lane-dense (M, C) f32 value -> no per-head masked stores, no VMEM
        # scratch, no concatenate.
        y = None
        for hh in range(num_heads):
            lo = hh * head_dim
            qh = q3[:, :, lo:lo + head_dim]
            kh = k3[:, :, lo:lo + head_dim]
            vh = v3[:, :, lo:lo + head_dim]
            s = jnp.einsum("bqd,bkd->bqk", qh, kh,
                           preferred_element_type=jnp.float32)
            s = s - jnp.max(s, axis=-1, keepdims=True)
            e = jnp.exp(s)
            p = e * pl.reciprocal(jnp.sum(e, axis=-1, keepdims=True),
                                  approx=True)
            oh = jnp.einsum("bqk,bkd->bqd", p.astype(jnp.bfloat16), vh,
                            preferred_element_type=jnp.float32)
            oh2 = oh.astype(jnp.bfloat16).reshape(M, head_dim)
            contrib = jnp.dot(oh2, wp_ref[hh],
                              preferred_element_type=jnp.float32)
            y = contrib if y is None else y + contrib
        y = y + bp_ref[...]                              # (M, C) f32

        # 'o' adapter (LN affine folded into wd_o/bd_o), residual add.
        mu_y = jnp.mean(y, axis=-1, keepdims=True)
        var_y = jnp.mean(jnp.square(y - mu_y), axis=-1, keepdims=True)
        yhat = ((y - mu_y) * jax.lax.rsqrt(var_y + LN_EPS)).astype(jnp.bfloat16)
        ho = jnp.dot(yhat, wd_o_ref[...],
                     preferred_element_type=jnp.float32) + bd_o_ref[...]
        ho = _gelu_exact_kernel(ho).astype(jnp.bfloat16)
        y = y + jnp.dot(ho, wu_o_ref[...],
                        preferred_element_type=jnp.float32) + bu_o_ref[...]

        o_ref[...] = y.astype(o_ref.dtype)

    return kernel


def _prepare_kernel_params(p, num_heads):
    """Host-side constant folding:
       * LayerNorm gamma/beta folded into the adapter down-projections,
       * attention scale folded into the q projection and q-adapter up-proj,
       * adapter_scaling folded into every adapter up-projection and bias,
       * q/k/v adapter down-projections fused into one (C, 3r) matrix, the
         up-projections zero-padded to (3r, C) row blocks,
       * output projection reshaped to (num_heads, head_dim, C) so the head
         merge happens inside the per-head projection matmul,
       * matmul operands cast to bf16 (f32 accumulation in-kernel)."""
    C = p["wqkv"].shape[0]
    r = p["wd"].shape[-1]
    head_dim = C // num_heads
    scale = float(head_dim) ** -0.5
    a_scale = float(p["adapter_scaling"])
    bf16 = jnp.bfloat16

    # LN(x) @ Wd + bd == xhat @ (g[:,None]*Wd) + (b @ Wd + bd)
    wd_f = p["ln_g"][:, :, None] * p["wd"]                                 # (4,C,r)
    bd_f = jnp.einsum("ac,acr->ar", p["ln_b"], p["wd"])[:, None, :] + p["bd"]

    wd_qkv = jnp.concatenate([wd_f[0], wd_f[1], wd_f[2]], axis=1)          # (C,3r)
    bd_qkv = jnp.concatenate([bd_f[0], bd_f[1], bd_f[2]], axis=1)          # (1,3r)

    proj_scale = (scale, 1.0, 1.0)        # attention scale folded into q only
    wqkv_list, bqkv_list, wu_list = [], [], []
    for i in range(3):
        si = proj_scale[i]
        wqkv_list.append(p["wqkv"][:, i * C:(i + 1) * C] * si)
        bqkv_list.append(p["bqkv"][:, i * C:(i + 1) * C] * si
                         + p["bu"][i] * (a_scale * si))
        # Zero-padded (3r, C) up-projection: row block i holds adapter i.
        # TODO(synk): for r >= ~32 use a batched (3, M, r) x (3, r, C)
        # up-projection instead (the padding wastes 3x MACs at large r).
        blk = jnp.zeros((3 * r, C), jnp.float32)
        blk = blk.at[i * r:(i + 1) * r].set(p["wu"][i] * (a_scale * si))
        wu_list.append(blk)

    return dict(
        wqkv_s=jnp.stack(wqkv_list).astype(bf16),      # (3, C, C)
        bqkv_s=jnp.stack(bqkv_list),                   # (3, 1, C) f32
        wd_qkv=wd_qkv.astype(bf16), bd_qkv=bd_qkv,
        wu_s=jnp.stack(wu_list).astype(bf16),          # (3, 3r, C)
        wp_h=p["wp"].reshape(num_heads, head_dim, C).astype(bf16),
        bp=p["bp"],
        wd_o=wd_f[3].astype(bf16), bd_o=bd_f[3],
        wu_o=(p["wu"][3] * a_scale).astype(bf16),
        bu_o=p["bu"][3] * a_scale,
    )


def _default_block_b(B, N, *, target_rows=512, min_steps=4):
    """Largest divisor of B keeping >= min_steps grid steps (software pipeline
    has work to overlap; >= 2 steps per TensorCore on v7x) while M = block_b*N
    stays within an MXU-friendly row budget.  Sweep per generation at
    production shapes (v6e likes M in 256-512, v5e multiples of 128)."""
    min_steps = min(min_steps, B)
    best = 1
    for cand in range(1, B + 1):
        if B % cand == 0 and B // cand >= min_steps and cand * N <= target_rows:
            best = cand
    return best


def _vmem_limit_bytes():
    """Generation-aware VMEM request: ~3/4 of physical per-core VMEM capped at
    64 MiB (=> 48 MiB on v7x's 64 MiB cores, 64 MiB on v5e/v6e)."""
    cap = 128 * 1024 * 1024
    try:
        cap = int(pltpu.get_tpu_info().vmem_capacity_bytes)
    except Exception:
        pass
    return min(64 * 1024 * 1024, (cap * 3) // 4)


def lora_attention(x, params, *, num_heads, block_b=None):
    """Pallas TPU forward of LoRAAttention (inference: dropout/droppath are
    identity).  x: (B, N, C) float32."""
    B, N, C = x.shape
    assert C % num_heads == 0, "C must be divisible by num_heads"
    r = params["wd"].shape[-1]
    head_dim = C // num_heads
    if block_b is None:
        block_b = _default_block_b(B, N)
    # TODO(synk): pad/mask a ragged final batch block instead of requiring
    # divisibility.
    assert B % block_b == 0, "B must be divisible by block_b"
    M = block_b * N

    kp = _prepare_kernel_params(params, num_heads)
    kernel = _make_kernel(block_b, N, C, num_heads)

    # Stream tokens as bf16 (halves per-step input DMA); LN stats and all
    # matmul accumulation stay f32 inside the kernel.
    x2 = x.reshape(B * N, C).astype(jnp.bfloat16)
    args = (x2, kp["wqkv_s"], kp["bqkv_s"], kp["wd_qkv"], kp["bd_qkv"],
            kp["wu_s"], kp["wp_h"], kp["bp"], kp["wd_o"], kp["bd_o"],
            kp["wu_o"], kp["bu_o"])

    def run(single_buffer_weights):
        c0_2 = lambda i: (0, 0)
        c0_3 = lambda i: (0, 0, 0)

        def wspec(shape):
            idx = c0_3 if len(shape) == 3 else c0_2
            if single_buffer_weights:
                # Grid-invariant weights: one VMEM buffer instead of the
                # default double-buffer (halves weight VMEM).
                return pl.BlockSpec(shape, idx, pipeline_mode=pl.Buffered(1))
            return pl.BlockSpec(shape, idx)

        in_specs = [
            pl.BlockSpec((M, C), lambda i: (i, 0)),        # x tokens (bf16)
            wspec((3, C, C)),                              # wqkv_s
            wspec((3, 1, C)),                              # bqkv_s
            wspec((C, 3 * r)),                             # wd_qkv (LN folded)
            wspec((1, 3 * r)),                             # bd_qkv
            wspec((3, 3 * r, C)),                          # wu_s (padded blocks)
            wspec((num_heads, head_dim, C)),               # wp per head
            wspec((1, C)),                                 # bp
            wspec((C, r)),                                 # wd_o (LN folded)
            wspec((1, r)),                                 # bd_o
            wspec((r, C)),                                 # wu_o
            wspec((1, C)),                                 # bu_o
        ]
        return pl.pallas_call(
            kernel,
            out_shape=jax.ShapeDtypeStruct((B * N, C), x.dtype),
            grid_spec=pltpu.PrefetchScalarGridSpec(
                num_scalar_prefetch=0,
                grid=(B // block_b,),
                in_specs=in_specs,
                out_specs=pl.BlockSpec((M, C), lambda i: (i, 0)),
            ),
            compiler_params=pltpu.CompilerParams(
                dimension_semantics=("parallel",),
                vmem_limit_bytes=_vmem_limit_bytes()),
        )(*args)

    try:
        out2 = run(single_buffer_weights=True)
    except Exception:
        # pipeline_mode=pl.Buffered(1) on the top-level grid may be
        # unsupported on some JAX versions; fall back to default
        # double-buffered weights (identical results, slightly more VMEM).
        out2 = run(single_buffer_weights=False)

    return out2.reshape(B, N, C)


def reference(x, p, *, num_heads):
    """Pure-JAX f32 replica of LoRAAttention.forward (eval mode)."""
    B, N, C = x.shape
    hd = C // num_heads
    scale = hd ** (-0.5)

    def adapt(inp, i):
        mu = inp.mean(-1, keepdims=True)
        var = ((inp - mu) ** 2).mean(-1, keepdims=True)
        h = (inp - mu) / jnp.sqrt(var + LN_EPS) * p["ln_g"][i] + p["ln_b"][i]
        h = h @ p["wd"][i] + p["bd"][i]
        h = _gelu_exact_ref(h)
        h = h @ p["wu"][i] + p["bu"][i]
        return h * p["adapter_scaling"]

    qkv = x @ p["wqkv"] + p["bqkv"]
    q, k, v = qkv[..., :C], qkv[..., C:2 * C], qkv[..., 2 * C:]
    q = q + adapt(x, 0)
    k = k + adapt(x, 1)
    v = v + adapt(x, 2)

    def split_heads(t):
        return t.reshape(B, N, num_heads, hd).transpose(0, 2, 1, 3)

    qh, kh, vh = split_heads(q), split_heads(k), split_heads(v)
    attn = jnp.einsum("bhqd,bhkd->bhqk", qh, kh) * scale
    attn = jax.nn.softmax(attn, axis=-1)
    out = jnp.einsum("bhqk,bhkd->bhqd", attn, vh)
    out = out.transpose(0, 2, 1, 3).reshape(B, N, C)
    y = out @ p["wp"] + p["bp"]
    y = y + adapt(y, 3)
    return y


def make_params(key, C, r, num_adapters=4):
    ks = jax.random.split(key, 8)
    std_main = 0.02
    std_houlsby = 0.01
    return {
        # linear weights stored pre-transposed: (in, out)
        "wqkv": jax.random.normal(ks[0], (C, 3 * C), jnp.float32) * std_main,
        "bqkv": jax.random.normal(ks[1], (1, 3 * C), jnp.float32) * std_main,
        "wp": jax.random.normal(ks[2], (C, C), jnp.float32) * std_main,
        "bp": jax.random.normal(ks[3], (1, C), jnp.float32) * std_main,
        # stacked adapter params, order: q, k, v, o
        "ln_g": jnp.ones((num_adapters, C), jnp.float32)
                + 0.01 * jax.random.normal(ks[4], (num_adapters, C), jnp.float32),
        "ln_b": 0.01 * jax.random.normal(ks[5], (num_adapters, C), jnp.float32),
        "wd": jax.random.normal(ks[6], (num_adapters, C, r), jnp.float32) * std_houlsby,
        "bd": jnp.zeros((num_adapters, 1, r), jnp.float32),
        "wu": jax.random.normal(ks[7], (num_adapters, r, C), jnp.float32) * std_houlsby,
        "bu": jnp.zeros((num_adapters, 1, C), jnp.float32),
        "adapter_scaling": 1.0,
    }


if __name__ == "__main__":
    # Small demo shapes: 8 batch x 16 tokens x 64 channels, 4 heads, r = 4.
    # The default block_b heuristic picks block_b=2 -> grid=(4,) "parallel"
    # steps (>= 2 per TensorCore on v7x) with M = 32 token rows per step.
    # TODO(synk): production sizing should use C / N multiples of 128 (lane
    # dense q/k/v slices and score matrices); these demo shapes under-fill
    # every unit and must not drive any tuning decision.
    B, N, C = 8, 16, 64
    num_heads = 4
    r = 4

    key = jax.random.PRNGKey(0)
    kx, kparam = jax.random.split(key)
    x = jax.random.normal(kx, (B, N, C), jnp.float32)
    params = make_params(kparam, C, r)

    out = lora_attention(x, params, num_heads=num_heads)
    out = jax.block_until_ready(out)

    ref = reference(x, params, num_heads=num_heads)
    assert out.shape == (B, N, C)
    # bf16 matmul operands + bf16 token streaming + approx-reciprocal softmax
    # => looser tolerance than the pure-f32 reference.
    err = float(jnp.max(jnp.abs(out - ref)))
    assert jnp.allclose(out, ref, atol=2e-2, rtol=2e-2), f"max abs err {err}"

    print("KERNEL_OK")
</pallas_src>

<mosaic_0001>
module attributes {stable_mosaic.version = 11 : i64} {
  func.func @kernel(%arg0: i32, %arg1: memref<32x64xbf16, #tpu.memory_space<vmem>>, %arg2: memref<3x64x64xbf16, #tpu.memory_space<vmem>>, %arg3: memref<3x1x64xf32, #tpu.memory_space<vmem>>, %arg4: memref<64x12xbf16, #tpu.memory_space<vmem>>, %arg5: memref<1x12xf32, #tpu.memory_space<vmem>>, %arg6: memref<3x12x64xbf16, #tpu.memory_space<vmem>>, %arg7: memref<4x16x64xbf16, #tpu.memory_space<vmem>>, %arg8: memref<1x64xf32, #tpu.memory_space<vmem>>, %arg9: memref<64x4xbf16, #tpu.memory_space<vmem>>, %arg10: memref<1x4xf32, #tpu.memory_space<vmem>>, %arg11: memref<4x64xbf16, #tpu.memory_space<vmem>>, %arg12: memref<1x64xf32, #tpu.memory_space<vmem>>, %arg13: memref<32x64xf32, #tpu.memory_space<vmem>>) attributes {dimension_semantics = [#tpu.dimension_semantics<parallel>], iteration_bounds = array<i64: 4>, scalar_prefetch = 0 : i64, scratch_operands = 0 : i64, tpu.core_type = #tpu.core_type<tc>, window_params = [{transform_indices = @transform_0, window_bounds = array<i64: 32, 64>}, {pipeline_mode = #tpu.pipeline_mode<synchronous>, transform_indices = @transform_1, window_bounds = array<i64: 3, 64, 64>}, {pipeline_mode = #tpu.pipeline_mode<synchronous>, transform_indices = @transform_2, window_bounds = array<i64: 3, 1, 64>}, {pipeline_mode = #tpu.pipeline_mode<synchronous>, transform_indices = @transform_3, window_bounds = array<i64: 64, 12>}, {pipeline_mode = #tpu.pipeline_mode<synchronous>, transform_indices = @transform_4, window_bounds = array<i64: 1, 12>}, {pipeline_mode = #tpu.pipeline_mode<synchronous>, transform_indices = @transform_5, window_bounds = array<i64: 3, 12, 64>}, {pipeline_mode = #tpu.pipeline_mode<synchronous>, transform_indices = @transform_6, window_bounds = array<i64: 4, 16, 64>}, {pipeline_mode = #tpu.pipeline_mode<synchronous>, transform_indices = @transform_7, window_bounds = array<i64: 1, 64>}, {pipeline_mode = #tpu.pipeline_mode<synchronous>, transform_indices = @transform_8, window_bounds = array<i64: 64, 4>}, {pipeline_mode = #tpu.pipeline_mode<synchronous>, transform_indices = @transform_9, window_bounds = array<i64: 1, 4>}, {pipeline_mode = #tpu.pipeline_mode<synchronous>, transform_indices = @transform_10, window_bounds = array<i64: 4, 64>}, {pipeline_mode = #tpu.pipeline_mode<synchronous>, transform_indices = @transform_11, window_bounds = array<i64: 1, 64>}, {transform_indices = @transform_12, window_bounds = array<i64: 32, 64>}]} {
    %c0 = arith.constant 0 : index
    %c0_0 = arith.constant 0 : index
    %0 = vector.load %arg1[%c0, %c0_0] : memref<32x64xbf16, #tpu.memory_space<vmem>>, vector<32x64xbf16>
    %1 = arith.extf %0 : vector<32x64xbf16> to vector<32x64xf32>
    %cst = arith.constant dense<0.000000e+00> : vector<32xf32>
    %2 = vector.multi_reduction <add>, %1, %cst [1] : vector<32x64xf32> to vector<32xf32>
    %3 = vector.shape_cast %2 : vector<32xf32> to vector<32x1xf32>
    %cst_1 = arith.constant 6.400000e+01 : f32
    %4 = vector.broadcast %cst_1 : f32 to vector<32x1xf32>
    %5 = arith.divf %3, %4 : vector<32x1xf32>
    %6 = vector.broadcast %5 : vector<32x1xf32> to vector<32x64xf32>
    %7 = arith.subf %1, %6 : vector<32x64xf32>
    %8 = arith.mulf %7, %7 : vector<32x64xf32>
    %cst_2 = arith.constant dense<0.000000e+00> : vector<32xf32>
    %9 = vector.multi_reduction <add>, %8, %cst_2 [1] : vector<32x64xf32> to vector<32xf32>
    %10 = vector.shape_cast %9 : vector<32xf32> to vector<32x1xf32>
    %cst_3 = arith.constant 6.400000e+01 : f32
    %11 = vector.broadcast %cst_3 : f32 to vector<32x1xf32>
    %12 = arith.divf %10, %11 : vector<32x1xf32>
    %13 = vector.broadcast %5 : vector<32x1xf32> to vector<32x64xf32>
    %14 = arith.subf %1, %13 : vector<32x64xf32>
    %cst_4 = arith.constant 9.99999974E-6 : f32
    %15 = vector.broadcast %cst_4 : f32 to vector<32x1xf32>
    %16 = arith.addf %12, %15 : vector<32x1xf32>
    %17 = math.rsqrt %16 : vector<32x1xf32>
    %18 = vector.broadcast %17 : vector<32x1xf32> to vector<32x64xf32>
    %19 = arith.mulf %14, %18 : vector<32x64xf32>
    %20 = arith.truncf %19 : vector<32x64xf32> to vector<32x64xbf16>
    %c0_5 = arith.constant 0 : index
    %c0_6 = arith.constant 0 : index
    %21 = vector.load %arg4[%c0_5, %c0_6] : memref<64x12xbf16, #tpu.memory_space<vmem>>, vector<64x12xbf16>
    %cst_7 = arith.constant dense<0.000000e+00> : vector<32x12xf32>
    %22 = tpu.matmul %20, %21, %cst_7 {dimension_numbers = #tpu.dot_dimension_numbers<[1], [0], [0], [1], [0, 0, 1, 1], [], []>} : vector<32x64xbf16>, vector<64x12xbf16>, vector<32x12xf32> -> vector<32x12xf32>
    %c0_8 = arith.constant 0 : index
    %c0_9 = arith.constant 0 : index
    %23 = vector.load %arg5[%c0_8, %c0_9] : memref<1x12xf32, #tpu.memory_space<vmem>>, vector<1x12xf32>
    %24 = vector.broadcast %23 : vector<1x12xf32> to vector<32x12xf32>
    %25 = arith.addf %22, %24 : vector<32x12xf32>
    %cst_10 = arith.constant 5.000000e-01 : f32
    %26 = vector.broadcast %cst_10 : f32 to vector<32x12xf32>
    %27 = arith.mulf %26, %25 : vector<32x12xf32>
    %cst_11 = arith.constant 0.707106769 : f32
    %28 = vector.broadcast %cst_11 : f32 to vector<32x12xf32>
    %29 = arith.mulf %25, %28 : vector<32x12xf32>
    %30 = math.absf %29 : vector<32x12xf32>
    %cst_12 = arith.constant 0.327591091 : f32
    %31 = vector.broadcast %cst_12 : f32 to vector<32x12xf32>
    %32 = arith.mulf %31, %30 : vector<32x12xf32>
    %cst_13 = arith.constant 1.000000e+00 : f32
    %33 = vector.broadcast %cst_13 : f32 to vector<32x12xf32>
    %34 = arith.addf %33, %32 : vector<32x12xf32>
    %cst_14 = arith.constant 1.000000e+00 : f32
    %35 = vector.broadcast %cst_14 : f32 to vector<32x12xf32>
    %36 = arith.divf %35, %34 : vector<32x12xf32>
    %cst_15 = arith.constant 1.06140542 : f32
    %37 = vector.broadcast %cst_15 : f32 to vector<32x12xf32>
    %38 = arith.mulf %37, %36 : vector<32x12xf32>
    %cst_16 = arith.constant -1.45315206 : f32
    %39 = vector.broadcast %cst_16 : f32 to vector<32x12xf32>
    %40 = arith.addf %38, %39 : vector<32x12xf32>
    %41 = arith.mulf %40, %36 : vector<32x12xf32>
    %cst_17 = arith.constant 1.42141378 : f32
    %42 = vector.broadcast %cst_17 : f32 to vector<32x12xf32>
    %43 = arith.addf %41, %42 : vector<32x12xf32>
    %44 = arith.mulf %43, %36 : vector<32x12xf32>
    %cst_18 = arith.constant -0.284496725 : f32
    %45 = vector.broadcast %cst_18 : f32 to vector<32x12xf32>
    %46 = arith.addf %44, %45 : vector<32x12xf32>
    %47 = arith.mulf %46, %36 : vector<32x12xf32>
    %cst_19 = arith.constant 0.254829586 : f32
    %48 = vector.broadcast %cst_19 : f32 to vector<32x12xf32>
    %49 = arith.addf %47, %48 : vector<32x12xf32>
    %50 = arith.mulf %49, %36 : vector<32x12xf32>
    %cst_20 = arith.constant 0.000000e+00 : f32
    %51 = vector.broadcast %cst_20 : f32 to vector<32x12xf32>
    %52 = arith.subf %51, %30 : vector<32x12xf32>
    %53 = arith.mulf %52, %30 : vector<32x12xf32>
    %54 = math.exp %53 : vector<32x12xf32>
    %55 = arith.mulf %50, %54 : vector<32x12xf32>
    %cst_21 = arith.constant 1.000000e+00 : f32
    %56 = vector.broadcast %cst_21 : f32 to vector<32x12xf32>
    %57 = arith.subf %56, %55 : vector<32x12xf32>
    %cst_22 = arith.constant 0.000000e+00 : f32
    %58 = vector.broadcast %cst_22 : f32 to vector<32x12xf32>
    %59 = arith.cmpf oge, %29, %58 : vector<32x12xf32>
    %cst_23 = arith.constant 0.000000e+00 : f32
    %60 = vector.broadcast %cst_23 : f32 to vector<32x12xf32>
    %61 = arith.subf %60, %57 : vector<32x12xf32>
    %62 = arith.select %59, %57, %61 : vector<32x12xi1>, vector<32x12xf32>
    %cst_24 = arith.constant 1.000000e+00 : f32
    %63 = vector.broadcast %cst_24 : f32 to vector<32x12xf32>
    %64 = arith.addf %63, %62 : vector<32x12xf32>
    %65 = arith.mulf %27, %64 : vector<32x12xf32>
    %66 = arith.truncf %65 : vector<32x12xf32> to vector<32x12xbf16>
    %c0_25 = arith.constant 0 : index
    %c0_26 = arith.constant 0 : index
    %c0_27 = arith.constant 0 : index
    %67 = vector.load %arg2[%c0_25, %c0_26, %c0_27] : memref<3x64x64xbf16, #tpu.memory_space<vmem>>, vector<1x64x64xbf16>
    %68 = vector.shape_cast %67 : vector<1x64x64xbf16> to vector<64x64xbf16>
    %cst_28 = arith.constant dense<0.000000e+00> : vector<32x64xf32>
    %69 = tpu.matmul %0, %68, %cst_28 {dimension_numbers = #tpu.dot_dimension_numbers<[1], [0], [0], [1], [0, 0, 1, 1], [], []>} : vector<32x64xbf16>, vector<64x64xbf16>, vector<32x64xf32> -> vector<32x64xf32>
    %c0_29 = arith.constant 0 : index
    %c0_30 = arith.constant 0 : index
    %c0_31 = arith.constant 0 : index
    %70 = vector.load %arg6[%c0_29, %c0_30, %c0_31] : memref<3x12x64xbf16, #tpu.memory_space<vmem>>, vector<1x12x64xbf16>
    %71 = vector.shape_cast %70 : vector<1x12x64xbf16> to vector<12x64xbf16>
    %cst_32 = arith.constant dense<0.000000e+00> : vector<32x64xf32>
    %72 = tpu.matmul %66, %71, %cst_32 {dimension_numbers = #tpu.dot_dimension_numbers<[1], [0], [0], [1], [0, 0, 1, 1], [], []>} : vector<32x12xbf16>, vector<12x64xbf16>, vector<32x64xf32> -> vector<32x64xf32>
    %73 = arith.addf %69, %72 : vector<32x64xf32>
    %c0_33 = arith.constant 0 : index
    %c0_34 = arith.constant 0 : index
    %c0_35 = arith.constant 0 : index
    %74 = vector.load %arg3[%c0_33, %c0_34, %c0_35] : memref<3x1x64xf32, #tpu.memory_space<vmem>>, vector<1x1x64xf32>
    %75 = vector.shape_cast %74 : vector<1x1x64xf32> to vector<1x64xf32>
    %76 = vector.broadcast %75 : vector<1x64xf32> to vector<32x64xf32>
    %77 = arith.addf %73, %76 : vector<32x64xf32>
    %78 = arith.truncf %77 : vector<32x64xf32> to vector<32x64xbf16>
    %79 = vector.shape_cast %78 : vector<32x64xbf16> to vector<2x16x64xbf16>
    %c1 = arith.constant 1 : index
    %c0_36 = arith.constant 0 : index
    %c0_37 = arith.constant 0 : index
    %80 = vector.load %arg2[%c1, %c0_36, %c0_37] : memref<3x64x64xbf16, #tpu.memory_space<vmem>>, vector<1x64x64xbf16>
    %81 = vector.shape_cast %80 : vector<1x64x64xbf16> to vector<64x64xbf16>
    %cst_38 = arith.constant dense<0.000000e+00> : vector<32x64xf32>
    %82 = tpu.matmul %0, %81, %cst_38 {dimension_numbers = #tpu.dot_dimension_numbers<[1], [0], [0], [1], [0, 0, 1, 1], [], []>} : vector<32x64xbf16>, vector<64x64xbf16>, vector<32x64xf32> -> vector<32x64xf32>
    %c1_39 = arith.constant 1 : index
    %c0_40 = arith.constant 0 : index
    %c0_41 = arith.constant 0 : index
    %83 = vector.load %arg6[%c1_39, %c0_40, %c0_41] : memref<3x12x64xbf16, #tpu.memory_space<vmem>>, vector<1x12x64xbf16>
    %84 = vector.shape_cast %83 : vector<1x12x64xbf16> to vector<12x64xbf16>
    %cst_42 = arith.constant dense<0.000000e+00> : vector<32x64xf32>
    %85 = tpu.matmul %66, %84, %cst_42 {dimension_numbers = #tpu.dot_dimension_numbers<[1], [0], [0], [1], [0, 0, 1, 1], [], []>} : vector<32x12xbf16>, vector<12x64xbf16>, vector<32x64xf32> -> vector<32x64xf32>
    %86 = arith.addf %82, %85 : vector<32x64xf32>
    %c1_43 = arith.constant 1 : index
    %c0_44 = arith.constant 0 : index
    %c0_45 = arith.constant 0 : index
    %87 = vector.load %arg3[%c1_43, %c0_44, %c0_45] : memref<3x1x64xf32, #tpu.memory_space<vmem>>, vector<1x1x64xf32>
    %88 = vector.shape_cast %87 : vector<1x1x64xf32> to vector<1x64xf32>
    %89 = vector.broadcast %88 : vector<1x64xf32> to vector<32x64xf32>
    %90 = arith.addf %86, %89 : vector<32x64xf32>
    %91 = arith.truncf %90 : vector<32x64xf32> to vector<32x64xbf16>
    %92 = vector.shape_cast %91 : vector<32x64xbf16> to vector<2x16x64xbf16>
    %c2 = arith.constant 2 : index
    %c0_46 = arith.constant 0 : index
    %c0_47 = arith.constant 0 : index
    %93 = vector.load %arg2[%c2, %c0_46, %c0_47] : memref<3x64x64xbf16, #tpu.memory_space<vmem>>, vector<1x64x64xbf16>
    %94 = vector.shape_cast %93 : vector<1x64x64xbf16> to vector<64x64xbf16>
    %cst_48 = arith.constant dense<0.000000e+00> : vector<32x64xf32>
    %95 = tpu.matmul %0, %94, %cst_48 {dimension_numbers = #tpu.dot_dimension_numbers<[1], [0], [0], [1], [0, 0, 1, 1], [], []>} : vector<32x64xbf16>, vector<64x64xbf16>, vector<32x64xf32> -> vector<32x64xf32>
    %c2_49 = arith.constant 2 : index
    %c0_50 = arith.constant 0 : index
    %c0_51 = arith.constant 0 : index
    %96 = vector.load %arg6[%c2_49, %c0_50, %c0_51] : memref<3x12x64xbf16, #tpu.memory_space<vmem>>, vector<1x12x64xbf16>
    %97 = vector.shape_cast %96 : vector<1x12x64xbf16> to vector<12x64xbf16>
    %cst_52 = arith.constant dense<0.000000e+00> : vector<32x64xf32>
    %98 = tpu.matmul %66, %97, %cst_52 {dimension_numbers = #tpu.dot_dimension_numbers<[1], [0], [0], [1], [0, 0, 1, 1], [], []>} : vector<32x12xbf16>, vector<12x64xbf16>, vector<32x64xf32> -> vector<32x64xf32>
    %99 = arith.addf %95, %98 : vector<32x64xf32>
    %c2_53 = arith.constant 2 : index
    %c0_54 = arith.constant 0 : index
    %c0_55 = arith.constant 0 : index
    %100 = vector.load %arg3[%c2_53, %c0_54, %c0_55] : memref<3x1x64xf32, #tpu.memory_space<vmem>>, vector<1x1x64xf32>
    %101 = vector.shape_cast %100 : vector<1x1x64xf32> to vector<1x64xf32>
    %102 = vector.broadcast %101 : vector<1x64xf32> to vector<32x64xf32>
    %103 = arith.addf %99, %102 : vector<32x64xf32>
    %104 = arith.truncf %103 : vector<32x64xf32> to vector<32x64xbf16>
    %105 = vector.shape_cast %104 : vector<32x64xbf16> to vector<2x16x64xbf16>
    %106 = vector.extract_strided_slice %79 {offsets = [0, 0, 0], sizes = [2, 16, 16], strides = [1, 1, 1]} : vector<2x16x64xbf16> to vector<2x16x16xbf16>
    %107 = vector.extract_strided_slice %92 {offsets = [0, 0, 0], sizes = [2, 16, 16], strides = [1, 1, 1]} : vector<2x16x64xbf16> to vector<2x16x16xbf16>
    %108 = vector.extract_strided_slice %105 {offsets = [0, 0, 0], sizes = [2, 16, 16], strides = [1, 1, 1]} : vector<2x16x64xbf16> to vector<2x16x16xbf16>
    "tpu.trace_start"() <{level = 10 : i32, message = "bqd,bkd->bqk"}> : () -> ()
    %cst_56 = arith.constant dense<0.000000e+00> : vector<2x16x16xf32>
    %109 = tpu.matmul %106, %107, %cst_56 {dimension_numbers = #tpu.dot_dimension_numbers<[2], [2], [1], [1], [0, 0, 0, 1, 1, 1], [0], [0]>} : vector<2x16x16xbf16>, vector<2x16x16xbf16>, vector<2x16x16xf32> -> vector<2x16x16xf32>
    "tpu.trace_stop"() : () -> ()
    %cst_57 = arith.constant dense<0xFF800000> : vector<2x16xf32>
    %110 = vector.multi_reduction <maximumf>, %109, %cst_57 [2] : vector<2x16x16xf32> to vector<2x16xf32>
    %111 = vector.shape_cast %110 : vector<2x16xf32> to vector<2x16x1xf32>
    %112 = vector.broadcast %111 : vector<2x16x1xf32> to vector<2x16x16xf32>
    %113 = arith.subf %109, %112 : vector<2x16x16xf32>
    %114 = math.exp %113 : vector<2x16x16xf32>
    %cst_58 = arith.constant dense<0.000000e+00> : vector<2x16xf32>
    %115 = vector.multi_reduction <add>, %114, %cst_58 [2] : vector<2x16x16xf32> to vector<2x16xf32>
    %116 = vector.shape_cast %115 : vector<2x16xf32> to vector<2x16x1xf32>
    %117 = tpu.reciprocal %116 {approx = true} : vector<2x16x1xf32> -> vector<2x16x1xf32>
    %118 = vector.broadcast %117 : vector<2x16x1xf32> to vector<2x16x16xf32>
    %119 = arith.mulf %114, %118 : vector<2x16x16xf32>
    %120 = arith.truncf %119 : vector<2x16x16xf32> to vector<2x16x16xbf16>
    "tpu.trace_start"() <{level = 10 : i32, message = "bqk,bkd->bqd"}> : () -> ()
    %cst_59 = arith.constant dense<0.000000e+00> : vector<2x16x16xf32>
    %121 = tpu.matmul %120, %108, %cst_59 {dimension_numbers = #tpu.dot_dimension_numbers<[2], [1], [1], [2], [0, 0, 0, 1, 1, 2], [0], [0]>} : vector<2x16x16xbf16>, vector<2x16x16xbf16>, vector<2x16x16xf32> -> vector<2x16x16xf32>
    "tpu.trace_stop"() : () -> ()
    %122 = arith.truncf %121 : vector<2x16x16xf32> to vector<2x16x16xbf16>
    %123 = vector.shape_cast %122 : vector<2x16x16xbf16> to vector<32x16xbf16>
    %c0_60 = arith.constant 0 : index
    %c0_61 = arith.constant 0 : index
    %c0_62 = arith.constant 0 : index
    %124 = vector.load %arg7[%c0_60, %c0_61, %c0_62] : memref<4x16x64xbf16, #tpu.memory_space<vmem>>, vector<1x16x64xbf16>
    %125 = vector.shape_cast %124 : vector<1x16x64xbf16> to vector<16x64xbf16>
    %cst_63 = arith.constant dense<0.000000e+00> : vector<32x64xf32>
    %126 = tpu.matmul %123, %125, %cst_63 {dimension_numbers = #tpu.dot_dimension_numbers<[1], [0], [0], [1], [0, 0, 1, 1], [], []>} : vector<32x16xbf16>, vector<16x64xbf16>, vector<32x64xf32> -> vector<32x64xf32>
    %127 = vector.extract_strided_slice %79 {offsets = [0, 0, 16], sizes = [2, 16, 16], strides = [1, 1, 1]} : vector<2x16x64xbf16> to vector<2x16x16xbf16>
    %128 = vector.extract_strided_slice %92 {offsets = [0, 0, 16], sizes = [2, 16, 16], strides = [1, 1, 1]} : vector<2x16x64xbf16> to vector<2x16x16xbf16>
    %129 = vector.extract_strided_slice %105 {offsets = [0, 0, 16], sizes = [2, 16, 16], strides = [1, 1, 1]} : vector<2x16x64xbf16> to vector<2x16x16xbf16>
    "tpu.trace_start"() <{level = 10 : i32, message = "bqd,bkd->bqk"}> : () -> ()
    %cst_64 = arith.constant dense<0.000000e+00> : vector<2x16x16xf32>
    %130 = tpu.matmul %127, %128, %cst_64 {dimension_numbers = #tpu.dot_dimension_numbers<[2], [2], [1], [1], [0, 0, 0, 1, 1, 1], [0], [0]>} : vector<2x16x16xbf16>, vector<2x16x16xbf16>, vector<2x16x16xf32> -> vector<2x16x16xf32>
    "tpu.trace_stop"() : () -> ()
    %cst_65 = arith.constant dense<0xFF800000> : vector<2x16xf32>
    %131 = vector.multi_reduction <maximumf>, %130, %cst_65 [2] : vector<2x16x16xf32> to vector<2x16xf32>
    %132 = vector.shape_cast %131 : vector<2x16xf32> to vector<2x16x1xf32>
    %133 = vector.broadcast %132 : vector<2x16x1xf32> to vector<2x16x16xf32>
    %134 = arith.subf %130, %133 : vector<2x16x16xf32>
    %135 = math.exp %134 : vector<2x16x16xf32>
    %cst_66 = arith.constant dense<0.000000e+00> : vector<2x16xf32>
    %136 = vector.multi_reduction <add>, %135, %cst_66 [2] : vector<2x16x16xf32> to vector<2x16xf32>
    %137 = vector.shape_cast %136 : vector<2x16xf32> to vector<2x16x1xf32>
    %138 = tpu.reciprocal %137 {approx = true} : vector<2x16x1xf32> -> vector<2x16x1xf32>
    %139 = vector.broadcast %138 : vector<2x16x1xf32> to vector<2x16x16xf32>
    %140 = arith.mulf %135, %139 : vector<2x16x16xf32>
    %141 = arith.truncf %140 : vector<2x16x16xf32> to vector<2x16x16xbf16>
    "tpu.trace_start"() <{level = 10 : i32, message = "bqk,bkd->bqd"}> : () -> ()
    %cst_67 = arith.constant dense<0.000000e+00> : vector<2x16x16xf32>
    %142 = tpu.matmul %141, %129, %cst_67 {dimension_numbers = #tpu.dot_dimension_numbers<[2], [1], [1], [2], [0, 0, 0, 1, 1, 2], [0], [0]>} : vector<2x16x16xbf16>, vector<2x16x16xbf16>, vector<2x16x16xf32> -> vector<2x16x16xf32>
    "tpu.trace_stop"() : () -> ()
    %143 = arith.truncf %142 : vector<2x16x16xf32> to vector<2x16x16xbf16>
    %144 = vector.shape_cast %143 : vector<2x16x16xbf16> to vector<32x16xbf16>
    %c1_68 = arith.constant 1 : index
    %c0_69 = arith.constant 0 : index
    %c0_70 = arith.constant 0 : index
    %145 = vector.load %arg7[%c1_68, %c0_69, %c0_70] : memref<4x16x64xbf16, #tpu.memory_space<vmem>>, vector<1x16x64xbf16>
    %146 = vector.shape_cast %145 : vector<1x16x64xbf16> to vector<16x64xbf16>
    %cst_71 = arith.constant dense<0.000000e+00> : vector<32x64xf32>
    %147 = tpu.matmul %144, %146, %cst_71 {dimension_numbers = #tpu.dot_dimension_numbers<[1], [0], [0], [1], [0, 0, 1, 1], [], []>} : vector<32x16xbf16>, vector<16x64xbf16>, vector<32x64xf32> -> vector<32x64xf32>
    %148 = arith.addf %126, %147 : vector<32x64xf32>
    %149 = vector.extract_strided_slice %79 {offsets = [0, 0, 32], sizes = [2, 16, 16], strides = [1, 1, 1]} : vector<2x16x64xbf16> to vector<2x16x16xbf16>
    %150 = vector.extract_strided_slice %92 {offsets = [0, 0, 32], sizes = [2, 16, 16], strides = [1, 1, 1]} : vector<2x16x64xbf16> to vector<2x16x16xbf16>
    %151 = vector.extract_strided_slice %105 {offsets = [0, 0, 32], sizes = [2, 16, 16], strides = [1, 1, 1]} : vector<2x16x64xbf16> to vector<2x16x16xbf16>
    "tpu.trace_start"() <{level = 10 : i32, message = "bqd,bkd->bqk"}> : () -> ()
    %cst_72 = arith.constant dense<0.000000e+00> : vector<2x16x16xf32>
    %152 = tpu.matmul %149, %150, %cst_72 {dimension_numbers = #tpu.dot_dimension_numbers<[2], [2], [1], [1], [0, 0, 0, 1, 1, 1], [0], [0]>} : vector<2x16x16xbf16>, vector<2x16x16xbf16>, vector<2x16x16xf32> -> vector<2x16x16xf32>
    "tpu.trace_stop"() : () -> ()
    %cst_73 = arith.constant dense<0xFF800000> : vector<2x16xf32>
    %153 = vector.multi_reduction <maximumf>, %152, %cst_73 [2] : vector<2x16x16xf32> to vector<2x16xf32>
    %154 = vector.shape_cast %153 : vector<2x16xf32> to vector<2x16x1xf32>
    %155 = vector.broadcast %154 : vector<2x16x1xf32> to vector<2x16x16xf32>
    %156 = arith.subf %152, %155 : vector<2x16x16xf32>
    %157 = math.exp %156 : vector<2x16x16xf32>
    %cst_74 = arith.constant dense<0.000000e+00> : vector<2x16xf32>
    %158 = vector.multi_reduction <add>, %157, %cst_74 [2] : vector<2x16x16xf32> to vector<2x16xf32>
    %159 = vector.shape_cast %158 : vector<2x16xf32> to vector<2x16x1xf32>
    %160 = tpu.reciprocal %159 {approx = true} : vector<2x16x1xf32> -> vector<2x16x1xf32>
    %161 = vector.broadcast %160 : vector<2x16x1xf32> to vector<2x16x16xf32>
    %162 = arith.mulf %157, %161 : vector<2x16x16xf32>
    %163 = arith.truncf %162 : vector<2x16x16xf32> to vector<2x16x16xbf16>
    "tpu.trace_start"() <{level = 10 : i32, message = "bqk,bkd->bqd"}> : () -> ()
    %cst_75 = arith.constant dense<0.000000e+00> : vector<2x16x16xf32>
    %164 = tpu.matmul %163, %151, %cst_75 {dimension_numbers = #tpu.dot_dimension_numbers<[2], [1], [1], [2], [0, 0, 0, 1, 1, 2], [0], [0]>} : vector<2x16x16xbf16>, vector<2x16x16xbf16>, vector<2x16x16xf32> -> vector<2x16x16xf32>
    "tpu.trace_stop"() : () -> ()
    %165 = arith.truncf %164 : vector<2x16x16xf32> to vector<2x16x16xbf16>
    %166 = vector.shape_cast %165 : vector<2x16x16xbf16> to vector<32x16xbf16>
    %c2_76 = arith.constant 2 : index
    %c0_77 = arith.constant 0 : index
    %c0_78 = arith.constant 0 : index
    %167 = vector.load %arg7[%c2_76, %c0_77, %c0_78] : memref<4x16x64xbf16, #tpu.memory_space<vmem>>, vector<1x16x64xbf16>
    %168 = vector.shape_cast %167 : vector<1x16x64xbf16> to vector<16x64xbf16>
    %cst_79 = arith.constant dense<0.000000e+00> : vector<32x64xf32>
    %169 = tpu.matmul %166, %168, %cst_79 {dimension_numbers = #tpu.dot_dimension_numbers<[1], [0], [0], [1], [0, 0, 1, 1], [], []>} : vector<32x16xbf16>, vector<16x64xbf16>, vector<32x64xf32> -> vector<32x64xf32>
    %170 = arith.addf %148, %169 : vector<32x64xf32>
    %171 = vector.extract_strided_slice %79 {offsets = [0, 0, 48], sizes = [2, 16, 16], strides = [1, 1, 1]} : vector<2x16x64xbf16> to vector<2x16x16xbf16>
    %172 = vector.extract_strided_slice %92 {offsets = [0, 0, 48], sizes = [2, 16, 16], strides = [1, 1, 1]} : vector<2x16x64xbf16> to vector<2x16x16xbf16>
    %173 = vector.extract_strided_slice %105 {offsets = [0, 0, 48], sizes = [2, 16, 16], strides = [1, 1, 1]} : vector<2x16x64xbf16> to vector<2x16x16xbf16>
    "tpu.trace_start"() <{level = 10 : i32, message = "bqd,bkd->bqk"}> : () -> ()
    %cst_80 = arith.constant dense<0.000000e+00> : vector<2x16x16xf32>
    %174 = tpu.matmul %171, %172, %cst_80 {dimension_numbers = #tpu.dot_dimension_numbers<[2], [2], [1], [1], [0, 0, 0, 1, 1, 1], [0], [0]>} : vector<2x16x16xbf16>, vector<2x16x16xbf16>, vector<2x16x16xf32> -> vector<2x16x16xf32>
    "tpu.trace_stop"() : () -> ()
    %cst_81 = arith.constant dense<0xFF800000> : vector<2x16xf32>
    %175 = vector.multi_reduction <maximumf>, %174, %cst_81 [2] : vector<2x16x16xf32> to vector<2x16xf32>
    %176 = vector.shape_cast %175 : vector<2x16xf32> to vector<2x16x1xf32>
    %177 = vector.broadcast %176 : vector<2x16x1xf32> to vector<2x16x16xf32>
    %178 = arith.subf %174, %177 : vector<2x16x16xf32>
    %179 = math.exp %178 : vector<2x16x16xf32>
    %cst_82 = arith.constant dense<0.000000e+00> : vector<2x16xf32>
    %180 = vector.multi_reduction <add>, %179, %cst_82 [2] : vector<2x16x16xf32> to vector<2x16xf32>
    %181 = vector.shape_cast %180 : vector<2x16xf32> to vector<2x16x1xf32>
    %182 = tpu.reciprocal %181 {approx = true} : vector<2x16x1xf32> -> vector<2x16x1xf32>
    %183 = vector.broadcast %182 : vector<2x16x1xf32> to vector<2x16x16xf32>
    %184 = arith.mulf %179, %183 : vector<2x16x16xf32>
    %185 = arith.truncf %184 : vector<2x16x16xf32> to vector<2x16x16xbf16>
    "tpu.trace_start"() <{level = 10 : i32, message = "bqk,bkd->bqd"}> : () -> ()
    %cst_83 = arith.constant dense<0.000000e+00> : vector<2x16x16xf32>
    %186 = tpu.matmul %185, %173, %cst_83 {dimension_numbers = #tpu.dot_dimension_numbers<[2], [1], [1], [2], [0, 0, 0, 1, 1, 2], [0], [0]>} : vector<2x16x16xbf16>, vector<2x16x16xbf16>, vector<2x16x16xf32> -> vector<2x16x16xf32>
    "tpu.trace_stop"() : () -> ()
    %187 = arith.truncf %186 : vector<2x16x16xf32> to vector<2x16x16xbf16>
    %188 = vector.shape_cast %187 : vector<2x16x16xbf16> to vector<32x16xbf16>
    %c3 = arith.constant 3 : index
    %c0_84 = arith.constant 0 : index
    %c0_85 = arith.constant 0 : index
    %189 = vector.load %arg7[%c3, %c0_84, %c0_85] : memref<4x16x64xbf16, #tpu.memory_space<vmem>>, vector<1x16x64xbf16>
    %190 = vector.shape_cast %189 : vector<1x16x64xbf16> to vector<16x64xbf16>
    %cst_86 = arith.constant dense<0.000000e+00> : vector<32x64xf32>
    %191 = tpu.matmul %188, %190, %cst_86 {dimension_numbers = #tpu.dot_dimension_numbers<[1], [0], [0], [1], [0, 0, 1, 1], [], []>} : vector<32x16xbf16>, vector<16x64xbf16>, vector<32x64xf32> -> vector<32x64xf32>
    %192 = arith.addf %170, %191 : vector<32x64xf32>
    %c0_87 = arith.constant 0 : index
    %c0_88 = arith.constant 0 : index
    %193 = vector.load %arg8[%c0_87, %c0_88] : memref<1x64xf32, #tpu.memory_space<vmem>>, vector<1x64xf32>
    %194 = vector.broadcast %193 : vector<1x64xf32> to vector<32x64xf32>
    %195 = arith.addf %192, %194 : vector<32x64xf32>
    %cst_89 = arith.constant dense<0.000000e+00> : vector<32xf32>
    %196 = vector.multi_reduction <add>, %195, %cst_89 [1] : vector<32x64xf32> to vector<32xf32>
    %197 = vector.shape_cast %196 : vector<32xf32> to vector<32x1xf32>
    %cst_90 = arith.constant 6.400000e+01 : f32
    %198 = vector.broadcast %cst_90 : f32 to vector<32x1xf32>
    %199 = arith.divf %197, %198 : vector<32x1xf32>
    %200 = vector.broadcast %199 : vector<32x1xf32> to vector<32x64xf32>
    %201 = arith.subf %195, %200 : vector<32x64xf32>
    %202 = arith.mulf %201, %201 : vector<32x64xf32>
    %cst_91 = arith.constant dense<0.000000e+00> : vector<32xf32>
    %203 = vector.multi_reduction <add>, %202, %cst_91 [1] : vector<32x64xf32> to vector<32xf32>
    %204 = vector.shape_cast %203 : vector<32xf32> to vector<32x1xf32>
    %cst_92 = arith.constant 6.400000e+01 : f32
    %205 = vector.broadcast %cst_92 : f32 to vector<32x1xf32>
    %206 = arith.divf %204, %205 : vector<32x1xf32>
    %207 = vector.broadcast %199 : vector<32x1xf32> to vector<32x64xf32>
    %208 = arith.subf %195, %207 : vector<32x64xf32>
    %cst_93 = arith.constant 9.99999974E-6 : f32
    %209 = vector.broadcast %cst_93 : f32 to vector<32x1xf32>
    %210 = arith.addf %206, %209 : vector<32x1xf32>
    %211 = math.rsqrt %210 : vector<32x1xf32>
    %212 = vector.broadcast %211 : vector<32x1xf32> to vector<32x64xf32>
    %213 = arith.mulf %208, %212 : vector<32x64xf32>
    %214 = arith.truncf %213 : vector<32x64xf32> to vector<32x64xbf16>
    %c0_94 = arith.constant 0 : index
    %c0_95 = arith.constant 0 : index
    %215 = vector.load %arg9[%c0_94, %c0_95] : memref<64x4xbf16, #tpu.memory_space<vmem>>, vector<64x4xbf16>
    %cst_96 = arith.constant dense<0.000000e+00> : vector<32x4xf32>
    %216 = tpu.matmul %214, %215, %cst_96 {dimension_numbers = #tpu.dot_dimension_numbers<[1], [0], [0], [1], [0, 0, 1, 1], [], []>} : vector<32x64xbf16>, vector<64x4xbf16>, vector<32x4xf32> -> vector<32x4xf32>
    %c0_97 = arith.constant 0 : index
    %c0_98 = arith.constant 0 : index
    %217 = vector.load %arg10[%c0_97, %c0_98] : memref<1x4xf32, #tpu.memory_space<vmem>>, vector<1x4xf32>
    %218 = vector.broadcast %217 : vector<1x4xf32> to vector<32x4xf32>
    %219 = arith.addf %216, %218 : vector<32x4xf32>
    %cst_99 = arith.constant 5.000000e-01 : f32
    %220 = vector.broadcast %cst_99 : f32 to vector<32x4xf32>
    %221 = arith.mulf %220, %219 : vector<32x4xf32>
    %cst_100 = arith.constant 0.707106769 : f32
    %222 = vector.broadcast %cst_100 : f32 to vector<32x4xf32>
    %223 = arith.mulf %219, %222 : vector<32x4xf32>
    %224 = math.absf %223 : vector<32x4xf32>
    %cst_101 = arith.constant 0.327591091 : f32
    %225 = vector.broadcast %cst_101 : f32 to vector<32x4xf32>
    %226 = arith.mulf %225, %224 : vector<32x4xf32>
    %cst_102 = arith.constant 1.000000e+00 : f32
    %227 = vector.broadcast %cst_102 : f32 to vector<32x4xf32>
    %228 = arith.addf %227, %226 : vector<32x4xf32>
    %cst_103 = arith.constant 1.000000e+00 : f32
    %229 = vector.broadcast %cst_103 : f32 to vector<32x4xf32>
    %230 = arith.divf %229, %228 : vector<32x4xf32>
    %cst_104 = arith.constant 1.06140542 : f32
    %231 = vector.broadcast %cst_104 : f32 to vector<32x4xf32>
    %232 = arith.mulf %231, %230 : vector<32x4xf32>
    %cst_105 = arith.constant -1.45315206 : f32
    %233 = vector.broadcast %cst_105 : f32 to vector<32x4xf32>
    %234 = arith.addf %232, %233 : vector<32x4xf32>
    %235 = arith.mulf %234, %230 : vector<32x4xf32>
    %cst_106 = arith.constant 1.42141378 : f32
    %236 = vector.broadcast %cst_106 : f32 to vector<32x4xf32>
    %237 = arith.addf %235, %236 : vector<32x4xf32>
    %238 = arith.mulf %237, %230 : vector<32x4xf32>
    %cst_107 = arith.constant -0.284496725 : f32
    %239 = vector.broadcast %cst_107 : f32 to vector<32x4xf32>
    %240 = arith.addf %238, %239 : vector<32x4xf32>
    %241 = arith.mulf %240, %230 : vector<32x4xf32>
    %cst_108 = arith.constant 0.254829586 : f32
    %242 = vector.broadcast %cst_108 : f32 to vector<32x4xf32>
    %243 = arith.addf %241, %242 : vector<32x4xf32>
    %244 = arith.mulf %243, %230 : vector<32x4xf32>
    %cst_109 = arith.constant 0.000000e+00 : f32
    %245 = vector.broadcast %cst_109 : f32 to vector<32x4xf32>
    %246 = arith.subf %245, %224 : vector<32x4xf32>
    %247 = arith.mulf %246, %224 : vector<32x4xf32>
    %248 = math.exp %247 : vector<32x4xf32>
    %249 = arith.mulf %244, %248 : vector<32x4xf32>
    %cst_110 = arith.constant 1.000000e+00 : f32
    %250 = vector.broadcast %cst_110 : f32 to vector<32x4xf32>
    %251 = arith.subf %250, %249 : vector<32x4xf32>
    %cst_111 = arith.constant 0.000000e+00 : f32
    %252 = vector.broadcast %cst_111 : f32 to vector<32x4xf32>
    %253 = arith.cmpf oge, %223, %252 : vector<32x4xf32>
    %cst_112 = arith.constant 0.000000e+00 : f32
    %254 = vector.broadcast %cst_112 : f32 to vector<32x4xf32>
    %255 = arith.subf %254, %251 : vector<32x4xf32>
    %256 = arith.select %253, %251, %255 : vector<32x4xi1>, vector<32x4xf32>
    %cst_113 = arith.constant 1.000000e+00 : f32
    %257 = vector.broadcast %cst_113 : f32 to vector<32x4xf32>
    %258 = arith.addf %257, %256 : vector<32x4xf32>
    %259 = arith.mulf %221, %258 : vector<32x4xf32>
    %260 = arith.truncf %259 : vector<32x4xf32> to vector<32x4xbf16>
    %c0_114 = arith.constant 0 : index
    %c0_115 = arith.constant 0 : index
    %261 = vector.load %arg11[%c0_114, %c0_115] : memref<4x64xbf16, #tpu.memory_space<vmem>>, vector<4x64xbf16>
    %cst_116 = arith.constant dense<0.000000e+00> : vector<32x64xf32>
    %262 = tpu.matmul %260, %261, %cst_116 {dimension_numbers = #tpu.dot_dimension_numbers<[1], [0], [0], [1], [0, 0, 1, 1], [], []>} : vector<32x4xbf16>, vector<4x64xbf16>, vector<32x64xf32> -> vector<32x64xf32>
    %263 = arith.addf %195, %262 : vector<32x64xf32>
    %c0_117 = arith.constant 0 : index
    %c0_118 = arith.constant 0 : index
    %264 = vector.load %arg12[%c0_117, %c0_118] : memref<1x64xf32, #tpu.memory_space<vmem>>, vector<1x64xf32>
    %265 = vector.broadcast %264 : vector<1x64xf32> to vector<32x64xf32>
    %266 = arith.addf %263, %265 : vector<32x64xf32>
    %c0_119 = arith.constant 0 : index
    %c0_120 = arith.constant 0 : index
    %267 = vector.load %arg13[%c0_119, %c0_120] : memref<32x64xf32, #tpu.memory_space<vmem>>, vector<32x64xf32>
    tpu.vector_store %arg13[%c0_119, %c0_120], %266 {strides = array<i32>} : memref<32x64xf32, #tpu.memory_space<vmem>>, vector<32x64xf32>,
    return
  }
  func.func @transform_0(%arg0: i32) -> (i32, i32) {
    %c0_i32 = arith.constant 0 : i32
    %c0_i32_0 = arith.constant 0 : i32
    return %arg0, %c0_i32 : i32, i32
  }
  func.func @transform_1(%arg0: i32) -> (i32, i32, i32) {
    %c0_i32 = arith.constant 0 : i32
    %c0_i32_0 = arith.constant 0 : i32
    %c0_i32_1 = arith.constant 0 : i32
    %c0_i32_2 = arith.constant 0 : i32
    return %c0_i32, %c0_i32_0, %c0_i32_1 : i32, i32, i32
  }
  func.func @transform_2(%arg0: i32) -> (i32, i32, i32) {
    %c0_i32 = arith.constant 0 : i32
    %c0_i32_0 = arith.constant 0 : i32
    %c0_i32_1 = arith.constant 0 : i32
    %c0_i32_2 = arith.constant 0 : i32
    return %c0_i32, %c0_i32_0, %c0_i32_1 : i32, i32, i32
  }
  func.func @transform_3(%arg0: i32) -> (i32, i32) {
    %c0_i32 = arith.constant 0 : i32
    %c0_i32_0 = arith.constant 0 : i32
    %c0_i32_1 = arith.constant 0 : i32
    return %c0_i32, %c0_i32_0 : i32, i32
  }
  func.func @transform_4(%arg0: i32) -> (i32, i32) {
    %c0_i32 = arith.constant 0 : i32
    %c0_i32_0 = arith.constant 0 : i32
    %c0_i32_1 = arith.constant 0 : i32
    return %c0_i32, %c0_i32_0 : i32, i32
  }
  func.func @transform_5(%arg0: i32) -> (i32, i32, i32) {
    %c0_i32 = arith.constant 0 : i32
    %c0_i32_0 = arith.constant 0 : i32
    %c0_i32_1 = arith.constant 0 : i32
    %c0_i32_2 = arith.constant 0 : i32
    return %c0_i32, %c0_i32_0, %c0_i32_1 : i32, i32, i32
  }
  func.func @transform_6(%arg0: i32) -> (i32, i32, i32) {
    %c0_i32 = arith.constant 0 : i32
    %c0_i32_0 = arith.constant 0 : i32
    %c0_i32_1 = arith.constant 0 : i32
    %c0_i32_2 = arith.constant 0 : i32
    return %c0_i32, %c0_i32_0, %c0_i32_1 : i32, i32, i32
  }
  func.func @transform_7(%arg0: i32) -> (i32, i32) {
    %c0_i32 = arith.constant 0 : i32
    %c0_i32_0 = arith.constant 0 : i32
    %c0_i32_1 = arith.constant 0 : i32
    return %c0_i32, %c0_i32_0 : i32, i32
  }
  func.func @transform_8(%arg0: i32) -> (i32, i32) {
    %c0_i32 = arith.constant 0 : i32
    %c0_i32_0 = arith.constant 0 : i32
    %c0_i32_1 = arith.constant 0 : i32
    return %c0_i32, %c0_i32_0 : i32, i32
  }
  func.func @transform_9(%arg0: i32) -> (i32, i32) {
    %c0_i32 = arith.constant 0 : i32
    %c0_i32_0 = arith.constant 0 : i32
    %c0_i32_1 = arith.constant 0 : i32
    return %c0_i32, %c0_i32_0 : i32, i32
  }
  func.func @transform_10(%arg0: i32) -> (i32, i32) {
    %c0_i32 = arith.constant 0 : i32
    %c0_i32_0 = arith.constant 0 : i32
    %c0_i32_1 = arith.constant 0 : i32
    return %c0_i32, %c0_i32_0 : i32, i32
  }
  func.func @transform_11(%arg0: i32) -> (i32, i32) {
    %c0_i32 = arith.constant 0 : i32
    %c0_i32_0 = arith.constant 0 : i32
    %c0_i32_1 = arith.constant 0 : i32
    return %c0_i32, %c0_i32_0 : i32, i32
  }
  func.func @transform_12(%arg0: i32) -> (i32, i32) {
    %c0_i32 = arith.constant 0 : i32
    %c0_i32_0 = arith.constant 0 : i32
    return %arg0, %c0_i32 : i32, i32
  }
}

module attributes {stable_mosaic.version = 11 : i64} {
  func.func @kernel(%arg0: i32, %arg1: memref<32x64xbf16, #tpu.memory_space<vmem>>, %arg2: memref<3x64x64xbf16, #tpu.memory_space<vmem>>, %arg3: memref<3x1x64xf32, #tpu.memory_space<vmem>>, %arg4: memref<64x12xbf16, #tpu.memory_space<vmem>>, %arg5: memref<1x12xf32, #tpu.memory_space<vmem>>, %arg6: memref<3x12x64xbf16, #tpu.memory_space<vmem>>, %arg7: memref<4x16x64xbf16, #tpu.memory_space<vmem>>, %arg8: memref<1x64xf32, #tpu.memory_space<vmem>>, %arg9: memref<64x4xbf16, #tpu.memory_space<vmem>>, %arg10: memref<1x4xf32, #tpu.memory_space<vmem>>, %arg11: memref<4x64xbf16, #tpu.memory_space<vmem>>, %arg12: memref<1x64xf32, #tpu.memory_space<vmem>>, %arg13: memref<32x64xf32, #tpu.memory_space<vmem>>) attributes {dimension_semantics = [#tpu.dimension_semantics<parallel>], iteration_bounds = array<i64: 4>, scalar_prefetch = 0 : i64, scratch_operands = 0 : i64, tpu.core_type = #tpu.core_type<tc>, window_params = [{transform_indices = @transform_0, window_bounds = array<i64: 32, 64>}, {pipeline_mode = #tpu.pipeline_mode<synchronous>, transform_indices = @transform_1, window_bounds = array<i64: 3, 64, 64>}, {pipeline_mode = #tpu.pipeline_mode<synchronous>, transform_indices = @transform_2, window_bounds = array<i64: 3, 1, 64>}, {pipeline_mode = #tpu.pipeline_mode<synchronous>, transform_indices = @transform_3, window_bounds = array<i64: 64, 12>}, {pipeline_mode = #tpu.pipeline_mode<synchronous>, transform_indices = @transform_4, window_bounds = array<i64: 1, 12>}, {pipeline_mode = #tpu.pipeline_mode<synchronous>, transform_indices = @transform_5, window_bounds = array<i64: 3, 12, 64>}, {pipeline_mode = #tpu.pipeline_mode<synchronous>, transform_indices = @transform_6, window_bounds = array<i64: 4, 16, 64>}, {pipeline_mode = #tpu.pipeline_mode<synchronous>, transform_indices = @transform_7, window_bounds = array<i64: 1, 64>}, {pipeline_mode = #tpu.pipeline_mode<synchronous>, transform_indices = @transform_8, window_bounds = array<i64: 64, 4>}, {pipeline_mode = #tpu.pipeline_mode<synchronous>, transform_indices = @transform_9, window_bounds = array<i64: 1, 4>}, {pipeline_mode = #tpu.pipeline_mode<synchronous>, transform_indices = @transform_10, window_bounds = array<i64: 4, 64>}, {pipeline_mode = #tpu.pipeline_mode<synchronous>, transform_indices = @transform_11, window_bounds = array<i64: 1, 64>}, {transform_indices = @transform_12, window_bounds = array<i64: 32, 64>}]} {
    %c0 = arith.constant 0 : index
    %c0_0 = arith.constant 0 : index
    %0 = vector.load %arg1[%c0, %c0_0] : memref<32x64xbf16, #tpu.memory_space<vmem>>, vector<32x64xbf16>
    %1 = arith.extf %0 : vector<32x64xbf16> to vector<32x64xf32>
    %cst = arith.constant dense<0.000000e+00> : vector<32xf32>
    %2 = vector.multi_reduction <add>, %1, %cst [1] : vector<32x64xf32> to vector<32xf32>
    %3 = vector.shape_cast %2 : vector<32xf32> to vector<32x1xf32>
    %cst_1 = arith.constant 6.400000e+01 : f32
    %4 = vector.broadcast %cst_1 : f32 to vector<32x1xf32>
    %5 = arith.divf %3, %4 : vector<32x1xf32>
    %6 = vector.broadcast %5 : vector<32x1xf32> to vector<32x64xf32>
    %7 = arith.subf %1, %6 : vector<32x64xf32>
    %8 = arith.mulf %7, %7 : vector<32x64xf32>
    %cst_2 = arith.constant dense<0.000000e+00> : vector<32xf32>
    %9 = vector.multi_reduction <add>, %8, %cst_2 [1] : vector<32x64xf32> to vector<32xf32>
    %10 = vector.shape_cast %9 : vector<32xf32> to vector<32x1xf32>
    %cst_3 = arith.constant 6.400000e+01 : f32
    %11 = vector.broadcast %cst_3 : f32 to vector<32x1xf32>
    %12 = arith.divf %10, %11 : vector<32x1xf32>
    %13 = vector.broadcast %5 : vector<32x1xf32> to vector<32x64xf32>
    %14 = arith.subf %1, %13 : vector<32x64xf32>
    %cst_4 = arith.constant 9.99999974E-6 : f32
    %15 = vector.broadcast %cst_4 : f32 to vector<32x1xf32>
    %16 = arith.addf %12, %15 : vector<32x1xf32>
    %17 = math.rsqrt %16 : vector<32x1xf32>
    %18 = vector.broadcast %17 : vector<32x1xf32> to vector<32x64xf32>
    %19 = arith.mulf %14, %18 : vector<32x64xf32>
    %20 = arith.truncf %19 : vector<32x64xf32> to vector<32x64xbf16>
    %c0_5 = arith.constant 0 : index
    %c0_6 = arith.constant 0 : index
    %21 = vector.load %arg4[%c0_5, %c0_6] : memref<64x12xbf16, #tpu.memory_space<vmem>>, vector<64x12xbf16>
    %cst_7 = arith.constant dense<0.000000e+00> : vector<32x12xf32>
    %22 = tpu.matmul %20, %21, %cst_7 {dimension_numbers = #tpu.dot_dimension_numbers<[1], [0], [0], [1], [0, 0, 1, 1], [], []>} : vector<32x64xbf16>, vector<64x12xbf16>, vector<32x12xf32> -> vector<32x12xf32>
    %c0_8 = arith.constant 0 : index
    %c0_9 = arith.constant 0 : index
    %23 = vector.load %arg5[%c0_8, %c0_9] : memref<1x12xf32, #tpu.memory_space<vmem>>, vector<1x12xf32>
    %24 = vector.broadcast %23 : vector<1x12xf32> to vector<32x12xf32>
    %25 = arith.addf %22, %24 : vector<32x12xf32>
    %cst_10 = arith.constant 5.000000e-01 : f32
    %26 = vector.broadcast %cst_10 : f32 to vector<32x12xf32>
    %27 = arith.mulf %26, %25 : vector<32x12xf32>
    %cst_11 = arith.constant 0.707106769 : f32
    %28 = vector.broadcast %cst_11 : f32 to vector<32x12xf32>
    %29 = arith.mulf %25, %28 : vector<32x12xf32>
    %30 = math.absf %29 : vector<32x12xf32>
    %cst_12 = arith.constant 0.327591091 : f32
    %31 = vector.broadcast %cst_12 : f32 to vector<32x12xf32>
    %32 = arith.mulf %31, %30 : vector<32x12xf32>
    %cst_13 = arith.constant 1.000000e+00 : f32
    %33 = vector.broadcast %cst_13 : f32 to vector<32x12xf32>
    %34 = arith.addf %33, %32 : vector<32x12xf32>
    %cst_14 = arith.constant 1.000000e+00 : f32
    %35 = vector.broadcast %cst_14 : f32 to vector<32x12xf32>
    %36 = arith.divf %35, %34 : vector<32x12xf32>
    %cst_15 = arith.constant 1.06140542 : f32
    %37 = vector.broadcast %cst_15 : f32 to vector<32x12xf32>
    %38 = arith.mulf %37, %36 : vector<32x12xf32>
    %cst_16 = arith.constant -1.45315206 : f32
    %39 = vector.broadcast %cst_16 : f32 to vector<32x12xf32>
    %40 = arith.addf %38, %39 : vector<32x12xf32>
    %41 = arith.mulf %40, %36 : vector<32x12xf32>
    %cst_17 = arith.constant 1.42141378 : f32
    %42 = vector.broadcast %cst_17 : f32 to vector<32x12xf32>
    %43 = arith.addf %41, %42 : vector<32x12xf32>
    %44 = arith.mulf %43, %36 : vector<32x12xf32>
    %cst_18 = arith.constant -0.284496725 : f32
    %45 = vector.broadcast %cst_18 : f32 to vector<32x12xf32>
    %46 = arith.addf %44, %45 : vector<32x12xf32>
    %47 = arith.mulf %46, %36 : vector<32x12xf32>
    %cst_19 = arith.constant 0.254829586 : f32
    %48 = vector.broadcast %cst_19 : f32 to vector<32x12xf32>
    %49 = arith.addf %47, %48 : vector<32x12xf32>
    %50 = arith.mulf %49, %36 : vector<32x12xf32>
    %cst_20 = arith.constant 0.000000e+00 : f32
    %51 = vector.broadcast %cst_20 : f32 to vector<32x12xf32>
    %52 = arith.subf %51, %30 : vector<32x12xf32>
    %53 = arith.mulf %52, %30 : vector<32x12xf32>
    %54 = math.exp %53 : vector<32x12xf32>
    %55 = arith.mulf %50, %54 : vector<32x12xf32>
    %cst_21 = arith.constant 1.000000e+00 : f32
    %56 = vector.broadcast %cst_21 : f32 to vector<32x12xf32>
    %57 = arith.subf %56, %55 : vector<32x12xf32>
    %cst_22 = arith.constant 0.000000e+00 : f32
    %58 = vector.broadcast %cst_22 : f32 to vector<32x12xf32>
    %59 = arith.cmpf oge, %29, %58 : vector<32x12xf32>
    %cst_23 = arith.constant 0.000000e+00 : f32
    %60 = vector.broadcast %cst_23 : f32 to vector<32x12xf32>
    %61 = arith.subf %60, %57 : vector<32x12xf32>
    %62 = arith.select %59, %57, %61 : vector<32x12xi1>, vector<32x12xf32>
    %cst_24 = arith.constant 1.000000e+00 : f32
    %63 = vector.broadcast %cst_24 : f32 to vector<32x12xf32>
    %64 = arith.addf %63, %62 : vector<32x12xf32>
    %65 = arith.mulf %27, %64 : vector<32x12xf32>
    %66 = arith.truncf %65 : vector<32x12xf32> to vector<32x12xbf16>
    %c0_25 = arith.constant 0 : index
    %c0_26 = arith.constant 0 : index
    %c0_27 = arith.constant 0 : index
    %67 = vector.load %arg2[%c0_25, %c0_26, %c0_27] : memref<3x64x64xbf16, #tpu.memory_space<vmem>>, vector<1x64x64xbf16>
    %68 = vector.shape_cast %67 : vector<1x64x64xbf16> to vector<64x64xbf16>
    %cst_28 = arith.constant dense<0.000000e+00> : vector<32x64xf32>
    %69 = tpu.matmul %0, %68, %cst_28 {dimension_numbers = #tpu.dot_dimension_numbers<[1], [0], [0], [1], [0, 0, 1, 1], [], []>} : vector<32x64xbf16>, vector<64x64xbf16>, vector<32x64xf32> -> vector<32x64xf32>
    %c0_29 = arith.constant 0 : index
    %c0_30 = arith.constant 0 : index
    %c0_31 = arith.constant 0 : index
    %70 = vector.load %arg6[%c0_29, %c0_30, %c0_31] : memref<3x12x64xbf16, #tpu.memory_space<vmem>>, vector<1x12x64xbf16>
    %71 = vector.shape_cast %70 : vector<1x12x64xbf16> to vector<12x64xbf16>
    %cst_32 = arith.constant dense<0.000000e+00> : vector<32x64xf32>
    %72 = tpu.matmul %66, %71, %cst_32 {dimension_numbers = #tpu.dot_dimension_numbers<[1], [0], [0], [1], [0, 0, 1, 1], [], []>} : vector<32x12xbf16>, vector<12x64xbf16>, vector<32x64xf32> -> vector<32x64xf32>
    %73 = arith.addf %69, %72 : vector<32x64xf32>
    %c0_33 = arith.constant 0 : index
    %c0_34 = arith.constant 0 : index
    %c0_35 = arith.constant 0 : index
    %74 = vector.load %arg3[%c0_33, %c0_34, %c0_35] : memref<3x1x64xf32, #tpu.memory_space<vmem>>, vector<1x1x64xf32>
    %75 = vector.shape_cast %74 : vector<1x1x64xf32> to vector<1x64xf32>
    %76 = vector.broadcast %75 : vector<1x64xf32> to vector<32x64xf32>
    %77 = arith.addf %73, %76 : vector<32x64xf32>
    %78 = arith.truncf %77 : vector<32x64xf32> to vector<32x64xbf16>
    %79 = vector.shape_cast %78 : vector<32x64xbf16> to vector<2x16x64xbf16>
    %c1 = arith.constant 1 : index
    %c0_36 = arith.constant 0 : index
    %c0_37 = arith.constant 0 : index
    %80 = vector.load %arg2[%c1, %c0_36, %c0_37] : memref<3x64x64xbf16, #tpu.memory_space<vmem>>, vector<1x64x64xbf16>
    %81 = vector.shape_cast %80 : vector<1x64x64xbf16> to vector<64x64xbf16>
    %cst_38 = arith.constant dense<0.000000e+00> : vector<32x64xf32>
    %82 = tpu.matmul %0, %81, %cst_38 {dimension_numbers = #tpu.dot_dimension_numbers<[1], [0], [0], [1], [0, 0, 1, 1], [], []>} : vector<32x64xbf16>, vector<64x64xbf16>, vector<32x64xf32> -> vector<32x64xf32>
    %c1_39 = arith.constant 1 : index
    %c0_40 = arith.constant 0 : index
    %c0_41 = arith.constant 0 : index
    %83 = vector.load %arg6[%c1_39, %c0_40, %c0_41] : memref<3x12x64xbf16, #tpu.memory_space<vmem>>, vector<1x12x64xbf16>
    %84 = vector.shape_cast %83 : vector<1x12x64xbf16> to vector<12x64xbf16>
    %cst_42 = arith.constant dense<0.000000e+00> : vector<32x64xf32>
    %85 = tpu.matmul %66, %84, %cst_42 {dimension_numbers = #tpu.dot_dimension_numbers<[1], [0], [0], [1], [0, 0, 1, 1], [], []>} : vector<32x12xbf16>, vector<12x64xbf16>, vector<32x64xf32> -> vector<32x64xf32>
    %86 = arith.addf %82, %85 : vector<32x64xf32>
    %c1_43 = arith.constant 1 : index
    %c0_44 = arith.constant 0 : index
    %c0_45 = arith.constant 0 : index
    %87 = vector.load %arg3[%c1_43, %c0_44, %c0_45] : memref<3x1x64xf32, #tpu.memory_space<vmem>>, vector<1x1x64xf32>
    %88 = vector.shape_cast %87 : vector<1x1x64xf32> to vector<1x64xf32>
    %89 = vector.broadcast %88 : vector<1x64xf32> to vector<32x64xf32>
    %90 = arith.addf %86, %89 : vector<32x64xf32>
    %91 = arith.truncf %90 : vector<32x64xf32> to vector<32x64xbf16>
    %92 = vector.shape_cast %91 : vector<32x64xbf16> to vector<2x16x64xbf16>
    %c2 = arith.constant 2 : index
    %c0_46 = arith.constant 0 : index
    %c0_47 = arith.constant 0 : index
    %93 = vector.load %arg2[%c2, %c0_46, %c0_47] : memref<3x64x64xbf16, #tpu.memory_space<vmem>>, vector<1x64x64xbf16>
    %94 = vector.shape_cast %93 : vector<1x64x64xbf16> to vector<64x64xbf16>
    %cst_48 = arith.constant dense<0.000000e+00> : vector<32x64xf32>
    %95 = tpu.matmul %0, %94, %cst_48 {dimension_numbers = #tpu.dot_dimension_numbers<[1], [0], [0], [1], [0, 0, 1, 1], [], []>} : vector<32x64xbf16>, vector<64x64xbf16>, vector<32x64xf32> -> vector<32x64xf32>
    %c2_49 = arith.constant 2 : index
    %c0_50 = arith.constant 0 : index
    %c0_51 = arith.constant 0 : index
    %96 = vector.load %arg6[%c2_49, %c0_50, %c0_51] : memref<3x12x64xbf16, #tpu.memory_space<vmem>>, vector<1x12x64xbf16>
    %97 = vector.shape_cast %96 : vector<1x12x64xbf16> to vector<12x64xbf16>
    %cst_52 = arith.constant dense<0.000000e+00> : vector<32x64xf32>
    %98 = tpu.matmul %66, %97, %cst_52 {dimension_numbers = #tpu.dot_dimension_numbers<[1], [0], [0], [1], [0, 0, 1, 1], [], []>} : vector<32x12xbf16>, vector<12x64xbf16>, vector<32x64xf32> -> vector<32x64xf32>
    %99 = arith.addf %95, %98 : vector<32x64xf32>
    %c2_53 = arith.constant 2 : index
    %c0_54 = arith.constant 0 : index
    %c0_55 = arith.constant 0 : index
    %100 = vector.load %arg3[%c2_53, %c0_54, %c0_55] : memref<3x1x64xf32, #tpu.memory_space<vmem>>, vector<1x1x64xf32>
    %101 = vector.shape_cast %100 : vector<1x1x64xf32> to vector<1x64xf32>
    %102 = vector.broadcast %101 : vector<1x64xf32> to vector<32x64xf32>
    %103 = arith.addf %99, %102 : vector<32x64xf32>
    %104 = arith.truncf %103 : vector<32x64xf32> to vector<32x64xbf16>
    %105 = vector.shape_cast %104 : vector<32x64xbf16> to vector<2x16x64xbf16>
    %106 = vector.extract_strided_slice %79 {offsets = [0, 0, 0], sizes = [2, 16, 16], strides = [1, 1, 1]} : vector<2x16x64xbf16> to vector<2x16x16xbf16>
    %107 = vector.extract_strided_slice %92 {offsets = [0, 0, 0], sizes = [2, 16, 16], strides = [1, 1, 1]} : vector<2x16x64xbf16> to vector<2x16x16xbf16>
    %108 = vector.extract_strided_slice %105 {offsets = [0, 0, 0], sizes = [2, 16, 16], strides = [1, 1, 1]} : vector<2x16x64xbf16> to vector<2x16x16xbf16>
    "tpu.trace_start"() <{level = 10 : i32, message = "bqd,bkd->bqk"}> : () -> ()
    %cst_56 = arith.constant dense<0.000000e+00> : vector<2x16x16xf32>
    %109 = tpu.matmul %106, %107, %cst_56 {dimension_numbers = #tpu.dot_dimension_numbers<[2], [2], [1], [1], [0, 0, 0, 1, 1, 1], [0], [0]>} : vector<2x16x16xbf16>, vector<2x16x16xbf16>, vector<2x16x16xf32> -> vector<2x16x16xf32>
    "tpu.trace_stop"() : () -> ()
    %cst_57 = arith.constant dense<0xFF800000> : vector<2x16xf32>
    %110 = vector.multi_reduction <maximumf>, %109, %cst_57 [2] : vector<2x16x16xf32> to vector<2x16xf32>
    %111 = vector.shape_cast %110 : vector<2x16xf32> to vector<2x16x1xf32>
    %112 = vector.broadcast %111 : vector<2x16x1xf32> to vector<2x16x16xf32>
    %113 = arith.subf %109, %112 : vector<2x16x16xf32>
    %114 = math.exp %113 : vector<2x16x16xf32>
    %cst_58 = arith.constant dense<0.000000e+00> : vector<2x16xf32>
    %115 = vector.multi_reduction <add>, %114, %cst_58 [2] : vector<2x16x16xf32> to vector<2x16xf32>
    %116 = vector.shape_cast %115 : vector<2x16xf32> to vector<2x16x1xf32>
    %117 = tpu.reciprocal %116 {approx = true} : vector<2x16x1xf32> -> vector<2x16x1xf32>
    %118 = vector.broadcast %117 : vector<2x16x1xf32> to vector<2x16x16xf32>
    %119 = arith.mulf %114, %118 : vector<2x16x16xf32>
    %120 = arith.truncf %119 : vector<2x16x16xf32> to vector<2x16x16xbf16>
    "tpu.trace_start"() <{level = 10 : i32, message = "bqk,bkd->bqd"}> : () -> ()
    %cst_59 = arith.constant dense<0.000000e+00> : vector<2x16x16xf32>
    %121 = tpu.matmul %120, %108, %cst_59 {dimension_numbers = #tpu.dot_dimension_numbers<[2], [1], [1], [2], [0, 0, 0, 1, 1, 2], [0], [0]>} : vector<2x16x16xbf16>, vector<2x16x16xbf16>, vector<2x16x16xf32> -> vector<2x16x16xf32>
    "tpu.trace_stop"() : () -> ()
    %122 = arith.truncf %121 : vector<2x16x16xf32> to vector<2x16x16xbf16>
    %123 = vector.shape_cast %122 : vector<2x16x16xbf16> to vector<32x16xbf16>
    %c0_60 = arith.constant 0 : index
    %c0_61 = arith.constant 0 : index
    %c0_62 = arith.constant 0 : index
    %124 = vector.load %arg7[%c0_60, %c0_61, %c0_62] : memref<4x16x64xbf16, #tpu.memory_space<vmem>>, vector<1x16x64xbf16>
    %125 = vector.shape_cast %124 : vector<1x16x64xbf16> to vector<16x64xbf16>
    %cst_63 = arith.constant dense<0.000000e+00> : vector<32x64xf32>
    %126 = tpu.matmul %123, %125, %cst_63 {dimension_numbers = #tpu.dot_dimension_numbers<[1], [0], [0], [1], [0, 0, 1, 1], [], []>} : vector<32x16xbf16>, vector<16x64xbf16>, vector<32x64xf32> -> vector<32x64xf32>
    %127 = vector.extract_strided_slice %79 {offsets = [0, 0, 16], sizes = [2, 16, 16], strides = [1, 1, 1]} : vector<2x16x64xbf16> to vector<2x16x16xbf16>
    %128 = vector.extract_strided_slice %92 {offsets = [0, 0, 16], sizes = [2, 16, 16], strides = [1, 1, 1]} : vector<2x16x64xbf16> to vector<2x16x16xbf16>
    %129 = vector.extract_strided_slice %105 {offsets = [0, 0, 16], sizes = [2, 16, 16], strides = [1, 1, 1]} : vector<2x16x64xbf16> to vector<2x16x16xbf16>
    "tpu.trace_start"() <{level = 10 : i32, message = "bqd,bkd->bqk"}> : () -> ()
    %cst_64 = arith.constant dense<0.000000e+00> : vector<2x16x16xf32>
    %130 = tpu.matmul %127, %128, %cst_64 {dimension_numbers = #tpu.dot_dimension_numbers<[2], [2], [1], [1], [0, 0, 0, 1, 1, 1], [0], [0]>} : vector<2x16x16xbf16>, vector<2x16x16xbf16>, vector<2x16x16xf32> -> vector<2x16x16xf32>
    "tpu.trace_stop"() : () -> ()
    %cst_65 = arith.constant dense<0xFF800000> : vector<2x16xf32>
    %131 = vector.multi_reduction <maximumf>, %130, %cst_65 [2] : vector<2x16x16xf32> to vector<2x16xf32>
    %132 = vector.shape_cast %131 : vector<2x16xf32> to vector<2x16x1xf32>
    %133 = vector.broadcast %132 : vector<2x16x1xf32> to vector<2x16x16xf32>
    %134 = arith.subf %130, %133 : vector<2x16x16xf32>
    %135 = math.exp %134 : vector<2x16x16xf32>
    %cst_66 = arith.constant dense<0.000000e+00> : vector<2x16xf32>
    %136 = vector.multi_reduction <add>, %135, %cst_66 [2] : vector<2x16x16xf32> to vector<2x16xf32>
    %137 = vector.shape_cast %136 : vector<2x16xf32> to vector<2x16x1xf32>
    %138 = tpu.reciprocal %137 {approx = true} : vector<2x16x1xf32> -> vector<2x16x1xf32>
    %139 = vector.broadcast %138 : vector<2x16x1xf32> to vector<2x16x16xf32>
    %140 = arith.mulf %135, %139 : vector<2x16x16xf32>
    %141 = arith.truncf %140 : vector<2x16x16xf32> to vector<2x16x16xbf16>
    "tpu.trace_start"() <{level = 10 : i32, message = "bqk,bkd->bqd"}> : () -> ()
    %cst_67 = arith.constant dense<0.000000e+00> : vector<2x16x16xf32>
    %142 = tpu.matmul %141, %129, %cst_67 {dimension_numbers = #tpu.dot_dimension_numbers<[2], [1], [1], [2], [0, 0, 0, 1, 1, 2], [0], [0]>} : vector<2x16x16xbf16>, vector<2x16x16xbf16>, vector<2x16x16xf32> -> vector<2x16x16xf32>
    "tpu.trace_stop"() : () -> ()
    %143 = arith.truncf %142 : vector<2x16x16xf32> to vector<2x16x16xbf16>
    %144 = vector.shape_cast %143 : vector<2x16x16xbf16> to vector<32x16xbf16>
    %c1_68 = arith.constant 1 : index
    %c0_69 = arith.constant 0 : index
    %c0_70 = arith.constant 0 : index
    %145 = vector.load %arg7[%c1_68, %c0_69, %c0_70] : memref<4x16x64xbf16, #tpu.memory_space<vmem>>, vector<1x16x64xbf16>
    %146 = vector.shape_cast %145 : vector<1x16x64xbf16> to vector<16x64xbf16>
    %cst_71 = arith.constant dense<0.000000e+00> : vector<32x64xf32>
    %147 = tpu.matmul %144, %146, %cst_71 {dimension_numbers = #tpu.dot_dimension_numbers<[1], [0], [0], [1], [0, 0, 1, 1], [], []>} : vector<32x16xbf16>, vector<16x64xbf16>, vector<32x64xf32> -> vector<32x64xf32>
    %148 = arith.addf %126, %147 : vector<32x64xf32>
    %149 = vector.extract_strided_slice %79 {offsets = [0, 0, 32], sizes = [2, 16, 16], strides = [1, 1, 1]} : vector<2x16x64xbf16> to vector<2x16x16xbf16>
    %150 = vector.extract_strided_slice %92 {offsets = [0, 0, 32], sizes = [2, 16, 16], strides = [1, 1, 1]} : vector<2x16x64xbf16> to vector<2x16x16xbf16>
    %151 = vector.extract_strided_slice %105 {offsets = [0, 0, 32], sizes = [2, 16, 16], strides = [1, 1, 1]} : vector<2x16x64xbf16> to vector<2x16x16xbf16>
    "tpu.trace_start"() <{level = 10 : i32, message = "bqd,bkd->bqk"}> : () -> ()
    %cst_72 = arith.constant dense<0.000000e+00> : vector<2x16x16xf32>
    %152 = tpu.matmul %149, %150, %cst_72 {dimension_numbers = #tpu.dot_dimension_numbers<[2], [2], [1], [1], [0, 0, 0, 1, 1, 1], [0], [0]>} : vector<2x16x16xbf16>, vector<2x16x16xbf16>, vector<2x16x16xf32> -> vector<2x16x16xf32>
    "tpu.trace_stop"() : () -> ()
    %cst_73 = arith.constant dense<0xFF800000> : vector<2x16xf32>
    %153 = vector.multi_reduction <maximumf>, %152, %cst_73 [2] : vector<2x16x16xf32> to vector<2x16xf32>
    %154 = vector.shape_cast %153 : vector<2x16xf32> to vector<2x16x1xf32>
    %155 = vector.broadcast %154 : vector<2x16x1xf32> to vector<2x16x16xf32>
    %156 = arith.subf %152, %155 : vector<2x16x16xf32>
    %157 = math.exp %156 : vector<2x16x16xf32>
    %cst_74 = arith.constant dense<0.000000e+00> : vector<2x16xf32>
    %158 = vector.multi_reduction <add>, %157, %cst_74 [2] : vector<2x16x16xf32> to vector<2x16xf32>
    %159 = vector.shape_cast %158 : vector<2x16xf32> to vector<2x16x1xf32>
    %160 = tpu.reciprocal %159 {approx = true} : vector<2x16x1xf32> -> vector<2x16x1xf32>
    %161 = vector.broadcast %160 : vector<2x16x1xf32> to vector<2x16x16xf32>
    %162 = arith.mulf %157, %161 : vector<2x16x16xf32>
    %163 = arith.truncf %162 : vector<2x16x16xf32> to vector<2x16x16xbf16>
    "tpu.trace_start"() <{level = 10 : i32, message = "bqk,bkd->bqd"}> : () -> ()
    %cst_75 = arith.constant dense<0.000000e+00> : vector<2x16x16xf32>
    %164 = tpu.matmul %163, %151, %cst_75 {dimension_numbers = #tpu.dot_dimension_numbers<[2], [1], [1], [2], [0, 0, 0, 1, 1, 2], [0], [0]>} : vector<2x16x16xbf16>, vector<2x16x16xbf16>, vector<2x16x16xf32> -> vector<2x16x16xf32>
    "tpu.trace_stop"() : () -> ()
    %165 = arith.truncf %164 : vector<2x16x16xf32> to vector<2x16x16xbf16>
    %166 = vector.shape_cast %165 : vector<2x16x16xbf16> to vector<32x16xbf16>
    %c2_76 = arith.constant 2 : index
    %c0_77 = arith.constant 0 : index
    %c0_78 = arith.constant 0 : index
    %167 = vector.load %arg7[%c2_76, %c0_77, %c0_78] : memref<4x16x64xbf16, #tpu.memory_space<vmem>>, vector<1x16x64xbf16>
    %168 = vector.shape_cast %167 : vector<1x16x64xbf16> to vector<16x64xbf16>
    %cst_79 = arith.constant dense<0.000000e+00> : vector<32x64xf32>
    %169 = tpu.matmul %166, %168, %cst_79 {dimension_numbers = #tpu.dot_dimension_numbers<[1], [0], [0], [1], [0, 0, 1, 1], [], []>} : vector<32x16xbf16>, vector<16x64xbf16>, vector<32x64xf32> -> vector<32x64xf32>
    %170 = arith.addf %148, %169 : vector<32x64xf32>
    %171 = vector.extract_strided_slice %79 {offsets = [0, 0, 48], sizes = [2, 16, 16], strides = [1, 1, 1]} : vector<2x16x64xbf16> to vector<2x16x16xbf16>
    %172 = vector.extract_strided_slice %92 {offsets = [0, 0, 48], sizes = [2, 16, 16], strides = [1, 1, 1]} : vector<2x16x64xbf16> to vector<2x16x16xbf16>
    %173 = vector.extract_strided_slice %105 {offsets = [0, 0, 48], sizes = [2, 16, 16], strides = [1, 1, 1]} : vector<2x16x64xbf16> to vector<2x16x16xbf16>
    "tpu.trace_start"() <{level = 10 : i32, message = "bqd,bkd->bqk"}> : () -> ()
    %cst_80 = arith.constant dense<0.000000e+00> : vector<2x16x16xf32>
    %174 = tpu.matmul %171, %172, %cst_80 {dimension_numbers = #tpu.dot_dimension_numbers<[2], [2], [1], [1], [0, 0, 0, 1, 1, 1], [0], [0]>} : vector<2x16x16xbf16>, vector<2x16x16xbf16>, vector<2x16x16xf32> -> vector<2x16x16xf32>
    "tpu.trace_stop"() : () -> ()
    %cst_81 = arith.constant dense<0xFF800000> : vector<2x16xf32>
    %175 = vector.multi_reduction <maximumf>, %174, %cst_81 [2] : vector<2x16x16xf32> to vector<2x16xf32>
    %176 = vector.shape_cast %175 : vector<2x16xf32> to vector<2x16x1xf32>
    %177 = vector.broadcast %176 : vector<2x16x1xf32> to vector<2x16x16xf32>
    %178 = arith.subf %174, %177 : vector<2x16x16xf32>
    %179 = math.exp %178 : vector<2x16x16xf32>
    %cst_82 = arith.constant dense<0.000000e+00> : vector<2x16xf32>
    %180 = vector.multi_reduction <add>, %179, %cst_82 [2] : vector<2x16x16xf32> to vector<2x16xf32>
    %181 = vector.shape_cast %180 : vector<2x16xf32> to vector<2x16x1xf32>
    %182 = tpu.reciprocal %181 {approx = true} : vector<2x16x1xf32> -> vector<2x16x1xf32>
    %183 = vector.broadcast %182 : vector<2x16x1xf32> to vector<2x16x16xf32>
    %184 = arith.mulf %179, %183 : vector<2x16x16xf32>
    %185 = arith.truncf %184 : vector<2x16x16xf32> to vector<2x16x16xbf16>
    "tpu.trace_start"() <{level = 10 : i32, message = "bqk,bkd->bqd"}> : () -> ()
    %cst_83 = arith.constant dense<0.000000e+00> : vector<2x16x16xf32>
    %186 = tpu.matmul %185, %173, %cst_83 {dimension_numbers = #tpu.dot_dimension_numbers<[2], [1], [1], [2], [0, 0, 0, 1, 1, 2], [0], [0]>} : vector<2x16x16xbf16>, vector<2x16x16xbf16>, vector<2x16x16xf32> -> vector<2x16x16xf32>
    "tpu.trace_stop"() : () -> ()
    %187 = arith.truncf %186 : vector<2x16x16xf32> to vector<2x16x16xbf16>
    %188 = vector.shape_cast %187 : vector<2x16x16xbf16> to vector<32x16xbf16>
    %c3 = arith.constant 3 : index
    %c0_84 = arith.constant 0 : index
    %c0_85 = arith.constant 0 : index
    %189 = vector.load %arg7[%c3, %c0_84, %c0_85] : memref<4x16x64xbf16, #tpu.memory_space<vmem>>, vector<1x16x64xbf16>
    %190 = vector.shape_cast %189 : vector<1x16x64xbf16> to vector<16x64xbf16>
    %cst_86 = arith.constant dense<0.000000e+00> : vector<32x64xf32>
    %191 = tpu.matmul %188, %190, %cst_86 {dimension_numbers = #tpu.dot_dimension_numbers<[1], [0], [0], [1], [0, 0, 1, 1], [], []>} : vector<32x16xbf16>, vector<16x64xbf16>, vector<32x64xf32> -> vector<32x64xf32>
    %192 = arith.addf %170, %191 : vector<32x64xf32>
    %c0_87 = arith.constant 0 : index
    %c0_88 = arith.constant 0 : index
    %193 = vector.load %arg8[%c0_87, %c0_88] : memref<1x64xf32, #tpu.memory_space<vmem>>, vector<1x64xf32>
    %194 = vector.broadcast %193 : vector<1x64xf32> to vector<32x64xf32>
    %195 = arith.addf %192, %194 : vector<32x64xf32>
    %cst_89 = arith.constant dense<0.000000e+00> : vector<32xf32>
    %196 = vector.multi_reduction <add>, %195, %cst_89 [1] : vector<32x64xf32> to vector<32xf32>
    %197 = vector.shape_cast %196 : vector<32xf32> to vector<32x1xf32>
    %cst_90 = arith.constant 6.400000e+01 : f32
    %198 = vector.broadcast %cst_90 : f32 to vector<32x1xf32>
    %199 = arith.divf %197, %198 : vector<32x1xf32>
    %200 = vector.broadcast %199 : vector<32x1xf32> to vector<32x64xf32>
    %201 = arith.subf %195, %200 : vector<32x64xf32>
    %202 = arith.mulf %201, %201 : vector<32x64xf32>
    %cst_91 = arith.constant dense<0.000000e+00> : vector<32xf32>
    %203 = vector.multi_reduction <add>, %202, %cst_91 [1] : vector<32x64xf32> to vector<32xf32>
    %204 = vector.shape_cast %203 : vector<32xf32> to vector<32x1xf32>
    %cst_92 = arith.constant 6.400000e+01 : f32
    %205 = vector.broadcast %cst_92 : f32 to vector<32x1xf32>
    %206 = arith.divf %204, %205 : vector<32x1xf32>
    %207 = vector.broadcast %199 : vector<32x1xf32> to vector<32x64xf32>
    %208 = arith.subf %195, %207 : vector<32x64xf32>
    %cst_93 = arith.constant 9.99999974E-6 : f32
    %209 = vector.broadcast %cst_93 : f32 to vector<32x1xf32>
    %210 = arith.addf %206, %209 : vector<32x1xf32>
    %211 = math.rsqrt %210 : vector<32x1xf32>
    %212 = vector.broadcast %211 : vector<32x1xf32> to vector<32x64xf32>
    %213 = arith.mulf %208, %212 : vector<32x64xf32>
    %214 = arith.truncf %213 : vector<32x64xf32> to vector<32x64xbf16>
    %c0_94 = arith.constant 0 : index
    %c0_95 = arith.constant 0 : index
    %215 = vector.load %arg9[%c0_94, %c0_95] : memref<64x4xbf16, #tpu.memory_space<vmem>>, vector<64x4xbf16>
    %cst_96 = arith.constant dense<0.000000e+00> : vector<32x4xf32>
    %216 = tpu.matmul %214, %215, %cst_96 {dimension_numbers = #tpu.dot_dimension_numbers<[1], [0], [0], [1], [0, 0, 1, 1], [], []>} : vector<32x64xbf16>, vector<64x4xbf16>, vector<32x4xf32> -> vector<32x4xf32>
    %c0_97 = arith.constant 0 : index
    %c0_98 = arith.constant 0 : index
    %217 = vector.load %arg10[%c0_97, %c0_98] : memref<1x4xf32, #tpu.memory_space<vmem>>, vector<1x4xf32>
    %218 = vector.broadcast %217 : vector<1x4xf32> to vector<32x4xf32>
    %219 = arith.addf %216, %218 : vector<32x4xf32>
    %cst_99 = arith.constant 5.000000e-01 : f32
    %220 = vector.broadcast %cst_99 : f32 to vector<32x4xf32>
    %221 = arith.mulf %220, %219 : vector<32x4xf32>
    %cst_100 = arith.constant 0.707106769 : f32
    %222 = vector.broadcast %cst_100 : f32 to vector<32x4xf32>
    %223 = arith.mulf %219, %222 : vector<32x4xf32>
    %224 = math.absf %223 : vector<32x4xf32>
    %cst_101 = arith.constant 0.327591091 : f32
    %225 = vector.broadcast %cst_101 : f32 to vector<32x4xf32>
    %226 = arith.mulf %225, %224 : vector<32x4xf32>
    %cst_102 = arith.constant 1.000000e+00 : f32
    %227 = vector.broadcast %cst_102 : f32 to vector<32x4xf32>
    %228 = arith.addf %227, %226 : vector<32x4xf32>
    %cst_103 = arith.constant 1.000000e+00 : f32
    %229 = vector.broadcast %cst_103 : f32 to vector<32x4xf32>
    %230 = arith.divf %229, %228 : vector<32x4xf32>
    %cst_104 = arith.constant 1.06140542 : f32
    %231 = vector.broadcast %cst_104 : f32 to vector<32x4xf32>
    %232 = arith.mulf %231, %230 : vector<32x4xf32>
    %cst_105 = arith.constant -1.45315206 : f32
    %233 = vector.broadcast %cst_105 : f32 to vector<32x4xf32>
    %234 = arith.addf %232, %233 : vector<32x4xf32>
    %235 = arith.mulf %234, %230 : vector<32x4xf32>
    %cst_106 = arith.constant 1.42141378 : f32
    %236 = vector.broadcast %cst_106 : f32 to vector<32x4xf32>
    %237 = arith.addf %235, %236 : vector<32x4xf32>
    %238 = arith.mulf %237, %230 : vector<32x4xf32>
    %cst_107 = arith.constant -0.284496725 : f32
    %239 = vector.broadcast %cst_107 : f32 to vector<32x4xf32>
    %240 = arith.addf %238, %239 : vector<32x4xf32>
    %241 = arith.mulf %240, %230 : vector<32x4xf32>
    %cst_108 = arith.constant 0.254829586 : f32
    %242 = vector.broadcast %cst_108 : f32 to vector<32x4xf32>
    %243 = arith.addf %241, %242 : vector<32x4xf32>
    %244 = arith.mulf %243, %230 : vector<32x4xf32>
    %cst_109 = arith.constant 0.000000e+00 : f32
    %245 = vector.broadcast %cst_109 : f32 to vector<32x4xf32>
    %246 = arith.subf %245, %224 : vector<32x4xf32>
    %247 = arith.mulf %246, %224 : vector<32x4xf32>
    %248 = math.exp %247 : vector<32x4xf32>
    %249 = arith.mulf %244, %248 : vector<32x4xf32>
    %cst_110 = arith.constant 1.000000e+00 : f32
    %250 = vector.broadcast %cst_110 : f32 to vector<32x4xf32>
    %251 = arith.subf %250, %249 : vector<32x4xf32>
    %cst_111 = arith.constant 0.000000e+00 : f32
    %252 = vector.broadcast %cst_111 : f32 to vector<32x4xf32>
    %253 = arith.cmpf oge, %223, %252 : vector<32x4xf32>
    %cst_112 = arith.constant 0.000000e+00 : f32
    %254 = vector.broadcast %cst_112 : f32 to vector<32x4xf32>
    %255 = arith.subf %254, %251 : vector<32x4xf32>
    %256 = arith.select %253, %251, %255 : vector<32x4xi1>, vector<32x4xf32>
    %cst_113 = arith.constant 1.000000e+00 : f32
    %257 = vector.broadcast %cst_113 : f32 to vector<32x4xf32>
    %258 = arith.addf %257, %256 : vector<32x4xf32>
    %259 = arith.mulf %221, %258 : vector<32x4xf32>
    %260 = arith.truncf %259 : vector<32x4xf32> to vector<32x4xbf16>
    %c0_114 = arith.constant 0 : index
    %c0_115 = arith.constant 0 : index
    %261 = vector.load %arg11[%c0_114, %c0_115] : memref<4x64xbf16, #tpu.memory_space<vmem>>, vector<4x64xbf16>
    %cst_116 = arith.constant dense<0.000000e+00> : vector<32x64xf32>
    %262 = tpu.matmul %260, %261, %cst_116 {dimension_numbers = #tpu.dot_dimension_numbers<[1], [0], [0], [1], [0, 0, 1, 1], [], []>} : vector<32x4xbf16>, vector<4x64xbf16>, vector<32x64xf32> -> vector<32x64xf32>
    %263 = arith.addf %195, %262 : vector<32x64xf32>
    %c0_117 = arith.constant 0 : index
    %c0_118 = arith.constant 0 : index
    %264 = vector.load %arg12[%c0_117, %c0_118] : memref<1x64xf32, #tpu.memory_space<vmem>>, vector<1x64xf32>
    %265 = vector.broadcast %264 : vector<1x64xf32> to vector<32x64xf32>
    %266 = arith.addf %263, %265 : vector<32x64xf32>
    %c0_119 = arith.constant 0 : index
    %c0_120 = arith.constant 0 : index
    %267 = vector.load %arg13[%c0_119, %c0_120] : memref<32x64xf32, #tpu.memory_space<vmem>>, vector<32x64xf32>
    tpu.vector_store %arg13[%c0_119, %c0_120], %266 {strides = array<i32>} : memref<32x64xf32, #tpu.memory_space<vmem>>, vector<32x64xf32>,
    return
  }
  func.func @transform_0(%arg0: i32) -> (i32, i32) {
    %c0_i32 = arith.constant 0 : i32
    %c0_i32_0 = arith.constant 0 : i32
    return %arg0, %c0_i32 : i32, i32
  }
  func.func @transform_1(%arg0: i32) -> (i32, i32, i32) {
    %c0_i32 = arith.constant 0 : i32
    %c0_i32_0 = arith.constant 0 : i32
    %c0_i32_1 = arith.constant 0 : i32
    %c0_i32_2 = arith.constant 0 : i32
    return %c0_i32, %c0_i32_0, %c0_i32_1 : i32, i32, i32
  }
  func.func @transform_2(%arg0: i32) -> (i32, i32, i32) {
    %c0_i32 = arith.constant 0 : i32
    %c0_i32_0 = arith.constant 0 : i32
    %c0_i32_1 = arith.constant 0 : i32
    %c0_i32_2 = arith.constant 0 : i32
    return %c0_i32, %c0_i32_0, %c0_i32_1 : i32, i32, i32
  }
  func.func @transform_3(%arg0: i32) -> (i32, i32) {
    %c0_i32 = arith.constant 0 : i32
    %c0_i32_0 = arith.constant 0 : i32
    %c0_i32_1 = arith.constant 0 : i32
    return %c0_i32, %c0_i32_0 : i32, i32
  }
  func.func @transform_4(%arg0: i32) -> (i32, i32) {
    %c0_i32 = arith.constant 0 : i32
    %c0_i32_0 = arith.constant 0 : i32
    %c0_i32_1 = arith.constant 0 : i32
    return %c0_i32, %c0_i32_0 : i32, i32
  }
  func.func @transform_5(%arg0: i32) -> (i32, i32, i32) {
    %c0_i32 = arith.constant 0 : i32
    %c0_i32_0 = arith.constant 0 : i32
    %c0_i32_1 = arith.constant 0 : i32
    %c0_i32_2 = arith.constant 0 : i32
    return %c0_i32, %c0_i32_0, %c0_i32_1 : i32, i32, i32
  }
  func.func @transform_6(%arg0: i32) -> (i32, i32, i32) {
    %c0_i32 = arith.constant 0 : i32
    %c0_i32_0 = arith.constant 0 : i32
    %c0_i32_1 = arith.constant 0 : i32
    %c0_i32_2 = arith.constant 0 : i32
    return %c0_i32, %c0_i32_0, %c0_i32_1 : i32, i32, i32
  }
  func.func @transform_7(%arg0: i32) -> (i32, i32) {
    %c0_i32 = arith.constant 0 : i32
    %c0_i32_0 = arith.constant 0 : i32
    %c0_i32_1 = arith.constant 0 : i32
    return %c0_i32, %c0_i32_0 : i32, i32
  }
  func.func @transform_8(%arg0: i32) -> (i32, i32) {
    %c0_i32 = arith.constant 0 : i32
    %c0_i32_0 = arith.constant 0 : i32
    %c0_i32_1 = arith.constant 0 : i32
    return %c0_i32, %c0_i32_0 : i32, i32
  }
  func.func @transform_9(%arg0: i32) -> (i32, i32) {
    %c0_i32 = arith.constant 0 : i32
    %c0_i32_0 = arith.constant 0 : i32
    %c0_i32_1 = arith.constant 0 : i32
    return %c0_i32, %c0_i32_0 : i32, i32
  }
  func.func @transform_10(%arg0: i32) -> (i32, i32) {
    %c0_i32 = arith.constant 0 : i32
    %c0_i32_0 = arith.constant 0 : i32
    %c0_i32_1 = arith.constant 0 : i32
    return %c0_i32, %c0_i32_0 : i32, i32
  }
  func.func @transform_11(%arg0: i32) -> (i32, i32) {
    %c0_i32 = arith.constant 0 : i32
    %c0_i32_0 = arith.constant 0 : i32
    %c0_i32_1 = arith.constant 0 : i32
    return %c0_i32, %c0_i32_0 : i32, i32
  }
  func.func @transform_12(%arg0: i32) -> (i32, i32) {
    %c0_i32 = arith.constant 0 : i32
    %c0_i32_0 = arith.constant 0 : i32
    return %arg0, %c0_i32 : i32, i32
  }
}

</mosaic_0001>

<bundles_post_ra>
// kernel: tpu_custom_call.1
= control target key start
LH: loop header
LB: loop body
LE: loop exit
PB: predicated region body
PF: predicated region fallthrough
CT: control target
= control target key end

     0   :  { %s3457_s21 = smov 0   ;;  %s3944_s0 = inlined_call_operand.vmem [shape: bf16[128,64], index: 0, kind: input, shape index: {}]   ;;  %s3945_s1 = inlined_call_operand.vmem [shape: bf16[3,64,64], index: 1, kind: input, shape index: {}]   ;;  %s3946_s2 = inlined_call_operand.vmem [shape: f32[3,1,64], index: 2, kind: input, shape index: {}]   ;;  %s3947_s3 = inlined_call_operand.vmem [shape: bf16[64,12], index: 3, kind: input, shape index: {}]   ;;  %s3948_s4 = inlined_call_operand.vmem [shape: f32[1,12], index: 4, kind: input, shape index: {}]   ;;  %s3949_s5 = inlined_call_operand.vmem [shape: bf16[3,12,64], index: 5, kind: input, shape index: {}]   ;;  %s3950_s6 = inlined_call_operand.vmem [shape: bf16[4,16,64], index: 6, kind: input, shape index: {}]   ;;  %s3951_s7 = inlined_call_operand.vmem [shape: f32[1,64], index: 7, kind: input, shape index: {}]   ;;  %s3952_s8 = inlined_call_operand.vmem [shape: bf16[64,4], index: 8, kind: input, shape index: {}]   ;;  %s3953_s9 = inlined_call_operand.vmem [shape: f32[1,4], index: 9, kind: input, shape index: {}]   ;;  %s3954_s10 = inlined_call_operand.vmem [shape: bf16[4,64], index: 10, kind: input, shape index: {}]   ;;  %s3955_s11 = inlined_call_operand.vmem [shape: f32[1,64], index: 11, kind: input, shape index: {}]   ;;  %s3956_s12 = inlined_call_operand.vmem [shape: f32[128,64], index: 12, kind: output, shape index: {}]  }
   0x1 LB: > { %s2812_s22 = sadd.s32 4294967295, %s3385_s21   ;;  %p2816_p0 = scmp.ge.s32.totalorder %s3385_s21, 1  ;;  %s3385_s21 = sphi %s3457_s21, %s22_s21  }
   0x2   : > { %p363_p1 = scmp.lt.s32.totalorder %s3385_s21, 5 }
   0x4   : > { %p364_p2 = pnand %p2816_p0, %p363_p1 }
   0x5   : > { %s2817_s23 = sshll.u32 (!%p364_p2), %s2812_s22, 2  ;;  %s3389_s26 = smov (!%p364_p2), 112  }
   0x6   : > { %367 = sbr.rel (%p364_p2) target bundleno = 4533 (0x11b5), region = 68  ;;  %p406_p3 = scmp.lt.s32.totalorder (!%p364_p2), %s2817_s23, 15 }
   0x7   : > { %s3391_s14 = smov (!%p364_p2), 80  }
   0xb   : > { %s3958_s23 = smov (!%p406_p3, %s2817_s23), 15  ;;  %vm426_vm0 = vcmask 523264   ;;  %v3238_v30 = vld [vmem:[%s3947_s3 + $0x18] sm:$0xff]   ;;  %v3239_v31 = vld [vmem:[%s3947_s3 + $0x10] sm:$0xff]   ;;  %v3240_v32 = vld [vmem:[%s3947_s3 + $0x8] sm:$0xff]   ;;  %vm708_vm1 = vcmask 1045504  }
   0xc   : > { %s2818_s24 = sshll.u32 %s3958_s23, 2  ;;  %3015 = vmatprep.subr.bf16.mxu0 %v3238_v30  ;;  %v3241_v33 = vld [vmem:[%s3947_s3] sm:$0xff]   ;;  %v3243_v57 = vld [vmem:[%s3949_s5 + $0x8] sm:$0x3f]   ;;  %v3510_v60 = vld [vmem:[%s3945_s1 + $0x18] sm:$0xff]   ;;  %vm701_vm6 = vcmask 97280  }
   0xd   : > { %s409_s27 = scalar_lea.vmem %s3944_s0, %s2818_s24  ;;  %3016 = vmatpush3.bf16.msra.mxu0 %v3238_v30  ;;  %v3242_v56 = vld [vmem:[%s3949_s5] sm:$0x3f]   ;;  %v881_v59 = vsel %vm708_vm1, %v3243_v57, 0  ;;  %v3246_v61 = vld [vmem:[%s3949_s5 + $0x10] sm:$0x3f]   ;;  %vm3388_vm7 = vmmov 0  }
   0xe   : > { %v3471_v0 = vld [vmem:[%s409_s27] sm:$0xff]   ;;  %v3473_v1 = vld [vmem:[%s409_s27 + $0x8] sm:$0xff]   ;;  %3017 = vmatprep.subr.bf16.mxu0 %v3239_v31  ;;  %3219 = vmatprep.subr.msk.bf16.mxu1 %vm708_vm1, %v3242_v56  ;;  %v710_v58 = vsel %vm708_vm1, %v3242_v56, 0  ;;  %v3516_v62 = vsel %vm708_vm1, %v3246_v61, 0  ;;  %vm1175_vm8 = vcmask 130048   ;;  %s3390_s27 = smov 96  }
   0xf   : > { %v422_v2 = vunpack.c.l.bf16 %v3471_v0  ;;  %v424_v3 = vunpack.c.l.bf16 %v3473_v1  ;;  %v423_v4 = vunpack.c.h.bf16 %v3471_v0  ;;  %v425_v5 = vunpack.c.h.bf16 %v3473_v1  ;;  %3028 = vmatpush3.bf16.msra.mxu1 %v710_v58  ;;  %v2821_v63 = vld [vmem:[%s3948_s4] ss:$0 sm:$0xff]  ;;  %s2820_s17 = sshll.u32 %s3958_s23, 3 }
  0x10   : > { %3033 = vmatprep.subr.bf16.mxu1 %v3510_v60  ;;  %vm2684_vm9 = vcmask 1041408   ;;  %vm2677_vm14 = vcmask 31744   ;;  %s415_s24 = scalar_lea.vmem %s3956_s12, %s2820_s17 }
  0x11   : > { %v427_v6 = vsel %vm426_vm0, %v422_v2, 0.0  ;;  %v433_v7 = vsel %vm426_vm0, %v424_v3, 0.0  ;;  %v430_v8 = vsel %vm426_vm0, %v423_v4, 0.0  ;;  %v436_v9 = vsel %vm426_vm0, %v425_v5, 0.0  ;;  %3018 = vmatpush3.bf16.msra.mxu0 %v3239_v31 }
  0x12   : > { %428 = vadd.xlane.f32.xlu0 %v427_v6  ;;  %434 = vadd.xlane.f32.xlu1 %v433_v7 }
  0x13   : > { %3019 = vmatprep.subr.bf16.mxu0 %v3240_v32 }
  0x15   : > { %3020 = vmatpush3.bf16.msra.mxu0 %v3240_v32 }
  0x16   : > { %431 = vadd.xlane.f32.xlu0 %v430_v8  ;;  %437 = vadd.xlane.f32.xlu1 %v436_v9 }
  0x17   : > { %3021 = vmatprep.subr.bf16.mxu0 %v3241_v33 }
  0x19   : > { %3022 = vmatpush3.bf16.msra.mxu0 %v3241_v33 }
  0x1a   : > { %3220 = vmatprep.subr.msk.bf16.mxu0 %vm708_vm1, %v3243_v57 }
  0x9b   : > { %v429_v10 = vpop.xlane.xlu0 %428  ;;  %v435_v11 = vpop.xlane.xlu1 %434 }
  0x9c   : > { %v440_v12 = vmul.f32 0.015625, %v429_v10  ;;  %v442_v13 = vmul.f32 0.015625, %v435_v11 }
  0x9e   : > { %v444_v14 = vsub.f32 %v422_v2, %v440_v12  ;;  %v446_v15 = vsub.f32 %v424_v3, %v442_v13 }
  0x9f   : > { %v432_v16 = vpop.xlane.xlu0 %431  ;;  %v438_v17 = vpop.xlane.xlu1 %437 }
  0xa0   : > { %v441_v18 = vmul.f32 0.015625, %v432_v16  ;;  %v443_v19 = vmul.f32 0.015625, %v438_v17  ;;  %v448_v20 = vmul.f32 %v444_v14, %v444_v14  ;;  %v450_v21 = vmul.f32 %v446_v15, %v446_v15 }
  0xa2   : > { %v445_v22 = vsub.f32 %v423_v4, %v441_v18  ;;  %v447_v23 = vsub.f32 %v425_v5, %v443_v19  ;;  %v452_v24 = vsel %vm426_vm0, %v448_v20, 0.0  ;;  %v458_v25 = vsel %vm426_vm0, %v450_v21, 0.0 }
  0xa3   : > { %453 = vadd.xlane.f32.xlu0 %v452_v24 }
  0xa4   : > { %v449_v26 = vmul.f32 %v445_v22, %v445_v22  ;;  %v451_v27 = vmul.f32 %v447_v23, %v447_v23 }
  0xa6   : > { %v455_v28 = vsel %vm426_vm0, %v449_v26, 0.0  ;;  %v461_v29 = vsel %vm426_vm0, %v451_v27, 0.0 }
  0xa7   : > { %459 = vadd.xlane.f32.xlu0 %v458_v25  ;;  %456 = vadd.xlane.f32.xlu1 %v455_v28 }
  0xab   : > { %462 = vadd.xlane.f32.xlu1 %v461_v29 }
 0x12c   : > { %v454_v34 = vpop.xlane.xlu0 %453 }
 0x12d   : > { %v464_v35 = vmul.f32 0.015625, %v454_v34 }
 0x12f   : > { %v468_v36 = vadd.f32 1e-05, %v464_v35 }
 0x130   : > { %v457_v37 = vpop.xlane.xlu1 %456  ;;  %v460_v38 = vpop.xlane.xlu0 %459 }
 0x131   : > { %v465_v39 = vmul.f32 0.015625, %v457_v37  ;;  %v466_v40 = vmul.f32 0.015625, %v460_v38  ;;  %3267 = vrsqrt.f32 %v468_v36 }
 0x133   : > { %v469_v41 = vadd.f32 1e-05, %v465_v39  ;;  %v470_v42 = vadd.f32 1e-05, %v466_v40 }
 0x134   : > { %v463_v43 = vpop.xlane.xlu1 %462 }
 0x135   : > { %3269 = vrsqrt.f32 %v469_v41  ;;  %v467_v44 = vmul.f32 0.015625, %v463_v43 }
 0x136   : > { %3271 = vrsqrt.f32 %v470_v42 }
 0x137   : > { %v471_v45 = vadd.f32 1e-05, %v467_v44 }
 0x139   : > { %3273 = vrsqrt.f32 %v471_v45 }
 0x13e   : > { %v3268_v46 = vpop.eup %3267 }
 0x13f   : > { %v476_v48 = vmul.f32 %v3268_v46, %v444_v14 }
 0x142   : > { %v3270_v47 = vpop.eup %3269 }
 0x143   : > { %v477_v49 = vmul.f32 %v3270_v47, %v445_v22  ;;  %v3272_v50 = vpop.eup %3271 }
 0x144   : > { %v478_v53 = vmul.f32 %v3272_v50, %v446_v15 }
 0x145   : > { %v480_v51 = vpack.c.bf16 %v477_v49, %v476_v48 }
 0x146   : > { %v3274_v52 = vpop.eup %3273 }
 0x147   : > { %3023 = vmatprep.mubr.msk.bf16.mxu0 %vm426_vm0, %v480_v51  ;;  %v479_v54 = vmul.f32 %v3274_v52, %v447_v23 }
 0x149   : > { %v481_v55 = vpack.c.bf16 %v479_v54, %v478_v53 }
 0x14b   : > { %3024 = vmatmul.mubr.msk.bf16.vlgmr.msra.gmra.mxu0 %vm426_vm0, %v481_v55 }
 0x14c   : > { %3046 = vmatpush3.bf16.msra.mxu0 %v881_v59 }
 0x14d   : > { %3221 = vmatprep.subr.msk.bf16.mxu0 %vm708_vm1, %v3246_v61 }
 0x20b   : > { %v3025_v2 = vpop.f32.mrf.mxu0 }
 0x20c   : > { %v3521_v3 = vadd.f32 %v3025_v2, %v2821_v63 }
 0x20d   : > { %v561_v4 = vpop.f32.mrf.mxu0 }
 0x20e   : > { %v3524_v5 = vmul.f32 0.70710677, %v3521_v3  ;;  %v3526_v6 = vadd.f32 %v2821_v63, %v561_v4 }
 0x20f   : > { %v3026_v7 = vpop.f32.mrf.mxu0 }
 0x210   : > { %v586_v8 = vand.u32 2147483647, %v3524_v5  ;;  %v3530_v9 = vmul.f32 0.70710677, %v3526_v6  ;;  %v3532_v10 = vadd.f32 %v3026_v7, %v2821_v63  ;;  %vm666_vm3 = vcmp.ge.f32.partialorder %v3524_v5, 0.0 }
 0x211   : > { %v564_v11 = vpop.f32.mrf.mxu0 }
 0x212   : > { %v590_v12 = vmul.f32 0.3275911, %v586_v8  ;;  %v584_v13 = vand.u32 2147483647, %v3530_v9  ;;  %v3536_v14 = vmul.f32 0.70710677, %v3532_v10  ;;  %v3538_v15 = vadd.f32 %v2821_v63, %v564_v11 }
 0x213   : > { %v642_v26 = vsub.f32 0.0, %v586_v8  ;;  %vm664_vm2 = vcmp.ge.f32.partialorder %v3530_v9, 0.0  ;;  %v576_v9 = vmul.f32 0.5, %v3526_v6  ;;  %v3248_v6 = vld [vmem:[%s3945_s1 + $0x58] sm:$0xff]  }
 0x214   : > { %v594_v16 = vadd.f32 1.0, %v590_v12  ;;  %v588_v17 = vmul.f32 0.3275911, %v584_v13  ;;  %v587_v18 = vand.u32 2147483647, %v3536_v14  ;;  %v640_v27 = vsub.f32 0.0, %v584_v13 }
 0x215   : > { %v3542_v19 = vmul.f32 0.70710677, %v3538_v15  ;;  %v646_v28 = vmul.f32 %v642_v26, %v586_v8  ;;  %vm667_vm4 = vcmp.ge.f32.partialorder %v3536_v14, 0.0 }
 0x216   : > { %3275 = vrcp.f32 %v594_v16  ;;  %v592_v20 = vadd.f32 1.0, %v588_v17  ;;  %v591_v21 = vmul.f32 0.3275911, %v587_v18  ;;  %v643_v29 = vsub.f32 0.0, %v587_v18 }
 0x217   : > { %v585_v22 = vand.u32 2147483647, %v3542_v19  ;;  %v644_v31 = vmul.f32 %v640_v27, %v584_v13  ;;  %v652_v33 = vmul.f32 1.442695, %v646_v28  ;;  %vm665_vm5 = vcmp.ge.f32.partialorder %v3542_v19, 0.0  ;;  %v3245_v19 = vld [vmem:[%s3945_s1 + $0x10] sm:$0xff]  }
 0x218   : > { %3277 = vrcp.f32 %v592_v20  ;;  %v595_v23 = vadd.f32 1.0, %v591_v21  ;;  %v647_v35 = vmul.f32 %v643_v29, %v587_v18 }
 0x219   : > { %v589_v24 = vmul.f32 0.3275911, %v585_v22  ;;  %v641_v34 = vsub.f32 0.0, %v585_v22  ;;  %v648_v39 = vmul.f32 1.442695, %v644_v31 }
 0x21a   : > { %3279 = vrcp.f32 %v595_v23  ;;  %v654_v45 = vmul.f32 1.442695, %v647_v35 }
 0x21b   : > { %v593_v25 = vadd.f32 1.0, %v589_v24  ;;  %v645_v42 = vmul.f32 %v641_v34, %v585_v22 }
 0x21d   : > { %3281 = vrcp.f32 %v593_v25  ;;  %v650_v52 = vmul.f32 1.442695, %v645_v42 }
 0x21e   : > { %3283 = vpow2.f32 %v652_v33 }
 0x21f   : > { %3285 = vpow2.f32 %v648_v39 }
 0x220   : > { %3287 = vpow2.f32 %v654_v45 }
 0x221   : > { %3289 = vpow2.f32 %v650_v52 }
 0x223   : > { %v3276_v30 = vpop.eup %3275 }
 0x224   : > { %v606_v32 = vmul.f32 1.0614054, %v3276_v30 }
 0x225   : > { %v3278_v36 = vpop.eup %3277 }
 0x226   : > { %v610_v37 = vadd.f32 -1.4531521, %v606_v32  ;;  %v604_v38 = vmul.f32 1.0614054, %v3278_v36 }
 0x227   : > { %v3280_v40 = vpop.eup %3279 }
 0x228   : > { %v614_v41 = vmul.f32 %v3276_v30, %v610_v37  ;;  %v608_v43 = vadd.f32 -1.4531521, %v604_v38  ;;  %v607_v44 = vmul.f32 1.0614054, %v3280_v40 }
 0x22a   : > { %v618_v46 = vadd.f32 1.4214138, %v614_v41  ;;  %v3282_v47 = vpop.eup %3281  ;;  %v612_v48 = vmul.f32 %v3278_v36, %v608_v43  ;;  %v611_v49 = vadd.f32 -1.4531521, %v607_v44 }
 0x22b   : > { %v605_v51 = vmul.f32 1.0614054, %v3282_v47  ;;  %v3284_v16 = vpop.eup %3283 }
 0x22c   : > { %v622_v50 = vmul.f32 %v3276_v30, %v618_v46  ;;  %v616_v53 = vadd.f32 1.4214138, %v612_v48  ;;  %v615_v54 = vmul.f32 %v3280_v40, %v611_v49  ;;  %v3286_v24 = vpop.eup %3285  ;;  %v579_v48 = vmul.f32 0.5, %v3532_v10  ;;  %v3249_v10 = vld [vmem:[%s3945_s1] sm:$0xff]  }
 0x22d   : > { %v609_v56 = vadd.f32 -1.4531521, %v605_v51  ;;  %v3288_v29 = vpop.eup %3287  ;;  %v578_v51 = vmul.f32 0.5, %v3521_v3  ;;  %v3247_v3 = vld [vmem:[%s3945_s1 + $0x8] sm:$0xff]  }
 0x22e   : > { %v626_v55 = vadd.f32 -0.28449672, %v622_v50  ;;  %v620_v57 = vmul.f32 %v3278_v36, %v616_v53  ;;  %v619_v58 = vadd.f32 1.4214138, %v615_v54  ;;  %v3290_v35 = vpop.eup %3289  ;;  %v577_v50 = vmul.f32 0.5, %v3538_v15  ;;  %v3252_v15 = vld [vmem:[%s3945_s1 + $0x48] sm:$0xff]  }
 0x22f   : > { %v613_v61 = vmul.f32 %v3282_v47, %v609_v56 }
 0x230   : > { %v630_v59 = vmul.f32 %v3276_v30, %v626_v55  ;;  %v624_v63 = vadd.f32 -0.28449672, %v620_v57  ;;  %v623_v2 = vmul.f32 %v3280_v40, %v619_v58  ;;  %v3253_v57 = vld [vmem:[%s3945_s1 + $0x30] sm:$0xff]   ;;  %v3254_v58 = vld [vmem:[%s3945_s1 + $0x40] sm:$0xff]  }
 0x231   : > { %v617_v7 = vadd.f32 1.4214138, %v613_v61  ;;  %v3256_v61 = vld [vmem:[%s3945_s1 + $0x20] sm:$0xff]  }
 0x232   : > { %v634_v4 = vadd.f32 0.2548296, %v630_v59  ;;  %v628_v8 = vmul.f32 %v3278_v36, %v624_v63  ;;  %v627_v11 = vadd.f32 -0.28449672, %v623_v2  ;;  %v3255_v59 = vld [vmem:[%s3945_s1 + $0x28] sm:$0xff]   ;;  %v3387_v63 = vmov 0.0  }
 0x233   : > { %v621_v13 = vmul.f32 %v3282_v47, %v617_v7 }
 0x234   : > { %v638_v12 = vmul.f32 %v3276_v30, %v634_v4  ;;  %v632_v17 = vadd.f32 0.2548296, %v628_v8  ;;  %v631_v18 = vmul.f32 %v3280_v40, %v627_v11 }
 0x235   : > { %v625_v21 = vadd.f32 -0.28449672, %v621_v13 }
 0x236   : > { %v658_v20 = vmul.f32 %v3284_v16, %v638_v12  ;;  %v636_v22 = vmul.f32 %v3278_v36, %v632_v17  ;;  %v635_v23 = vadd.f32 0.2548296, %v631_v18 }
 0x237   : > { %v629_v25 = vmul.f32 %v3282_v47, %v625_v21 }
 0x238   : > { %v662_v26 = vsub.f32 1.0, %v658_v20  ;;  %v656_v27 = vmul.f32 %v3286_v24, %v636_v22  ;;  %v639_v28 = vmul.f32 %v3280_v40, %v635_v23 }
 0x239   : > { %v633_v31 = vadd.f32 0.2548296, %v629_v25 }
 0x23a   : > { %v660_v32 = vsub.f32 1.0, %v656_v27  ;;  %v659_v33 = vmul.f32 %v3288_v29, %v639_v28  ;;  %v670_v30 = vsub.f32 0.0, %v662_v26 }
 0x23b   : > { %v637_v34 = vmul.f32 %v3282_v47, %v633_v31  ;;  %v2881_v31 = vld [vmem:[%s3946_s2 + $0x2] ss:$0 sm:$0xff] }
 0x23c   : > { %v668_v37 = vsub.f32 0.0, %v660_v32  ;;  %v663_v38 = vsub.f32 1.0, %v659_v33  ;;  %v674_v40 = vsel %vm666_vm3, %v662_v26, %v670_v30 }
 0x23d   : > { %v657_v39 = vmul.f32 %v3290_v35, %v637_v34  ;;  %v678_v47 = vadd.f32 1.0, %v674_v40 }
 0x23e   : > { %v671_v41 = vsub.f32 0.0, %v663_v38  ;;  %v672_v36 = vsel %vm664_vm2, %v660_v32, %v668_v37 }
 0x23f   : > { %v661_v42 = vsub.f32 1.0, %v657_v39  ;;  %v676_v46 = vadd.f32 1.0, %v672_v36  ;;  %v682_v54 = vmul.f32 %v678_v47, %v578_v51  ;;  %v2860_v36 = vld [vmem:[%s3946_s2 + $0x1] ss:$0 sm:$0xff] }
 0x240   : > { %v675_v43 = vsel %vm667_vm4, %v663_v38, %v671_v41 }
 0x241   : > { %v679_v44 = vadd.f32 1.0, %v675_v43  ;;  %v669_v45 = vsub.f32 0.0, %v661_v42  ;;  %v680_v52 = vmul.f32 %v676_v46, %v576_v9  ;;  %v2839_v9 = vld [vmem:[%s3946_s2] ss:$0 sm:$0xff] }
 0x243   : > { %v673_v49 = vsel %vm665_vm5, %v661_v42, %v669_v45  ;;  %v683_v14 = vmul.f32 %v679_v44, %v579_v48 }
 0x244   : > { %v677_v5 = vadd.f32 1.0, %v673_v49 }
 0x245   : > { %v685_v56 = vpack.c.bf16 %v683_v14, %v682_v54 }
 0x246   : > { %v681_v53 = vmul.f32 %v677_v5, %v577_v50 }
 0x248   : > { %v684_v55 = vpack.c.bf16 %v681_v53, %v680_v52 }
 0x24a   : > { %3029 = vmatprep.mubr.msk.bf16.mxu1 %vm701_vm6, %v684_v55  ;;  %3047 = vmatprep.mubr.msk.bf16.mxu0 %vm701_vm6, %v684_v55 }
 0x24b   : > { %3030 = vmatmul.mubr.msk.bf16.vlgmr.msra.gmra.mxu1 %vm701_vm6, %v685_v56  ;;  %3048 = vmatmul.mubr.msk.bf16.vlgmr.msra.gmra.mxu0 %vm701_vm6, %v685_v56 }
 0x24c   : > { %3034 = vmatpush3.bf16.msra.mxu1 %v3510_v60  ;;  %3065 = vmatprep.mubr.msk.bf16.mxu0 %vm701_vm6, %v684_v55  ;;  %v3250_v60 = vld [vmem:[%s3945_s1 + $0x50] sm:$0xff]  }
 0x24d   : > { %3035 = vmatprep.subr.bf16.mxu1 %v3245_v19  ;;  %3064 = vmatpush3.bf16.msra.mxu0 %v3516_v62  ;;  %v3251_v62 = vld [vmem:[%s3945_s1 + $0x38] sm:$0xff]  }
 0x24e   : > { %3069 = vmatprep.subr.bf16.mxu0 %v3248_v6  ;;  %3041 = vmatprep.mubr.msk.bf16.mxu1 %vm426_vm0, %v3471_v0 }
 0x250   : > { %3036 = vmatpush3.bf16.msra.mxu1 %v3245_v19 }
 0x251   : > { %3037 = vmatprep.subr.bf16.mxu1 %v3247_v3 }
 0x253   : > { %3066 = vmatmul.mubr.msk.bf16.vlgmr.msra.gmra.mxu0 %vm701_vm6, %v685_v56 }
 0x254   : > { %3038 = vmatpush3.bf16.msra.mxu1 %v3247_v3  ;;  %3070 = vmatpush3.bf16.msra.mxu0 %v3248_v6 }
 0x255   : > { %3039 = vmatprep.subr.bf16.mxu1 %v3249_v10  ;;  %3071 = vmatprep.subr.bf16.mxu0 %v3250_v60 }
 0x256   : > { %3077 = vmatprep.mubr.msk.bf16.mxu0 %vm426_vm0, %v3471_v0 }
 0x258   : > { %3040 = vmatpush3.bf16.msra.mxu1 %v3249_v10  ;;  %3072 = vmatpush3.bf16.msra.mxu0 %v3250_v60 }
 0x259   : > { %3051 = vmatprep.subr.bf16.mxu1 %v3251_v62  ;;  %3073 = vmatprep.subr.bf16.mxu0 %v3252_v15 }
 0x25b   : > { %3042 = vmatmul.mubr.msk.bf16.vlgmr.msra.gmra.mxu1 %vm426_vm0, %v3473_v1 }
 0x25c   : > { %3052 = vmatpush3.bf16.msra.mxu1 %v3251_v62  ;;  %3074 = vmatpush3.bf16.msra.mxu0 %v3252_v15 }
 0x25d   : > { %3053 = vmatprep.subr.bf16.mxu1 %v3253_v57  ;;  %3075 = vmatprep.subr.bf16.mxu0 %v3254_v58 }
 0x25e   : > { %3059 = vmatprep.mubr.msk.bf16.mxu1 %vm426_vm0, %v3471_v0 }
 0x260   : > { %3054 = vmatpush3.bf16.msra.mxu1 %v3253_v57  ;;  %3076 = vmatpush3.bf16.msra.mxu0 %v3254_v58 }
 0x261   : > { %3055 = vmatprep.subr.bf16.mxu1 %v3255_v59  ;;  %3093 = vmatprep.subr.bf16.mxu0 %v3387_v63 }
 0x263   : > { %3078 = vmatmul.mubr.msk.bf16.vlgmr.msra.gmra.mxu0 %vm426_vm0, %v3473_v1 }
 0x264   : > { %3056 = vmatpush3.bf16.msra.mxu1 %v3255_v59  ;;  %3095 = vmatprep.mubr.msk.bf16.mxu0 %vm3388_vm7, %v3387_v63 }
 0x265   : > { %3057 = vmatprep.subr.bf16.mxu1 %v3256_v61 }
 0x268   : > { %3058 = vmatpush3.bf16.msra.mxu1 %v3256_v61 }
 0x269   : > { %3081 = vmatprep.subr.bf16.mxu1 %v3387_v63 }
 0x26b   : > { %3060 = vmatmul.mubr.msk.bf16.vlgmr.msra.gmra.mxu1 %vm426_vm0, %v3473_v1 }
 0x26c   : > { %3083 = vmatprep.mubr.msk.bf16.mxu1 %vm3388_vm7, %v3387_v63 }
 0x30b   : > { %v3049_v0 = vpop.f32.mrf.mxu0  ;;  %v3031_v4 = vpop.f32.mrf.mxu1 }
 0x30d   : > { %v917_v2 = vpop.f32.mrf.mxu0  ;;  %v746_v11 = vpop.f32.mrf.mxu1 }
 0x30f   : > { %v3050_v7 = vpop.f32.mrf.mxu0  ;;  %v3032_v1 = vpop.f32.mrf.mxu1 }
 0x311   : > { %v920_v8 = vpop.f32.mrf.mxu0  ;;  %v749_v16 = vpop.f32.mrf.mxu1 }
 0x313   : > { %v3067_v12 = vpop.f32.mrf.mxu0 }
 0x315   : > { %v1073_v13 = vpop.f32.mrf.mxu0 }
 0x317   : > { %v3068_v17 = vpop.f32.mrf.mxu0 }
 0x319   : > { %v1076_v20 = vpop.f32.mrf.mxu0 }
 0x31b   : > { %v3043_v18 = vpop.f32.mrf.mxu1 }
 0x31c   : > { %v844_v55 = vadd.f32 %v3043_v18, %v3031_v4 }
 0x31d   : > { %v835_v21 = vpop.f32.mrf.mxu1 }
 0x31e   : > { %v836_v47 = vadd.f32 %v835_v21, %v746_v11  ;;  %v859_v10 = vadd.f32 %v2839_v9, %v844_v55 }
 0x31f   : > { %v3044_v23 = vpop.f32.mrf.mxu1 }
 0x320   : > { %v857_v51 = vadd.f32 %v2839_v9, %v836_v47  ;;  %v847_v52 = vadd.f32 %v3044_v23, %v3032_v1 }
 0x321   : > { %v838_v27 = vpop.f32.mrf.mxu1 }
 0x322   : > { %v839_v44 = vadd.f32 %v838_v27, %v749_v16  ;;  %v860_v6 = vadd.f32 %v2839_v9, %v847_v52 }
 0x323   : > { %v3079_v22 = vpop.f32.mrf.mxu0 }
 0x324   : > { %v858_v50 = vadd.f32 %v2839_v9, %v839_v44  ;;  %v1155_v19 = vadd.f32 %v3079_v22, %v3067_v12  ;;  %v3641_v62 = vpack.c.bf16 %v860_v6, %v859_v10 }
 0x325   : > { %v1146_v24 = vpop.f32.mrf.mxu0 }
 0x326   : > { %v1147_v26 = vadd.f32 %v1146_v24, %v1073_v13  ;;  %v3632_v53 = vpack.c.bf16 %v858_v50, %v857_v51  ;;  %v1171_v60 = vadd.f32 %v2881_v31, %v1155_v19 }
 0x327   : > { %v3080_v25 = vpop.f32.mrf.mxu0 }
 0x328   : > { %v1169_v33 = vadd.f32 %v2881_v31, %v1147_v26  ;;  %v1158_v54 = vadd.f32 %v3080_v25, %v3068_v17 }
 0x329   : > { %v1149_v28 = vpop.f32.mrf.mxu0 }
 0x32a   : > { %v1150_v29 = vadd.f32 %v1149_v28, %v1076_v20  ;;  %v1172_v3 = vadd.f32 %v2881_v31, %v1158_v54 }
 0x32b   : > { %v3061_v32 = vpop.f32.mrf.mxu1 }
 0x32c   : > { %v1170_v34 = vadd.f32 %v2881_v31, %v1150_v29  ;;  %v999_v45 = vadd.f32 %v3061_v32, %v3049_v0  ;;  %v3643_v15 = vpack.c.bf16 %v1172_v3, %v1171_v60 }
 0x32d   : > { %v990_v35 = vpop.f32.mrf.mxu1 }
 0x32e   : > { %v3615_v30 = vpack.c.bf16 %v1170_v34, %v1169_v33  ;;  %v991_v38 = vadd.f32 %v990_v35, %v917_v2  ;;  %v1015_v5 = vadd.f32 %v2860_v36, %v999_v45 }
 0x32f   : > { %v3062_v37 = vpop.f32.mrf.mxu1 }
 0x330   : > { %3094 = vmatpush3.bf16.msra.mxu0 %v3615_v30  ;;  %v1013_v42 = vadd.f32 %v2860_v36, %v991_v38  ;;  %v1002_v40 = vadd.f32 %v3062_v37, %v3050_v7 }
 0x331   : > { %v993_v39 = vpop.f32.mrf.mxu1  ;;  %3105 = vmatprep.subr.bf16.mxu0 %v3387_v63 }
 0x332   : > { %v994_v41 = vadd.f32 %v993_v39, %v920_v8  ;;  %v1016_v48 = vadd.f32 %v2860_v36, %v1002_v40 }
 0x334   : > { %v1014_v43 = vadd.f32 %v2860_v36, %v994_v41  ;;  %v3630_v14 = vpack.c.bf16 %v1016_v48, %v1015_v5 }
 0x336   : > { %v3622_v46 = vpack.c.bf16 %v1014_v43, %v1013_v42  ;;  %v1227_v56 = vsel %vm1175_vm8, %v3630_v14, 0 }
 0x338   : > { %v1180_v49 = vsel %vm1175_vm8, %v3622_v46, 0 }
 0x339   : > { %3082 = vmatpush3.bf16.xpose.msra.mxu1 %v1180_v49 }
 0x33a   : > { %3087 = vmatprep.subr.bf16.mxu1 %v3387_v63 }
 0x340   : > { %3084 = vmatmul.mubr.msk.bf16.vlgmr.msra.gmra.mxu1 %vm1175_vm8, %v3632_v53 }
 0x341   : > { %3088 = vmatpush3.bf16.xpose.msra.mxu1 %v1227_v56  ;;  %3089 = vmatprep.mubr.msk.bf16.mxu1 %vm3388_vm7, %v3387_v63 }
 0x342   : > { %3099 = vmatprep.subr.bf16.mxu1 %v3387_v63 }
 0x348   : > { %3090 = vmatmul.mubr.msk.bf16.vlgmr.msra.gmra.mxu1 %vm1175_vm8, %v3641_v62 }
 0x349   : > { %3100 = vmatpush3.bf16.msra.mxu1 %v3643_v15  ;;  %3101 = vmatprep.mubr.msk.bf16.mxu1 %vm3388_vm7, %v3387_v63 }
 0x34a   : > { %3111 = vmatprep.subr.bf16.mxu1 %v3387_v63 }
 0x400   : > { %v1216_v57 = vpop.f32.mrf.mxu1 }
 0x401   : > { %v1270_v58 = vsel %vm1175_vm8, %v1216_v57, -inf }
 0x402   : > { %1271 = vmax.xlane.f32.xlu0 %v1270_v58  ;;  %v3085_v59 = vpop.f32.mrf.mxu1 }
 0x404   : > { %v1219_v61 = vpop.f32.mrf.mxu1 }
 0x405   : > { %v1273_v0 = vsel %vm1175_vm8, %v1219_v61, -inf }
 0x406   : > { %1274 = vmax.xlane.f32.xlu1 %v1273_v0  ;;  %v3086_v2 = vpop.f32.mrf.mxu1 }
 0x408   : > { %v1263_v4 = vpop.f32.mrf.mxu1 }
 0x409   : > { %v1276_v7 = vsel %vm1175_vm8, %v1263_v4, -inf }
 0x40a   : > { %1277 = vmax.xlane.f32.xlu0 %v1276_v7  ;;  %v3091_v8 = vpop.f32.mrf.mxu1 }
 0x40c   : > { %v1266_v11 = vpop.f32.mrf.mxu1 }
 0x40d   : > { %v1279_v12 = vsel %vm1175_vm8, %v1266_v11, -inf }
 0x40e   : > { %1280 = vmax.xlane.f32.xlu1 %v1279_v12  ;;  %v3092_v1 = vpop.f32.mrf.mxu1 }
 0x48b   : > { %v1272_v13 = vpop.xlane.xlu0 %1271 }
 0x48c   : > { %v1282_v16 = vsub.f32 %v1216_v57, %v1272_v13 }
 0x48e   : > { %v1286_v17 = vmul.f32 1.442695, %v1282_v16 }
 0x48f   : > { %v1275_v18 = vpop.xlane.xlu1 %1274 }
 0x490   : > { %3291 = vpow2.f32 %v1286_v17  ;;  %v1283_v20 = vsub.f32 %v1219_v61, %v1275_v18 }
 0x492   : > { %v1288_v21 = vmul.f32 1.442695, %v1283_v20 }
 0x493   : > { %v1278_v22 = vpop.xlane.xlu0 %1277 }
 0x494   : > { %3293 = vpow2.f32 %v1288_v21  ;;  %v1284_v23 = vsub.f32 %v1263_v4, %v1278_v22 }
 0x496   : > { %v1290_v24 = vmul.f32 1.442695, %v1284_v23 }
 0x497   : > { %v1281_v32 = vpop.xlane.xlu1 %1280 }
 0x498   : > { %3295 = vpow2.f32 %v1290_v24  ;;  %v1285_v33 = vsub.f32 %v1266_v11, %v1281_v32 }
 0x49a   : > { %v1292_v34 = vmul.f32 1.442695, %v1285_v33 }
 0x49c   : > { %3297 = vpow2.f32 %v1292_v34 }
 0x49d   : > { %v3292_v25 = vpop.eup %3291 }
 0x49e   : > { %v1294_v26 = vsel %vm1175_vm8, %v3292_v25, 0.0 }
 0x49f   : > { %1295 = vadd.xlane.f32.xlu0 %v1294_v26 }
 0x4a1   : > { %v3294_v27 = vpop.eup %3293 }
 0x4a2   : > { %v1297_v28 = vsel %vm1175_vm8, %v3294_v27, 0.0 }
 0x4a3   : > { %1298 = vadd.xlane.f32.xlu1 %v1297_v28 }
 0x4a5   : > { %v3296_v29 = vpop.eup %3295 }
 0x4a6   : > { %v1300_v31 = vsel %vm1175_vm8, %v3296_v29, 0.0 }
 0x4a7   : > { %1301 = vadd.xlane.f32.xlu0 %v1300_v31 }
 0x4a9   : > { %v3298_v35 = vpop.eup %3297 }
 0x4aa   : > { %v1303_v37 = vsel %vm1175_vm8, %v3298_v35, 0.0 }
 0x4b4   : > { %1465 = vrot.lane.b32.xlu1 %v3630_v14, %s3389_s26 }
 0x4bd   : > { %1412 = vrot.lane.b32.xlu0 %v3622_v46, %s3389_s26 }
 0x4d8   : > { %1304 = vadd.xlane.f32.xlu1 %v1303_v37 }
 0x4e9   : > { %1409 = vrot.lane.b32.xlu1 %v3632_v53, %s3389_s26 }
 0x4ed   : > { %1462 = vrot.lane.b32.xlu1 %v3641_v62, %s3389_s26 }
 0x528   : > { %v1296_v38 = vpop.xlane.xlu0 %1295 }
 0x529   : > { %3299 = vrcp.f32 %v1296_v38 }
 0x52c   : > { %v1299_v39 = vpop.xlane.xlu1 %1298 }
 0x52d   : > { %3301 = vrcp.f32 %v1299_v39 }
 0x530   : > { %v1302_v41 = vpop.xlane.xlu0 %1301  ;;  %v1466_v48 = vpop.permute.xlu1 %1465 }
 0x531   : > { %3303 = vrcp.f32 %v1302_v41  ;;  %v1471_v55 = vsel %vm1175_vm8, %v1466_v48, 0 }
 0x534   : > { %v1413_v44 = vpop.permute.xlu0 %1412 }
 0x535   : > { %v1418_v47 = vsel %vm1175_vm8, %v1413_v44, 0 }
 0x536   : > { %v3300_v36 = vpop.eup %3299 }
 0x537   : > { %v1310_v40 = vmul.f32 %v3300_v36, %v3292_v25 }
 0x53a   : > { %v3302_v42 = vpop.eup %3301 }
 0x53b   : > { %v1311_v43 = vmul.f32 %v3302_v42, %v3294_v27 }
 0x53d   : > { %v1314_v45 = vpack.c.bf16 %v1311_v43, %v1310_v40 }
 0x53e   : > { %v3304_v50 = vpop.eup %3303 }
 0x53f   : > { %3096 = vmatmul.mubr.msk.bf16.vlgmr.msra.gmra.mxu0 %vm1175_vm8, %v1314_v45  ;;  %v1312_v51 = vmul.f32 %v3304_v50, %v3296_v29 }
 0x540   : > { %3106 = vmatpush3.bf16.xpose.msra.mxu0 %v1418_v47  ;;  %3107 = vmatprep.mubr.msk.bf16.mxu0 %vm3388_vm7, %v3387_v63 }
 0x541   : > { %3117 = vmatprep.subr.bf16.mxu0 %v3387_v63 }
 0x561   : > { %v1305_v49 = vpop.xlane.xlu1 %1304 }
 0x562   : > { %3305 = vrcp.f32 %v1305_v49 }
 0x565   : > { %v1410_v9 = vpop.permute.xlu1 %1409 }
 0x566   : > { %3108 = vmatmul.mubr.msk.bf16.vlgmr.msra.gmra.mxu0 %vm1175_vm8, %v1410_v9 }
 0x567   : > { %3119 = vmatprep.mubr.msk.bf16.mxu0 %vm3388_vm7, %v3387_v63 }
 0x569   : > { %v1463_v56 = vpop.permute.xlu1 %1462 }
 0x56f   : > { %v3306_v5 = vpop.eup %3305 }
 0x570   : > { %v1313_v52 = vmul.f32 %v3306_v5, %v3298_v35 }
 0x572   : > { %v1315_v54 = vpack.c.bf16 %v1313_v52, %v1312_v51  ;;  %v3257_v51 = vld [vmem:[%s3950_s6] sm:$0xff]  }
 0x574   : > { %3102 = vmatmul.mubr.msk.bf16.vlgmr.msra.gmra.mxu1 %vm1175_vm8, %v1315_v54 }
 0x575   : > { %3112 = vmatpush3.bf16.xpose.msra.mxu1 %v1471_v55  ;;  %3113 = vmatprep.mubr.msk.bf16.mxu1 %vm3388_vm7, %v3387_v63 }
 0x576   : > { %3123 = vmatprep.subr.bf16.mxu1 %v3387_v63 }
 0x57c   : > { %3114 = vmatmul.mubr.msk.bf16.vlgmr.msra.gmra.mxu1 %vm1175_vm8, %v1463_v56 }
 0x57d   : > { %3125 = vmatprep.mubr.msk.bf16.mxu1 %vm3388_vm7, %v3387_v63 }
 0x5ff   : > { %v3683_v19 = vpop.f32.mrf.mxu0 }
 0x601   : > { %v3097_v6 = vpop.f32.mrf.mxu0 }
 0x603   : > { %v3685_v3 = vpop.f32.mrf.mxu0 }
 0x604   : > { %v1404_v10 = vpack.c.bf16 %v3685_v3, %v3683_v19  ;;  %v3258_v3 = vld [vmem:[%s3950_s6 + $0x8] sm:$0xff]  }
 0x605   : > { %v3098_v60 = vpop.f32.mrf.mxu0 }
 0x626   : > { %v1454_v57 = vpop.f32.mrf.mxu0 }
 0x627   : > { %v1514_v58 = vsel %vm1175_vm8, %v1454_v57, -inf }
 0x628   : > { %1515 = vmax.xlane.f32.xlu0 %v1514_v58  ;;  %v3109_v59 = vpop.f32.mrf.mxu0 }
 0x62a   : > { %v1457_v61 = vpop.f32.mrf.mxu0 }
 0x62b   : > { %v1517_v0 = vsel %vm1175_vm8, %v1457_v61, -inf }
 0x62c   : > { %1518 = vmax.xlane.f32.xlu1 %v1517_v0  ;;  %v3110_v2 = vpop.f32.mrf.mxu0 }
 0x634   : > { %v3691_v4 = vpop.f32.mrf.mxu1 }
 0x636   : > { %v3103_v7 = vpop.f32.mrf.mxu1 }
 0x638   : > { %v3693_v8 = vpop.f32.mrf.mxu1 }
 0x639   : > { %v1405_v11 = vpack.c.bf16 %v3693_v8, %v3691_v4 }
 0x63a   : > { %v3104_v12 = vpop.f32.mrf.mxu1 }
 0x63c   : > { %v1507_v1 = vpop.f32.mrf.mxu1 }
 0x63d   : > { %v1520_v13 = vsel %vm1175_vm8, %v1507_v1, -inf }
 0x63e   : > { %1521 = vmax.xlane.f32.xlu0 %v1520_v13  ;;  %v3115_v16 = vpop.f32.mrf.mxu1 }
 0x640   : > { %v1510_v17 = vpop.f32.mrf.mxu1 }
 0x641   : > { %v1523_v18 = vsel %vm1175_vm8, %v1510_v17, -inf }
 0x642   : > { %1524 = vmax.xlane.f32.xlu0 %v1523_v18  ;;  %v3116_v20 = vpop.f32.mrf.mxu1 }
 0x6b1   : > { %v1516_v21 = vpop.xlane.xlu0 %1515 }
 0x6b2   : > { %v1526_v22 = vsub.f32 %v1454_v57, %v1516_v21 }
 0x6b4   : > { %v1530_v23 = vmul.f32 1.442695, %v1526_v22 }
 0x6b5   : > { %v1519_v24 = vpop.xlane.xlu1 %1518 }
 0x6b6   : > { %3307 = vpow2.f32 %v1530_v23  ;;  %v1527_v25 = vsub.f32 %v1457_v61, %v1519_v24 }
 0x6b8   : > { %v1532_v26 = vmul.f32 1.442695, %v1527_v25 }
 0x6ba   : > { %3309 = vpow2.f32 %v1532_v26 }
 0x6c3   : > { %v3308_v27 = vpop.eup %3307 }
 0x6c4   : > { %v1538_v28 = vsel %vm1175_vm8, %v3308_v27, 0.0 }
 0x6c5   : > { %1539 = vadd.xlane.f32.xlu0 %v1538_v28 }
 0x6c7   : > { %v3310_v29 = vpop.eup %3309  ;;  %v1522_v31 = vpop.xlane.xlu0 %1521 }
 0x6c8   : > { %v1528_v32 = vsub.f32 %v1507_v1, %v1522_v31  ;;  %v1541_v33 = vsel %vm1175_vm8, %v3310_v29, 0.0 }
 0x6c9   : > { %1542 = vadd.xlane.f32.xlu1 %v1541_v33 }
 0x6ca   : > { %v1534_v34 = vmul.f32 1.442695, %v1528_v32 }
 0x6cb   : > { %v1525_v35 = vpop.xlane.xlu0 %1524 }
 0x6cc   : > { %3311 = vpow2.f32 %v1534_v34  ;;  %v1529_v37 = vsub.f32 %v1510_v17, %v1525_v35 }
 0x6ce   : > { %v1536_v38 = vmul.f32 1.442695, %v1529_v37 }
 0x6d0   : > { %3313 = vpow2.f32 %v1536_v38 }
 0x6d9   : > { %v3312_v39 = vpop.eup %3311 }
 0x6da   : > { %v1544_v41 = vsel %vm1175_vm8, %v3312_v39, 0.0 }
 0x6db   : > { %1545 = vadd.xlane.f32.xlu0 %v1544_v41 }
 0x6dd   : > { %v3314_v36 = vpop.eup %3313 }
 0x6de   : > { %v1547_v42 = vsel %vm1175_vm8, %v3314_v36, 0.0 }
 0x6df   : > { %1548 = vadd.xlane.f32.xlu1 %v1547_v42 }
 0x6f0   : > { %1609 = vrot.lane.b32.xlu1 %v3643_v15, %s3389_s26 }
 0x6f1   : > { %1561 = vrot.lane.b32.xlu0 %v3615_v30, %s3389_s26 }
 0x6f4   : > { %1785 = vrot.lane.b32.xlu1 %v3622_v46, %s3390_s27 }
 0x6f5   : > { %1783 = vrot.lane.b32.xlu0 %v3632_v53, %s3390_s27 }
 0x6f8   : > { %1836 = vrot.lane.b32.xlu1 %v3630_v14, %s3390_s27 }
 0x6fc   : > { %1834 = vrot.lane.b32.xlu1 %v3641_v62, %s3390_s27 }
 0x74e   : > { %v1540_v43 = vpop.xlane.xlu0 %1539 }
 0x752   : > { %v1543_v40 = vpop.xlane.xlu1 %1542 }
 0x753   : > { %3315 = vrcp.f32 %v1543_v40 }
 0x754   : > { %3317 = vrcp.f32 %v1540_v43 }
 0x760   : > { %v3316_v44 = vpop.eup %3315 }
 0x761   : > { %v3318_v47 = vpop.eup %3317  ;;  %v1555_v48 = vmul.f32 %v3316_v44, %v3310_v29 }
 0x762   : > { %v1554_v50 = vmul.f32 %v3318_v47, %v3308_v27 }
 0x764   : > { %v1546_v45 = vpop.xlane.xlu0 %1545  ;;  %v1558_v5 = vpack.c.bf16 %v1555_v48, %v1554_v50 }
 0x765   : > { %3319 = vrcp.f32 %v1546_v45 }
 0x768   : > { %v1549_v49 = vpop.xlane.xlu1 %1548  ;;  %v1562_v9 = vpop.permute.xlu0 %1561 }
 0x769   : > { %3321 = vrcp.f32 %v1549_v49  ;;  %3118 = vmatpush3.bf16.msra.mxu0 %v1562_v9 }
 0x76a   : > { %3129 = vmatprep.subr.bf16.mxu0 %v3258_v3 }
 0x76c   : > { %v1610_v52 = vpop.permute.xlu1 %1609  ;;  %3120 = vmatmul.mubr.msk.bf16.vlgmr.msra.gmra.mxu0 %vm1175_vm8, %v1558_v5  ;;  %v1784_v20 = vpop.permute.xlu0 %1783 }
 0x76d   : > { %3124 = vmatpush3.bf16.msra.mxu1 %v1610_v52  ;;  %3130 = vmatpush3.bf16.msra.mxu0 %v3258_v3 }
 0x76e   : > { %3135 = vmatprep.subr.bf16.mxu1 %v3257_v51  ;;  %3141 = vmatprep.subr.bf16.mxu0 %v3387_v63 }
 0x770   : > { %v1786_v57 = vpop.permute.xlu1 %1785 }
 0x771   : > { %v1791_v13 = vsel %vm1175_vm8, %v1786_v57, 0 }
 0x772   : > { %v3320_v54 = vpop.eup %3319 }
 0x773   : > { %v1556_v56 = vmul.f32 %v3320_v54, %v3312_v39 }
 0x774   : > { %v1837_v58 = vpop.permute.xlu1 %1836 }
 0x775   : > { %v1842_v59 = vsel %vm1175_vm8, %v1837_v58, 0 }
 0x776   : > { %v3322_v55 = vpop.eup %3321 }
 0x777   : > { %v1557_v6 = vmul.f32 %v3322_v55, %v3314_v36 }
 0x778   : > { %v1835_v19 = vpop.permute.xlu1 %1834 }
 0x779   : > { %v1559_v60 = vpack.c.bf16 %v1557_v6, %v1556_v56 }
 0x77b   : > { %3126 = vmatmul.mubr.msk.bf16.vlgmr.msra.gmra.mxu1 %vm1175_vm8, %v1559_v60 }
 0x77c   : > { %3137 = vmatprep.mubr.msk.bf16.mxu1 %vm1175_vm8, %v1404_v10  ;;  %3136 = vmatpush3.bf16.msra.mxu1 %v3257_v51 }
 0x77d   : > { %3147 = vmatprep.subr.bf16.mxu1 %v3387_v63 }
 0x783   : > { %3138 = vmatmul.mubr.msk.bf16.vlgmr.msra.gmra.mxu1 %vm1175_vm8, %v1405_v11 }
 0x784   : > { %3148 = vmatpush3.bf16.xpose.msra.mxu1 %v1842_v59  ;;  %3149 = vmatprep.mubr.msk.bf16.mxu1 %vm3388_vm7, %v3387_v63 }
 0x785   : > { %3159 = vmatprep.subr.bf16.mxu1 %v3387_v63 }
 0x78b   : > { %3150 = vmatmul.mubr.msk.bf16.vlgmr.msra.gmra.mxu1 %vm1175_vm8, %v1835_v19 }
 0x78c   : > { %3161 = vmatprep.mubr.msk.bf16.mxu1 %vm3388_vm7, %v3387_v63 }
 0x82c   : > { %v1601_v10 = vpop.f32.mrf.mxu0 }
 0x82e   : > { %v3121_v61 = vpop.f32.mrf.mxu0 }
 0x830   : > { %v1604_v0 = vpop.f32.mrf.mxu0 }
 0x831   : > { %v1656_v2 = vpack.c.bf16 %v1604_v0, %v1601_v10 }
 0x832   : > { %v3122_v4 = vpop.f32.mrf.mxu0 }
 0x833   : > { %3131 = vmatprep.mubr.msk.bf16.mxu0 %vm1175_vm8, %v1656_v2 }
 0x83b   : > { %v1649_v7 = vpop.f32.mrf.mxu1 }
 0x83d   : > { %v3127_v8 = vpop.f32.mrf.mxu1 }
 0x83f   : > { %v1652_v11 = vpop.f32.mrf.mxu1 }
 0x840   : > { %v1657_v12 = vpack.c.bf16 %v1652_v11, %v1649_v7 }
 0x841   : > { %v3128_v1 = vpop.f32.mrf.mxu1 }
 0x842   : > { %3132 = vmatmul.mubr.msk.bf16.vlgmr.msra.gmra.mxu0 %vm1175_vm8, %v1657_v12 }
 0x843   : > { %3142 = vmatpush3.bf16.xpose.msra.mxu0 %v1791_v13  ;;  %v3743_v16 = vpop.f32.mrf.mxu1  ;;  %3143 = vmatprep.mubr.msk.bf16.mxu0 %vm3388_vm7, %v3387_v63  ;;  %v3259_v13 = vld [vmem:[%s3950_s6 + $0x10] sm:$0xff]  }
 0x844   : > { %3153 = vmatprep.subr.bf16.mxu0 %v3387_v63 }
 0x845   : > { %v3748_v17 = vpop.f32.mrf.mxu1 }
 0x847   : > { %v3750_v18 = vpop.f32.mrf.mxu1 }
 0x849   : > { %v3752_v21 = vpop.f32.mrf.mxu1 }
 0x84a   : > { %3144 = vmatmul.mubr.msk.bf16.vlgmr.msra.gmra.mxu0 %vm1175_vm8, %v1784_v20 }
 0x84b   : > { %v1878_v22 = vpop.f32.mrf.mxu1  ;;  %3155 = vmatprep.mubr.msk.bf16.mxu0 %vm3388_vm7, %v3387_v63 }
 0x84c   : > { %v1891_v37 = vsel %vm1175_vm8, %v1878_v22, -inf }
 0x84d   : > { %v3151_v23 = vpop.f32.mrf.mxu1 }
 0x84f   : > { %v1881_v24 = vpop.f32.mrf.mxu1 }
 0x850   : > { %v1894_v39 = vsel %vm1175_vm8, %v1881_v24, -inf }
 0x851   : > { %v3152_v25 = vpop.f32.mrf.mxu1 }
 0x902   : > { %v3757_v26 = vpop.f32.mrf.mxu0 }
 0x904   : > { %v3759_v27 = vpop.f32.mrf.mxu0 }
 0x906   : > { %v3761_v28 = vpop.f32.mrf.mxu0 }
 0x908   : > { %v3763_v29 = vpop.f32.mrf.mxu0 }
 0x90a   : > { %v1827_v31 = vpop.f32.mrf.mxu0 }
 0x90b   : > { %v1885_v32 = vsel %vm1175_vm8, %v1827_v31, -inf }
 0x90c   : > { %1886 = vmax.xlane.f32.xlu0 %v1885_v32  ;;  %v3145_v33 = vpop.f32.mrf.mxu0 }
 0x90e   : > { %v1830_v34 = vpop.f32.mrf.mxu0 }
 0x90f   : > { %v1888_v35 = vsel %vm1175_vm8, %v1830_v34, -inf }
 0x910   : > { %1889 = vmax.xlane.f32.xlu1 %v1888_v35  ;;  %v3146_v38 = vpop.f32.mrf.mxu0  ;;  %1892 = vmax.xlane.f32.xlu0 %v1891_v37 }
 0x914   : > { %1895 = vmax.xlane.f32.xlu0 %v1894_v39 }
 0x995   : > { %v1887_v41 = vpop.xlane.xlu0 %1886 }
 0x996   : > { %v1897_v36 = vsub.f32 %v1827_v31, %v1887_v41 }
 0x998   : > { %v1901_v47 = vmul.f32 1.442695, %v1897_v36 }
 0x999   : > { %v1890_v42 = vpop.xlane.xlu1 %1889  ;;  %v1893_v40 = vpop.xlane.xlu0 %1892 }
 0x99a   : > { %v1899_v43 = vsub.f32 %v1878_v22, %v1893_v40  ;;  %v1898_v44 = vsub.f32 %v1830_v34, %v1890_v42 }
 0x99c   : > { %v1905_v45 = vmul.f32 1.442695, %v1899_v43  ;;  %v1903_v9 = vmul.f32 1.442695, %v1898_v44 }
 0x99d   : > { %v1896_v48 = vpop.xlane.xlu0 %1895 }
 0x99e   : > { %v1900_v49 = vsub.f32 %v1881_v24, %v1896_v48  ;;  %3323 = vpow2.f32 %v1905_v45 }
 0x99f   : > { %3325 = vpow2.f32 %v1901_v47 }
 0x9a0   : > { %v1907_v50 = vmul.f32 1.442695, %v1900_v49 }
 0x9a2   : > { %3327 = vpow2.f32 %v1907_v50 }
 0x9a3   : > { %3329 = vpow2.f32 %v1903_v9 }
 0x9ab   : > { %v3324_v5 = vpop.eup %3323 }
 0x9ac   : > { %v1915_v51 = vsel %vm1175_vm8, %v3324_v5, 0.0  ;;  %v3326_v52 = vpop.eup %3325 }
 0x9ad   : > { %1916 = vadd.xlane.f32.xlu0 %v1915_v51  ;;  %v1909_v6 = vsel %vm1175_vm8, %v3326_v52, 0.0 }
 0x9af   : > { %v3328_v54 = vpop.eup %3327 }
 0x9b0   : > { %v1918_v55 = vsel %vm1175_vm8, %v3328_v54, 0.0  ;;  %v3330_v56 = vpop.eup %3329 }
 0x9b1   : > { %1919 = vadd.xlane.f32.xlu1 %v1918_v55  ;;  %1910 = vadd.xlane.f32.xlu0 %v1909_v6  ;;  %v1912_v60 = vsel %vm1175_vm8, %v3330_v56, 0.0  ;;  %v1769_v55 = vadd.f32 %v3748_v17, %v3759_v27  ;;  %v1780_v6 = vadd.f32 %v3750_v18, %v3761_v28 }
 0x9b5   : > { %1913 = vadd.xlane.f32.xlu1 %v1912_v60 }
 0x9c6   : > { %1978 = vrot.lane.b32.xlu1 %v3643_v15, %s3390_s27 }
 0x9c7   : > { %1931 = vrot.lane.b32.xlu0 %v3615_v30, %s3390_s27 }
 0x9ca   : > { %2097 = vrot.lane.b32.xlu1 %v3622_v46, %s3391_s14 }
 0x9cb   : > { %2095 = vrot.lane.b32.xlu0 %v3632_v53, %s3391_s14 }
 0x9ce   : > { %2148 = vrot.lane.b32.xlu1 %v3630_v14, %s3391_s14 }
 0x9d2   : > { %2146 = vrot.lane.b32.xlu1 %v3641_v62, %s3391_s14 }
 0xa36   : > { %v1917_v57 = vpop.xlane.xlu0 %1916 }
 0xa37   : > { %3331 = vrcp.f32 %v1917_v57 }
 0xa3a   : > { %v1920_v58 = vpop.xlane.xlu1 %1919  ;;  %v1911_v59 = vpop.xlane.xlu0 %1910 }
 0xa3b   : > { %3333 = vrcp.f32 %v1920_v58  ;;  %v1772_v58 = vadd.f32 %v3752_v21, %v3763_v29 }
 0xa3c   : > { %3335 = vrcp.f32 %v1911_v59 }
 0xa3e   : > { %v1914_v19 = vpop.xlane.xlu1 %1913  ;;  %v1932_v3 = vpop.permute.xlu0 %1931 }
 0xa3f   : > { %3337 = vrcp.f32 %v1914_v19  ;;  %3154 = vmatpush3.bf16.msra.mxu0 %v1932_v3 }
 0xa40   : > { %3165 = vmatprep.subr.bf16.mxu0 %v3259_v13 }
 0xa42   : > { %v1979_v46 = vpop.permute.xlu1 %1978  ;;  %v2096_v1 = vpop.permute.xlu0 %2095 }
 0xa43   : > { %3160 = vmatpush3.bf16.msra.mxu1 %v1979_v46 }
 0xa44   : > { %3171 = vmatprep.subr.bf16.mxu1 %v3387_v63  ;;  %v3332_v53 = vpop.eup %3331 }
 0xa45   : > { %v1927_v14 = vmul.f32 %v3332_v53, %v3324_v5 }
 0xa46   : > { %v2098_v62 = vpop.permute.xlu1 %2097 }
 0xa47   : > { %v2103_v7 = vsel %vm1175_vm8, %v2098_v62, 0 }
 0xa48   : > { %v3334_v10 = vpop.eup %3333 }
 0xa49   : > { %v1928_v61 = vmul.f32 %v3334_v10, %v3328_v54  ;;  %v3336_v0 = vpop.eup %3335 }
 0xa4a   : > { %v1925_v8 = vmul.f32 %v3336_v0, %v3326_v52  ;;  %v2149_v34 = vpop.permute.xlu1 %2148  ;;  %v1777_v52 = vadd.f32 %v3743_v16, %v3757_v26 }
 0xa4b   : > { %v1930_v2 = vpack.c.bf16 %v1928_v61, %v1927_v14  ;;  %v2154_v36 = vsel %vm1175_vm8, %v2149_v34, 0 }
 0xa4c   : > { %v3338_v4 = vpop.eup %3337 }
 0xa4d   : > { %3162 = vmatmul.mubr.msk.bf16.vlgmr.msra.gmra.mxu1 %vm1175_vm8, %v1930_v2  ;;  %v1926_v11 = vmul.f32 %v3338_v4, %v3330_v56 }
 0xa4e   : > { %3172 = vmatpush3.bf16.xpose.msra.mxu1 %v2103_v7  ;;  %3173 = vmatprep.mubr.msk.bf16.mxu1 %vm3388_vm7, %v3387_v63  ;;  %v2147_v44 = vpop.permute.xlu1 %2146 }
 0xa4f   : > { %v1929_v12 = vpack.c.bf16 %v1926_v11, %v1925_v8  ;;  %3183 = vmatprep.subr.bf16.mxu1 %v3387_v63 }
 0xa51   : > { %3156 = vmatmul.mubr.msk.bf16.vlgmr.msra.gmra.mxu0 %vm1175_vm8, %v1929_v12 }
 0xa52   : > { %3166 = vmatpush3.bf16.msra.mxu0 %v3259_v13 }
 0xa53   : > { %3177 = vmatprep.subr.bf16.mxu0 %v3387_v63 }
 0xa55   : > { %3174 = vmatmul.mubr.msk.bf16.vlgmr.msra.gmra.mxu1 %vm1175_vm8, %v2096_v1 }
 0xa56   : > { %3185 = vmatprep.mubr.msk.bf16.mxu1 %vm3388_vm7, %v3387_v63 }
 0xb0d   : > { %v2018_v20 = vpop.f32.mrf.mxu1 }
 0xb0f   : > { %v3163_v22 = vpop.f32.mrf.mxu1 }
 0xb11   : > { %v1971_v23 = vpop.f32.mrf.mxu0  ;;  %v2021_v24 = vpop.f32.mrf.mxu1 }
 0xb12   : > { %v2026_v38 = vpack.c.bf16 %v2021_v24, %v2018_v20 }
 0xb13   : > { %v3157_v25 = vpop.f32.mrf.mxu0  ;;  %v3164_v31 = vpop.f32.mrf.mxu1 }
 0xb15   : > { %v1974_v32 = vpop.f32.mrf.mxu0  ;;  %v2139_v33 = vpop.f32.mrf.mxu1 }
 0xb16   : > { %v2025_v35 = vpack.c.bf16 %v1974_v32, %v1971_v23  ;;  %v2197_v37 = vsel %vm1175_vm8, %v2139_v33, -inf }
 0xb17   : > { %v3158_v39 = vpop.f32.mrf.mxu0  ;;  %2198 = vmax.xlane.f32.xlu0 %v2197_v37  ;;  %v3175_v41 = vpop.f32.mrf.mxu1 }
 0xb18   : > { %3167 = vmatprep.mubr.msk.bf16.mxu0 %vm1175_vm8, %v2025_v35  ;;  %v3260_v35 = vld [vmem:[%s3950_s6 + $0x18] sm:$0xff]  }
 0xb19   : > { %3168 = vmatmul.mubr.msk.bf16.vlgmr.msra.gmra.mxu0 %vm1175_vm8, %v2026_v38  ;;  %v2142_v42 = vpop.f32.mrf.mxu1 }
 0xb1a   : > { %3178 = vmatpush3.bf16.xpose.msra.mxu0 %v2154_v36  ;;  %v2200_v40 = vsel %vm1175_vm8, %v2142_v42, -inf  ;;  %3179 = vmatprep.mubr.msk.bf16.mxu0 %vm3388_vm7, %v3387_v63 }
 0xb1b   : > { %2201 = vmax.xlane.f32.xlu1 %v2200_v40  ;;  %v3176_v43 = vpop.f32.mrf.mxu1  ;;  %3189 = vmatprep.subr.bf16.mxu0 %v3387_v63 }
 0xb21   : > { %3180 = vmatmul.mubr.msk.bf16.vlgmr.msra.gmra.mxu0 %vm1175_vm8, %v2147_v44 }
 0xb22   : > { %3191 = vmatprep.mubr.msk.bf16.mxu0 %vm3388_vm7, %v3387_v63 }
 0xba0   : > { %v2199_v50 = vpop.xlane.xlu0 %2198 }
 0xba1   : > { %v2209_v5 = vsub.f32 %v2139_v33, %v2199_v50 }
 0xba3   : > { %v2213_v51 = vmul.f32 1.442695, %v2209_v5 }
 0xba4   : > { %v2202_v45 = vpop.xlane.xlu1 %2201 }
 0xba5   : > { %v2210_v47 = vsub.f32 %v2142_v42, %v2202_v45 }
 0xba7   : > { %v2215_v48 = vmul.f32 1.442695, %v2210_v47 }
 0xba9   : > { %3339 = vpow2.f32 %v2215_v48 }
 0xbaa   : > { %3341 = vpow2.f32 %v2213_v51 }
 0xbb6   : > { %v3340_v49 = vpop.eup %3339 }
 0xbb7   : > { %v2224_v9 = vsel %vm1175_vm8, %v3340_v49, 0.0  ;;  %v3342_v18 = vpop.eup %3341 }
 0xbb8   : > { %2225 = vadd.xlane.f32.xlu1 %v2224_v9  ;;  %v2221_v53 = vsel %vm1175_vm8, %v3342_v18, 0.0  ;;  %v2916_v9 = vld [vmem:[%s3951_s7] ss:$0 sm:$0xff] }
 0xbd9   : > { %v3169_v54 = vpop.f32.mrf.mxu0 }
 0xbda   : > { %v3815_v63 = vadd.f32 %v3169_v54, %v1777_v52 }
 0xbdb   : > { %v2076_v56 = vpop.f32.mrf.mxu0 }
 0xbdc   : > { %v3819_v60 = vadd.f32 %v2076_v56, %v1769_v55 }
 0xbdd   : > { %v3170_v57 = vpop.f32.mrf.mxu0 }
 0xbde   : > { %v3823_v59 = vadd.f32 %v3170_v57, %v1780_v6 }
 0xbdf   : > { %v2079_v16 = vpop.f32.mrf.mxu0 }
 0xbe0   : > { %v3825_v26 = vadd.f32 %v2079_v16, %v1772_v58 }
 0xbe1   : > { %v2190_v19 = vpop.f32.mrf.mxu0 }
 0xbe2   : > { %v2203_v17 = vsel %vm1175_vm8, %v2190_v19, -inf }
 0xbe3   : > { %v3181_v27 = vpop.f32.mrf.mxu0  ;;  %2204 = vmax.xlane.f32.xlu0 %v2203_v17 }
 0xbe5   : > { %v2193_v3 = vpop.f32.mrf.mxu0 }
 0xbe6   : > { %v2206_v46 = vsel %vm1175_vm8, %v2193_v3, -inf }
 0xbe7   : > { %v3182_v28 = vpop.f32.mrf.mxu0  ;;  %2207 = vmax.xlane.f32.xlu0 %v2206_v46 }
 0xbeb   : > { %2222 = vadd.xlane.f32.xlu0 %v2221_v53 }
 0xc41   : > { %v2226_v11 = vpop.xlane.xlu1 %2225 }
 0xc6c   : > { %v2205_v21 = vpop.xlane.xlu0 %2204 }
 0xc6d   : > { %v2211_v29 = vsub.f32 %v2190_v19, %v2205_v21 }
 0xc6f   : > { %v2217_v10 = vmul.f32 1.442695, %v2211_v29 }
 0xc70   : > { %v2208_v14 = vpop.xlane.xlu0 %2207 }
 0xc71   : > { %3343 = vpow2.f32 %v2217_v10  ;;  %v2212_v61 = vsub.f32 %v2193_v3, %v2208_v14 }
 0xc73   : > { %v2219_v0 = vmul.f32 1.442695, %v2212_v61 }
 0xc74   : > { %v2223_v8 = vpop.xlane.xlu0 %2222 }
 0xc75   : > { %3345 = vpow2.f32 %v2219_v0 }
 0xc76   : > { %3347 = vrcp.f32 %v2223_v8  ;;  %v3261_v8 = vld [vmem:[%s3952_s8 + $0x18] sm:$0xff]  }
 0xc77   : > { %3349 = vrcp.f32 %v2226_v11  ;;  %v3262_v11 = vld [vmem:[%s3952_s8 + $0x10] sm:$0xff]  }
 0xc7e   : > { %v3344_v62 = vpop.eup %3343 }
 0xc7f   : > { %v2227_v2 = vsel %vm1175_vm8, %v3344_v62, 0.0 }
 0xc80   : > { %2228 = vadd.xlane.f32.xlu0 %v2227_v2 }
 0xc82   : > { %v3346_v4 = vpop.eup %3345 }
 0xc83   : > { %v2230_v7 = vsel %vm1175_vm8, %v3346_v4, 0.0  ;;  %v3348_v12 = vpop.eup %3347 }
 0xc84   : > { %2231 = vadd.xlane.f32.xlu1 %v2230_v7  ;;  %v3350_v13 = vpop.eup %3349  ;;  %v2237_v20 = vmul.f32 %v3348_v12, %v3342_v18  ;;  %v3263_v12 = vld [vmem:[%s3952_s8 + $0x8] sm:$0xff]  }
 0xc85   : > { %v2238_v24 = vmul.f32 %v3350_v13, %v3340_v49 }
 0xc87   : > { %v2241_v25 = vpack.c.bf16 %v2238_v24, %v2237_v20 }
 0xc95   : > { %2290 = vrot.lane.b32.xlu1 %v3643_v15, %s3391_s14 }
 0xc96   : > { %2243 = vrot.lane.b32.xlu0 %v3615_v30, %s3391_s14 }
 0xd09   : > { %v2229_v1 = vpop.xlane.xlu0 %2228 }
 0xd0a   : > { %3351 = vrcp.f32 %v2229_v1  ;;  %v3264_v1 = vld [vmem:[%s3952_s8] sm:$0xff]  }
 0xd0d   : > { %v2244_v22 = vpop.permute.xlu0 %2243  ;;  %v2232_v23 = vpop.xlane.xlu1 %2231 }
 0xd0e   : > { %3353 = vrcp.f32 %v2232_v23  ;;  %3184 = vmatpush3.bf16.msra.mxu1 %v2244_v22 }
 0xd0f   : > { %3195 = vmatprep.subr.bf16.mxu1 %v3260_v35 }
 0xd11   : > { %3186 = vmatmul.mubr.msk.bf16.vlgmr.msra.gmra.mxu1 %vm1175_vm8, %v2241_v25  ;;  %v2291_v15 = vpop.permute.xlu1 %2290 }
 0xd12   : > { %3190 = vmatpush3.bf16.msra.mxu0 %v2291_v15  ;;  %3196 = vmatpush3.bf16.msra.mxu1 %v3260_v35 }
 0xd13   : > { %3201 = vmatprep.subr.bf16.mxu0 %v3261_v8 }
 0xd17   : > { %v3352_v30 = vpop.eup %3351 }
 0xd18   : > { %v2239_v32 = vmul.f32 %v3352_v30, %v3344_v62 }
 0xd1b   : > { %v3354_v31 = vpop.eup %3353 }
 0xd1c   : > { %v2240_v33 = vmul.f32 %v3354_v31, %v3346_v4 }
 0xd1e   : > { %v2242_v34 = vpack.c.bf16 %v2240_v33, %v2239_v32 }
 0xd20   : > { %3192 = vmatmul.mubr.msk.bf16.vlgmr.msra.gmra.mxu0 %vm1175_vm8, %v2242_v34 }
 0xd21   : > { %3202 = vmatpush3.bf16.msra.mxu0 %v3261_v8 }
 0xd22   : > { %3203 = vmatprep.subr.bf16.mxu0 %v3262_v11 }
 0xd25   : > { %3204 = vmatpush3.bf16.msra.mxu0 %v3262_v11 }
 0xd26   : > { %3205 = vmatprep.subr.bf16.mxu0 %v3263_v12 }
 0xd29   : > { %3206 = vmatpush3.bf16.msra.mxu0 %v3263_v12 }
 0xd2a   : > { %3207 = vmatprep.subr.bf16.mxu0 %v3264_v1 }
 0xd2d   : > { %3208 = vmatpush3.bf16.msra.mxu0 %v3264_v1 }
 0xdd1   : > { %v2283_v37 = vpop.f32.mrf.mxu1 }
 0xdd3   : > { %v3187_v38 = vpop.f32.mrf.mxu1 }
 0xdd5   : > { %v2286_v39 = vpop.f32.mrf.mxu1 }
 0xdd6   : > { %v2337_v41 = vpack.c.bf16 %v2286_v39, %v2283_v37 }
 0xdd7   : > { %v3188_v36 = vpop.f32.mrf.mxu1 }
 0xdd8   : > { %3197 = vmatprep.mubr.msk.bf16.mxu1 %vm1175_vm8, %v2337_v41 }
 0xde0   : > { %v2330_v42 = vpop.f32.mrf.mxu0 }
 0xde2   : > { %v3193_v40 = vpop.f32.mrf.mxu0 }
 0xde4   : > { %v2333_v43 = vpop.f32.mrf.mxu0 }
 0xde5   : > { %v2338_v44 = vpack.c.bf16 %v2333_v43, %v2330_v42 }
 0xde6   : > { %v3194_v45 = vpop.f32.mrf.mxu0 }
 0xde7   : > { %3198 = vmatmul.mubr.msk.bf16.vlgmr.msra.gmra.mxu1 %vm1175_vm8, %v2338_v44  ;;  %v2676_v45 = vld [vmem:[%s3954_s10] sm:$0x3] }
 0xde8   : > { %3222 = vmatprep.subr.msk.bf16.mxu1 %vm2684_vm9, %v2676_v45 }
 0xea7   : > { %v3199_v47 = vpop.f32.mrf.mxu1 }
 0xea8   : > { %v2405_v54 = vadd.f32 %v3199_v47, %v3815_v63  ;;  %v2686_v47 = vsel %vm2684_vm9, %v2676_v45, 0 }
 0xea9   : > { %v2388_v48 = vpop.f32.mrf.mxu1  ;;  %3214 = vmatpush3.bf16.msra.mxu1 %v2686_v47 }
 0xeaa   : > { %v2403_v49 = vadd.f32 %v2388_v48, %v3819_v60  ;;  %v3858_v57 = vadd.f32 %v2916_v9, %v2405_v54  ;;  %v2917_v48 = vld [vmem:[%s3953_s9] ss:$0 sm:$0xff] }
 0xeab   : > { %v3200_v50 = vpop.f32.mrf.mxu1 }
 0xeac   : > { %v3847_v5 = vadd.f32 %v2916_v9, %v2403_v49  ;;  %v2406_v51 = vadd.f32 %v3200_v50, %v3823_v59  ;;  %v2424_v63 = vsel %vm426_vm0, %v3858_v57, 0.0 }
 0xead   : > { %v2391_v52 = vpop.f32.mrf.mxu1 }
 0xeae   : > { %v3851_v55 = vadd.f32 %v2916_v9, %v2406_v51  ;;  %v2404_v56 = vadd.f32 %v2391_v52, %v3825_v26  ;;  %v2418_v6 = vsel %vm426_vm0, %v3847_v5, 0.0 }
 0xeaf   : > { %2419 = vadd.xlane.f32.xlu1 %v2418_v6 }
 0xeb0   : > { %v3856_v60 = vadd.f32 %v2916_v9, %v2404_v56  ;;  %v2427_v59 = vsel %vm426_vm0, %v3851_v55, 0.0 }
 0xeb2   : > { %v2421_v58 = vsel %vm426_vm0, %v3856_v60, 0.0 }
 0xeb3   : > { %2422 = vadd.xlane.f32.xlu0 %v2421_v58  ;;  %2428 = vadd.xlane.f32.xlu1 %v2427_v59 }
 0xeb7   : > { %2425 = vadd.xlane.f32.xlu0 %v2424_v63 }
 0xf38   : > { %v2420_v16 = vpop.xlane.xlu1 %2419 }
 0xf39   : > { %v2430_v26 = vmul.f32 0.015625, %v2420_v16 }
 0xf3b   : > { %v2434_v19 = vsub.f32 %v3847_v5, %v2430_v26 }
 0xf3c   : > { %v2423_v17 = vpop.xlane.xlu0 %2422  ;;  %v2429_v27 = vpop.xlane.xlu1 %2428 }
 0xf3d   : > { %v2431_v3 = vmul.f32 0.015625, %v2423_v17  ;;  %v2433_v46 = vmul.f32 0.015625, %v2429_v27  ;;  %v2438_v18 = vmul.f32 %v2434_v19, %v2434_v19 }
 0xf3f   : > { %v2435_v28 = vsub.f32 %v3856_v60, %v2431_v3  ;;  %v2437_v53 = vsub.f32 %v3851_v55, %v2433_v46  ;;  %v2442_v21 = vsel %vm426_vm0, %v2438_v18, 0.0 }
 0xf40   : > { %v2426_v29 = vpop.xlane.xlu0 %2425  ;;  %2443 = vadd.xlane.f32.xlu0 %v2442_v21 }
 0xf41   : > { %v2432_v10 = vmul.f32 0.015625, %v2426_v29  ;;  %v2439_v14 = vmul.f32 %v2435_v28, %v2435_v28  ;;  %v2441_v62 = vmul.f32 %v2437_v53, %v2437_v53 }
 0xf43   : > { %v2436_v61 = vsub.f32 %v3858_v57, %v2432_v10  ;;  %v2445_v0 = vsel %vm426_vm0, %v2439_v14, 0.0  ;;  %v2451_v7 = vsel %vm426_vm0, %v2441_v62, 0.0 }
 0xf44   : > { %2446 = vadd.xlane.f32.xlu1 %v2445_v0 }
 0xf45   : > { %v2440_v2 = vmul.f32 %v2436_v61, %v2436_v61 }
 0xf47   : > { %v2448_v4 = vsel %vm426_vm0, %v2440_v2, 0.0 }
 0xf48   : > { %2449 = vadd.xlane.f32.xlu0 %v2448_v4  ;;  %2452 = vadd.xlane.f32.xlu1 %v2451_v7 }
 0xfc9   : > { %v2444_v13 = vpop.xlane.xlu0 %2443 }
 0xfca   : > { %v2454_v20 = vmul.f32 0.015625, %v2444_v13 }
 0xfcc   : > { %v2458_v22 = vadd.f32 1e-05, %v2454_v20 }
 0xfcd   : > { %v2447_v23 = vpop.xlane.xlu1 %2446 }
 0xfce   : > { %v2455_v24 = vmul.f32 0.015625, %v2447_v23  ;;  %3355 = vrsqrt.f32 %v2458_v22 }
 0xfd0   : > { %v2459_v25 = vadd.f32 1e-05, %v2455_v24 }
 0xfd1   : > { %v2450_v15 = vpop.xlane.xlu0 %2449  ;;  %v2453_v30 = vpop.xlane.xlu1 %2452 }
 0xfd2   : > { %3357 = vrsqrt.f32 %v2459_v25  ;;  %v2456_v31 = vmul.f32 0.015625, %v2450_v15  ;;  %v2457_v32 = vmul.f32 0.015625, %v2453_v30 }
 0xfd4   : > { %v2460_v33 = vadd.f32 1e-05, %v2456_v31  ;;  %v2461_v34 = vadd.f32 1e-05, %v2457_v32 }
 0xfd6   : > { %3359 = vrsqrt.f32 %v2460_v33 }
 0xfd7   : > { %3361 = vrsqrt.f32 %v2461_v34 }
 0xfdb   : > { %v3356_v35 = vpop.eup %3355 }
 0xfdc   : > { %v2466_v38 = vmul.f32 %v3356_v35, %v2434_v19 }
 0xfdf   : > { %v3358_v37 = vpop.eup %3357 }
 0xfe0   : > { %v2467_v39 = vmul.f32 %v3358_v37, %v2435_v28 }
 0xfe2   : > { %v2470_v41 = vpack.c.bf16 %v2467_v39, %v2466_v38 }
 0xfe3   : > { %v3360_v36 = vpop.eup %3359 }
 0xfe4   : > { %v3362_v42 = vpop.eup %3361  ;;  %3209 = vmatprep.mubr.msk.bf16.mxu0 %vm426_vm0, %v2470_v41  ;;  %v2468_v40 = vmul.f32 %v3360_v36, %v2436_v61 }
 0xfe5   : > { %v2469_v43 = vmul.f32 %v3362_v42, %v2437_v53 }
 0xfe7   : > { %v2471_v44 = vpack.c.bf16 %v2469_v43, %v2468_v40 }
 0xfe9   : > { %3210 = vmatmul.mubr.msk.bf16.vlgmr.msra.gmra.mxu0 %vm426_vm0, %v2471_v44 }
0x10a9   : > { %v3211_v49 = vpop.f32.mrf.mxu0 }
0x10aa   : > { %v3894_v9 = vadd.f32 %v3211_v49, %v2917_v48 }
0x10ab   : > { %v2551_v50 = vpop.f32.mrf.mxu0 }
0x10ac   : > { %v3897_v51 = vmul.f32 0.70710677, %v3894_v9  ;;  %v3899_v52 = vadd.f32 %v2917_v48, %v2551_v50 }
0x10ad   : > { %v3212_v54 = vpop.f32.mrf.mxu0 }
0x10ae   : > { %v2576_v56 = vand.u32 2147483647, %v3897_v51  ;;  %v3903_v6 = vmul.f32 0.70710677, %v3899_v52  ;;  %v3905_v58 = vadd.f32 %v3212_v54, %v2917_v48  ;;  %vm2656_vm11 = vcmp.ge.f32.partialorder %v3897_v51, 0.0 }
0x10af   : > { %v2554_v59 = vpop.f32.mrf.mxu0 }
0x10b0   : > { %v2580_v63 = vmul.f32 0.3275911, %v2576_v56  ;;  %v2574_v16 = vand.u32 2147483647, %v3903_v6  ;;  %v3909_v26 = vmul.f32 0.70710677, %v3905_v58  ;;  %v3911_v19 = vadd.f32 %v2917_v48, %v2554_v59 }
0x10b1   : > { %v2632_v14 = vsub.f32 0.0, %v2576_v56  ;;  %vm2654_vm10 = vcmp.ge.f32.partialorder %v3903_v6, 0.0  ;;  %v2566_v6 = vmul.f32 0.5, %v3899_v52  ;;  %v2926_v52 = vld [vmem:[%s3955_s11] ss:$0 sm:$0xff] }
0x10b2   : > { %v2584_v17 = vadd.f32 1.0, %v2580_v63  ;;  %v2578_v27 = vmul.f32 0.3275911, %v2574_v16  ;;  %v2577_v3 = vand.u32 2147483647, %v3909_v26  ;;  %v2630_v61 = vsub.f32 0.0, %v2574_v16 }
0x10b3   : > { %v3915_v46 = vmul.f32 0.70710677, %v3911_v19  ;;  %v2636_v0 = vmul.f32 %v2632_v14, %v2576_v56  ;;  %vm2657_vm12 = vcmp.ge.f32.partialorder %v3909_v26, 0.0  ;;  %v2567_v51 = vmul.f32 0.5, %v3911_v19 }
0x10b4   : > { %3363 = vrcp.f32 %v2584_v17  ;;  %v2582_v18 = vadd.f32 1.0, %v2578_v27  ;;  %v2581_v28 = vmul.f32 0.3275911, %v2577_v3  ;;  %v2633_v62 = vsub.f32 0.0, %v2577_v3 }
0x10b5   : > { %v2575_v53 = vand.u32 2147483647, %v3915_v46  ;;  %v2634_v4 = vmul.f32 %v2630_v61, %v2574_v16  ;;  %v2642_v8 = vmul.f32 1.442695, %v2636_v0  ;;  %vm2655_vm13 = vcmp.ge.f32.partialorder %v3915_v46, 0.0 }
0x10b6   : > { %3365 = vrcp.f32 %v2582_v18  ;;  %v2585_v21 = vadd.f32 1.0, %v2581_v28  ;;  %v2637_v12 = vmul.f32 %v2633_v62, %v2577_v3  ;;  %v2568_v26 = vmul.f32 0.5, %v3894_v9 }
0x10b7   : > { %v2579_v29 = vmul.f32 0.3275911, %v2575_v53  ;;  %v2631_v11 = vsub.f32 0.0, %v2575_v53  ;;  %v2638_v22 = vmul.f32 1.442695, %v2634_v4 }
0x10b8   : > { %3367 = vrcp.f32 %v2585_v21  ;;  %v2644_v31 = vmul.f32 1.442695, %v2637_v12 }
0x10b9   : > { %v2583_v10 = vadd.f32 1.0, %v2579_v29  ;;  %v2635_v25 = vmul.f32 %v2631_v11, %v2575_v53 }
0x10bb   : > { %3369 = vrcp.f32 %v2583_v10  ;;  %v2640_v39 = vmul.f32 1.442695, %v2635_v25 }
0x10bc   : > { %3371 = vpow2.f32 %v2642_v8 }
0x10bd   : > { %3373 = vpow2.f32 %v2638_v22 }
0x10be   : > { %3375 = vpow2.f32 %v2644_v31 }
0x10bf   : > { %3377 = vpow2.f32 %v2640_v39 }
0x10c1   : > { %v3364_v2 = vpop.eup %3363 }
0x10c2   : > { %v2596_v7 = vmul.f32 1.0614054, %v3364_v2 }
0x10c3   : > { %v3366_v1 = vpop.eup %3365 }
0x10c4   : > { %v2600_v13 = vadd.f32 -1.4531521, %v2596_v7  ;;  %v2594_v20 = vmul.f32 1.0614054, %v3366_v1 }
0x10c5   : > { %v3368_v23 = vpop.eup %3367 }
0x10c6   : > { %v2604_v24 = vmul.f32 %v3364_v2, %v2600_v13  ;;  %v2598_v15 = vadd.f32 -1.4531521, %v2594_v20  ;;  %v2597_v30 = vmul.f32 1.0614054, %v3368_v23 }
0x10c8   : > { %v2608_v32 = vadd.f32 1.4214138, %v2604_v24  ;;  %v3370_v33 = vpop.eup %3369  ;;  %v2602_v34 = vmul.f32 %v3366_v1, %v2598_v15  ;;  %v2601_v35 = vadd.f32 -1.4531521, %v2597_v30 }
0x10c9   : > { %v2595_v38 = vmul.f32 1.0614054, %v3370_v33  ;;  %v3372_v17 = vpop.eup %3371 }
0x10ca   : > { %v2612_v37 = vmul.f32 %v3364_v2, %v2608_v32  ;;  %v2606_v41 = vadd.f32 1.4214138, %v2602_v34  ;;  %v2605_v36 = vmul.f32 %v3368_v23, %v2601_v35  ;;  %v3374_v29 = vpop.eup %3373  ;;  %v2569_v34 = vmul.f32 0.5, %v3905_v58 }
0x10cb   : > { %v2599_v40 = vadd.f32 -1.4531521, %v2595_v38  ;;  %v3376_v62 = vpop.eup %3375 }
0x10cc   : > { %v2616_v42 = vadd.f32 -0.28449672, %v2612_v37  ;;  %v2610_v43 = vmul.f32 %v3366_v1, %v2606_v41  ;;  %v2609_v44 = vadd.f32 1.4214138, %v2605_v36  ;;  %v3378_v12 = vpop.eup %3377 }
0x10cd   : > { %v2603_v47 = vmul.f32 %v3370_v33, %v2599_v40 }
0x10ce   : > { %v2620_v45 = vmul.f32 %v3364_v2, %v2616_v42  ;;  %v2614_v48 = vadd.f32 -0.28449672, %v2610_v43  ;;  %v2613_v49 = vmul.f32 %v3368_v23, %v2609_v44 }
0x10cf   : > { %v2607_v54 = vadd.f32 1.4214138, %v2603_v47 }
0x10d0   : > { %v2624_v50 = vadd.f32 0.2548296, %v2620_v45  ;;  %v2618_v56 = vmul.f32 %v3366_v1, %v2614_v48  ;;  %v2617_v59 = vadd.f32 -0.28449672, %v2613_v49 }
0x10d1   : > { %v2611_v16 = vmul.f32 %v3370_v33, %v2607_v54 }
0x10d2   : > { %v2628_v63 = vmul.f32 %v3364_v2, %v2624_v50  ;;  %v2622_v27 = vadd.f32 0.2548296, %v2618_v56  ;;  %v2621_v3 = vmul.f32 %v3368_v23, %v2617_v59 }
0x10d3   : > { %v2615_v28 = vadd.f32 -0.28449672, %v2611_v16 }
0x10d4   : > { %v2648_v18 = vmul.f32 %v3372_v17, %v2628_v63  ;;  %v2626_v53 = vmul.f32 %v3366_v1, %v2622_v27  ;;  %v2625_v21 = vadd.f32 0.2548296, %v2621_v3 }
0x10d5   : > { %v2619_v10 = vmul.f32 %v3370_v33, %v2615_v28 }
0x10d6   : > { %v2652_v14 = vsub.f32 1.0, %v2648_v18  ;;  %v2646_v61 = vmul.f32 %v3374_v29, %v2626_v53  ;;  %v2629_v0 = vmul.f32 %v3368_v23, %v2625_v21 }
0x10d7   : > { %v2623_v4 = vadd.f32 0.2548296, %v2619_v10 }
0x10d8   : > { %v2650_v7 = vsub.f32 1.0, %v2646_v61  ;;  %v2649_v8 = vmul.f32 %v3376_v62, %v2629_v0  ;;  %v2660_v2 = vsub.f32 0.0, %v2652_v14 }
0x10d9   : > { %v2627_v11 = vmul.f32 %v3370_v33, %v2623_v4 }
0x10da   : > { %v2658_v13 = vsub.f32 0.0, %v2650_v7  ;;  %v2653_v20 = vsub.f32 1.0, %v2649_v8  ;;  %v2664_v23 = vsel %vm2656_vm11, %v2652_v14, %v2660_v2 }
0x10db   : > { %v2647_v22 = vmul.f32 %v3378_v12, %v2627_v11  ;;  %v2668_v33 = vadd.f32 1.0, %v2664_v23 }
0x10dc   : > { %v2661_v24 = vsub.f32 0.0, %v2653_v20  ;;  %v2662_v1 = vsel %vm2654_vm10, %v2650_v7, %v2658_v13 }
0x10dd   : > { %v2651_v25 = vsub.f32 1.0, %v2647_v22  ;;  %v2666_v32 = vadd.f32 1.0, %v2662_v1  ;;  %v2672_v36 = vmul.f32 %v2668_v33, %v2568_v26 }
0x10de   : > { %v2665_v15 = vsel %vm2657_vm12, %v2653_v20, %v2661_v24 }
0x10df   : > { %v2669_v30 = vadd.f32 1.0, %v2665_v15  ;;  %v2659_v31 = vsub.f32 0.0, %v2651_v25  ;;  %v2670_v39 = vmul.f32 %v2666_v32, %v2566_v6 }
0x10e1   : > { %v2663_v35 = vsel %vm2655_vm13, %v2651_v25, %v2659_v31  ;;  %v2673_v38 = vmul.f32 %v2669_v30, %v2569_v34 }
0x10e2   : > { %v2667_v37 = vadd.f32 1.0, %v2663_v35 }
0x10e3   : > { %v2675_v40 = vpack.c.bf16 %v2673_v38, %v2672_v36 }
0x10e4   : > { %v2671_v41 = vmul.f32 %v2667_v37, %v2567_v51 }
0x10e6   : > { %v2674_v42 = vpack.c.bf16 %v2671_v41, %v2670_v39 }
0x10e8   : > { %3215 = vmatprep.mubr.msk.bf16.mxu1 %vm2677_vm14, %v2674_v42 }
0x10e9   : > { %3216 = vmatmul.mubr.msk.bf16.vlgmr.msra.gmra.mxu1 %vm2677_vm14, %v2675_v40 }
0x11a9   : > { %v3217_v46 = vpop.f32.mrf.mxu1 }
0x11aa   : > { %v2739_v58 = vadd.f32 %v3217_v46, %v3858_v57 }
0x11ab   : > { %v2722_v9 = vpop.f32.mrf.mxu1 }
0x11ac   : > { %v2750_v19 = vadd.f32 %v2926_v52, %v2739_v58  ;;  %v2737_v43 = vadd.f32 %v2722_v9, %v3847_v5 }
0x11ad   : > { %v3218_v44 = vpop.f32.mrf.mxu1 }
0x11ae   : > { %2754 = vst.msk [vmem:[%s415_s24 + $0x10] sm:$0xff] %vm426_vm0, %v2750_v19  ;;  %v2748_v45 = vadd.f32 %v2926_v52, %v2737_v43  ;;  %v2740_v47 = vadd.f32 %v3218_v44, %v3851_v55 }
0x11af   : > { %v2725_v48 = vpop.f32.mrf.mxu1 }
0x11b0   : > { %2752 = vst.msk [vmem:[%s415_s24] sm:$0xff] %vm426_vm0, %v2748_v45  ;;  %v2751_v49 = vadd.f32 %v2926_v52, %v2740_v47  ;;  %v2738_v57 = vadd.f32 %v2725_v48, %v3856_v60 }
0x11b2   : > { %2755 = vst.msk [vmem:[%s415_s24 + $0x18] sm:$0xff] %vm426_vm0, %v2751_v49  ;;  %v2749_v50 = vadd.f32 %v2926_v52, %v2738_v57 }
0x11b4   : > { %2753 = vst.msk [vmem:[%s415_s24 + $0x8] sm:$0xff] %vm426_vm0, %v2749_v50 }
0x11b5 PF: > { %s22_s21 = sadd.s32 1, %s3385_s21  }
0x11b6   : > { %p19_p4 = scmp.ge.s32.totalorder %s22_s21, 6  }
0x11b8   :  { %21 = sbr.rel (!%p19_p4) target bundleno = 1 (0x1), region = 107 }

// kernel: tpu_custom_call.1
= control target key start
LH: loop header
LB: loop body
LE: loop exit
PB: predicated region body
PF: predicated region fallthrough
CT: control target
= control target key end

     0   :  { %s3457_s21 = smov 0   ;;  %s3944_s0 = inlined_call_operand.vmem [shape: bf16[128,64], index: 0, kind: input, shape index: {}]   ;;  %s3945_s1 = inlined_call_operand.vmem [shape: bf16[3,64,64], index: 1, kind: input, shape index: {}]   ;;  %s3946_s2 = inlined_call_operand.vmem [shape: f32[3,1,64], index: 2, kind: input, shape index: {}]   ;;  %s3947_s3 = inlined_call_operand.vmem [shape: bf16[64,12], index: 3, kind: input, shape index: {}]   ;;  %s3948_s4 = inlined_call_operand.vmem [shape: f32[1,12], index: 4, kind: input, shape index: {}]   ;;  %s3949_s5 = inlined_call_operand.vmem [shape: bf16[3,12,64], index: 5, kind: input, shape index: {}]   ;;  %s3950_s6 = inlined_call_operand.vmem [shape: bf16[4,16,64], index: 6, kind: input, shape index: {}]   ;;  %s3951_s7 = inlined_call_operand.vmem [shape: f32[1,64], index: 7, kind: input, shape index: {}]   ;;  %s3952_s8 = inlined_call_operand.vmem [shape: bf16[64,4], index: 8, kind: input, shape index: {}]   ;;  %s3953_s9 = inlined_call_operand.vmem [shape: f32[1,4], index: 9, kind: input, shape index: {}]   ;;  %s3954_s10 = inlined_call_operand.vmem [shape: bf16[4,64], index: 10, kind: input, shape index: {}]   ;;  %s3955_s11 = inlined_call_operand.vmem [shape: f32[1,64], index: 11, kind: input, shape index: {}]   ;;  %s3956_s12 = inlined_call_operand.vmem [shape: f32[128,64], index: 12, kind: output, shape index: {}]  }
   0x1 LB: > { %s2812_s22 = sadd.s32 4294967295, %s3385_s21   ;;  %p2816_p0 = scmp.ge.s32.totalorder %s3385_s21, 1  ;;  %s3385_s21 = sphi %s3457_s21, %s22_s21  }
   0x2   : > { %p363_p1 = scmp.lt.s32.totalorder %s3385_s21, 5 }
   0x4   : > { %p364_p2 = pnand %p2816_p0, %p363_p1 }
   0x5   : > { %s2817_s23 = sshll.u32 (!%p364_p2), %s2812_s22, 2  ;;  %s3389_s26 = smov (!%p364_p2), 112  }
   0x6   : > { %367 = sbr.rel (%p364_p2) target bundleno = 4533 (0x11b5), region = 68  ;;  %p406_p3 = scmp.lt.s32.totalorder (!%p364_p2), %s2817_s23, 15 }
   0x7   : > { %s3391_s14 = smov (!%p364_p2), 80  }
   0xb   : > { %s3958_s23 = smov (!%p406_p3, %s2817_s23), 15  ;;  %vm426_vm0 = vcmask 523264   ;;  %v3238_v30 = vld [vmem:[%s3947_s3 + $0x18] sm:$0xff]   ;;  %v3239_v31 = vld [vmem:[%s3947_s3 + $0x10] sm:$0xff]   ;;  %v3240_v32 = vld [vmem:[%s3947_s3 + $0x8] sm:$0xff]   ;;  %vm708_vm1 = vcmask 1045504  }
   0xc   : > { %s2818_s24 = sshll.u32 %s3958_s23, 2  ;;  %3015 = vmatprep.subr.bf16.mxu0 %v3238_v30  ;;  %v3241_v33 = vld [vmem:[%s3947_s3] sm:$0xff]   ;;  %v3243_v57 = vld [vmem:[%s3949_s5 + $0x8] sm:$0x3f]   ;;  %v3510_v60 = vld [vmem:[%s3945_s1 + $0x18] sm:$0xff]   ;;  %vm701_vm6 = vcmask 97280  }
   0xd   : > { %s409_s27 = scalar_lea.vmem %s3944_s0, %s2818_s24  ;;  %3016 = vmatpush3.bf16.msra.mxu0 %v3238_v30  ;;  %v3242_v56 = vld [vmem:[%s3949_s5] sm:$0x3f]   ;;  %v881_v59 = vsel %vm708_vm1, %v3243_v57, 0  ;;  %v3246_v61 = vld [vmem:[%s3949_s5 + $0x10] sm:$0x3f]   ;;  %vm3388_vm7 = vmmov 0  }
   0xe   : > { %v3471_v0 = vld [vmem:[%s409_s27] sm:$0xff]   ;;  %v3473_v1 = vld [vmem:[%s409_s27 + $0x8] sm:$0xff]   ;;  %3017 = vmatprep.subr.bf16.mxu0 %v3239_v31  ;;  %3219 = vmatprep.subr.msk.bf16.mxu1 %vm708_vm1, %v3242_v56  ;;  %v710_v58 = vsel %vm708_vm1, %v3242_v56, 0  ;;  %v3516_v62 = vsel %vm708_vm1, %v3246_v61, 0  ;;  %vm1175_vm8 = vcmask 130048   ;;  %s3390_s27 = smov 96  }
   0xf   : > { %v422_v2 = vunpack.c.l.bf16 %v3471_v0  ;;  %v424_v3 = vunpack.c.l.bf16 %v3473_v1  ;;  %v423_v4 = vunpack.c.h.bf16 %v3471_v0  ;;  %v425_v5 = vunpack.c.h.bf16 %v3473_v1  ;;  %3028 = vmatpush3.bf16.msra.mxu1 %v710_v58  ;;  %v2821_v63 = vld [vmem:[%s3948_s4] ss:$0 sm:$0xff]  ;;  %s2820_s17 = sshll.u32 %s3958_s23, 3 }
  0x10   : > { %3033 = vmatprep.subr.bf16.mxu1 %v3510_v60  ;;  %vm2684_vm9 = vcmask 1041408   ;;  %vm2677_vm14 = vcmask 31744   ;;  %s415_s24 = scalar_lea.vmem %s3956_s12, %s2820_s17 }
  0x11   : > { %v427_v6 = vsel %vm426_vm0, %v422_v2, 0.0  ;;  %v433_v7 = vsel %vm426_vm0, %v424_v3, 0.0  ;;  %v430_v8 = vsel %vm426_vm0, %v423_v4, 0.0  ;;  %v436_v9 = vsel %vm426_vm0, %v425_v5, 0.0  ;;  %3018 = vmatpush3.bf16.msra.mxu0 %v3239_v31 }
  0x12   : > { %428 = vadd.xlane.f32.xlu0 %v427_v6  ;;  %434 = vadd.xlane.f32.xlu1 %v433_v7 }
  0x13   : > { %3019 = vmatprep.subr.bf16.mxu0 %v3240_v32 }
  0x15   : > { %3020 = vmatpush3.bf16.msra.mxu0 %v3240_v32 }
  0x16   : > { %431 = vadd.xlane.f32.xlu0 %v430_v8  ;;  %437 = vadd.xlane.f32.xlu1 %v436_v9 }
  0x17   : > { %3021 = vmatprep.subr.bf16.mxu0 %v3241_v33 }
  0x19   : > { %3022 = vmatpush3.bf16.msra.mxu0 %v3241_v33 }
  0x1a   : > { %3220 = vmatprep.subr.msk.bf16.mxu0 %vm708_vm1, %v3243_v57 }
  0x9b   : > { %v429_v10 = vpop.xlane.xlu0 %428  ;;  %v435_v11 = vpop.xlane.xlu1 %434 }
  0x9c   : > { %v440_v12 = vmul.f32 0.015625, %v429_v10  ;;  %v442_v13 = vmul.f32 0.015625, %v435_v11 }
  0x9e   : > { %v444_v14 = vsub.f32 %v422_v2, %v440_v12  ;;  %v446_v15 = vsub.f32 %v424_v3, %v442_v13 }
  0x9f   : > { %v432_v16 = vpop.xlane.xlu0 %431  ;;  %v438_v17 = vpop.xlane.xlu1 %437 }
  0xa0   : > { %v441_v18 = vmul.f32 0.015625, %v432_v16  ;;  %v443_v19 = vmul.f32 0.015625, %v438_v17  ;;  %v448_v20 = vmul.f32 %v444_v14, %v444_v14  ;;  %v450_v21 = vmul.f32 %v446_v15, %v446_v15 }
  0xa2   : > { %v445_v22 = vsub.f32 %v423_v4, %v441_v18  ;;  %v447_v23 = vsub.f32 %v425_v5, %v443_v19  ;;  %v452_v24 = vsel %vm426_vm0, %v448_v20, 0.0  ;;  %v458_v25 = vsel %vm426_vm0, %v450_v21, 0.0 }
  0xa3   : > { %453 = vadd.xlane.f32.xlu0 %v452_v24 }
  0xa4   : > { %v449_v26 = vmul.f32 %v445_v22, %v445_v22  ;;  %v451_v27 = vmul.f32 %v447_v23, %v447_v23 }
  0xa6   : > { %v455_v28 = vsel %vm426_vm0, %v449_v26, 0.0  ;;  %v461_v29 = vsel %vm426_vm0, %v451_v27, 0.0 }
  0xa7   : > { %459 = vadd.xlane.f32.xlu0 %v458_v25  ;;  %456 = vadd.xlane.f32.xlu1 %v455_v28 }
  0xab   : > { %462 = vadd.xlane.f32.xlu1 %v461_v29 }
 0x12c   : > { %v454_v34 = vpop.xlane.xlu0 %453 }
 0x12d   : > { %v464_v35 = vmul.f32 0.015625, %v454_v34 }
 0x12f   : > { %v468_v36 = vadd.f32 1e-05, %v464_v35 }
 0x130   : > { %v457_v37 = vpop.xlane.xlu1 %456  ;;  %v460_v38 = vpop.xlane.xlu0 %459 }
 0x131   : > { %v465_v39 = vmul.f32 0.015625, %v457_v37  ;;  %v466_v40 = vmul.f32 0.015625, %v460_v38  ;;  %3267 = vrsqrt.f32 %v468_v36 }
 0x133   : > { %v469_v41 = vadd.f32 1e-05, %v465_v39  ;;  %v470_v42 = vadd.f32 1e-05, %v466_v40 }
 0x134   : > { %v463_v43 = vpop.xlane.xlu1 %462 }
 0x135   : > { %3269 = vrsqrt.f32 %v469_v41  ;;  %v467_v44 = vmul.f32 0.015625, %v463_v43 }
 0x136   : > { %3271 = vrsqrt.f32 %v470_v42 }
 0x137   : > { %v471_v45 = vadd.f32 1e-05, %v467_v44 }
 0x139   : > { %3273 = vrsqrt.f32 %v471_v45 }
 0x13e   : > { %v3268_v46 = vpop.eup %3267 }
 0x13f   : > { %v476_v48 = vmul.f32 %v3268_v46, %v444_v14 }
 0x142   : > { %v3270_v47 = vpop.eup %3269 }
 0x143   : > { %v477_v49 = vmul.f32 %v3270_v47, %v445_v22  ;;  %v3272_v50 = vpop.eup %3271 }
 0x144   : > { %v478_v53 = vmul.f32 %v3272_v50, %v446_v15 }
 0x145   : > { %v480_v51 = vpack.c.bf16 %v477_v49, %v476_v48 }
 0x146   : > { %v3274_v52 = vpop.eup %3273 }
 0x147   : > { %3023 = vmatprep.mubr.msk.bf16.mxu0 %vm426_vm0, %v480_v51  ;;  %v479_v54 = vmul.f32 %v3274_v52, %v447_v23 }
 0x149   : > { %v481_v55 = vpack.c.bf16 %v479_v54, %v478_v53 }
 0x14b   : > { %3024 = vmatmul.mubr.msk.bf16.vlgmr.msra.gmra.mxu0 %vm426_vm0, %v481_v55 }
 0x14c   : > { %3046 = vmatpush3.bf16.msra.mxu0 %v881_v59 }
 0x14d   : > { %3221 = vmatprep.subr.msk.bf16.mxu0 %vm708_vm1, %v3246_v61 }
 0x20b   : > { %v3025_v2 = vpop.f32.mrf.mxu0 }
 0x20c   : > { %v3521_v3 = vadd.f32 %v3025_v2, %v2821_v63 }
 0x20d   : > { %v561_v4 = vpop.f32.mrf.mxu0 }
 0x20e   : > { %v3524_v5 = vmul.f32 0.70710677, %v3521_v3  ;;  %v3526_v6 = vadd.f32 %v2821_v63, %v561_v4 }
 0x20f   : > { %v3026_v7 = vpop.f32.mrf.mxu0 }
 0x210   : > { %v586_v8 = vand.u32 2147483647, %v3524_v5  ;;  %v3530_v9 = vmul.f32 0.70710677, %v3526_v6  ;;  %v3532_v10 = vadd.f32 %v3026_v7, %v2821_v63  ;;  %vm666_vm3 = vcmp.ge.f32.partialorder %v3524_v5, 0.0 }
 0x211   : > { %v564_v11 = vpop.f32.mrf.mxu0 }
 0x212   : > { %v590_v12 = vmul.f32 0.3275911, %v586_v8  ;;  %v584_v13 = vand.u32 2147483647, %v3530_v9  ;;  %v3536_v14 = vmul.f32 0.70710677, %v3532_v10  ;;  %v3538_v15 = vadd.f32 %v2821_v63, %v564_v11 }
 0x213   : > { %v642_v26 = vsub.f32 0.0, %v586_v8  ;;  %vm664_vm2 = vcmp.ge.f32.partialorder %v3530_v9, 0.0  ;;  %v576_v9 = vmul.f32 0.5, %v3526_v6  ;;  %v3248_v6 = vld [vmem:[%s3945_s1 + $0x58] sm:$0xff]  }
 0x214   : > { %v594_v16 = vadd.f32 1.0, %v590_v12  ;;  %v588_v17 = vmul.f32 0.3275911, %v584_v13  ;;  %v587_v18 = vand.u32 2147483647, %v3536_v14  ;;  %v640_v27 = vsub.f32 0.0, %v584_v13 }
 0x215   : > { %v3542_v19 = vmul.f32 0.70710677, %v3538_v15  ;;  %v646_v28 = vmul.f32 %v642_v26, %v586_v8  ;;  %vm667_vm4 = vcmp.ge.f32.partialorder %v3536_v14, 0.0 }
 0x216   : > { %3275 = vrcp.f32 %v594_v16  ;;  %v592_v20 = vadd.f32 1.0, %v588_v17  ;;  %v591_v21 = vmul.f32 0.3275911, %v587_v18  ;;  %v643_v29 = vsub.f32 0.0, %v587_v18 }
 0x217   : > { %v585_v22 = vand.u32 2147483647, %v3542_v19  ;;  %v644_v31 = vmul.f32 %v640_v27, %v584_v13  ;;  %v652_v33 = vmul.f32 1.442695, %v646_v28  ;;  %vm665_vm5 = vcmp.ge.f32.partialorder %v3542_v19, 0.0  ;;  %v3245_v19 = vld [vmem:[%s3945_s1 + $0x10] sm:$0xff]  }
 0x218   : > { %3277 = vrcp.f32 %v592_v20  ;;  %v595_v23 = vadd.f32 1.0, %v591_v21  ;;  %v647_v35 = vmul.f32 %v643_v29, %v587_v18 }
 0x219   : > { %v589_v24 = vmul.f32 0.3275911, %v585_v22  ;;  %v641_v34 = vsub.f32 0.0, %v585_v22  ;;  %v648_v39 = vmul.f32 1.442695, %v644_v31 }
 0x21a   : > { %3279 = vrcp.f32 %v595_v23  ;;  %v654_v45 = vmul.f32 1.442695, %v647_v35 }
 0x21b   : > { %v593_v25 = vadd.f32 1.0, %v589_v24  ;;  %v645_v42 = vmul.f32 %v641_v34, %v585_v22 }
 0x21d   : > { %3281 = vrcp.f32 %v593_v25  ;;  %v650_v52 = vmul.f32 1.442695, %v645_v42 }
 0x21e   : > { %3283 = vpow2.f32 %v652_v33 }
 0x21f   : > { %3285 = vpow2.f32 %v648_v39 }
 0x220   : > { %3287 = vpow2.f32 %v654_v45 }
 0x221   : > { %3289 = vpow2.f32 %v650_v52 }
 0x223   : > { %v3276_v30 = vpop.eup %3275 }
 0x224   : > { %v606_v32 = vmul.f32 1.0614054, %v3276_v30 }
 0x225   : > { %v3278_v36 = vpop.eup %3277 }
 0x226   : > { %v610_v37 = vadd.f32 -1.4531521, %v606_v32  ;;  %v604_v38 = vmul.f32 1.0614054, %v3278_v36 }
 0x227   : > { %v3280_v40 = vpop.eup %3279 }
 0x228   : > { %v614_v41 = vmul.f32 %v3276_v30, %v610_v37  ;;  %v608_v43 = vadd.f32 -1.4531521, %v604_v38  ;;  %v607_v44 = vmul.f32 1.0614054, %v3280_v40 }
 0x22a   : > { %v618_v46 = vadd.f32 1.4214138, %v614_v41  ;;  %v3282_v47 = vpop.eup %3281  ;;  %v612_v48 = vmul.f32 %v3278_v36, %v608_v43  ;;  %v611_v49 = vadd.f32 -1.4531521, %v607_v44 }
 0x22b   : > { %v605_v51 = vmul.f32 1.0614054, %v3282_v47  ;;  %v3284_v16 = vpop.eup %3283 }
 0x22c   : > { %v622_v50 = vmul.f32 %v3276_v30, %v618_v46  ;;  %v616_v53 = vadd.f32 1.4214138, %v612_v48  ;;  %v615_v54 = vmul.f32 %v3280_v40, %v611_v49  ;;  %v3286_v24 = vpop.eup %3285  ;;  %v579_v48 = vmul.f32 0.5, %v3532_v10  ;;  %v3249_v10 = vld [vmem:[%s3945_s1] sm:$0xff]  }
 0x22d   : > { %v609_v56 = vadd.f32 -1.4531521, %v605_v51  ;;  %v3288_v29 = vpop.eup %3287  ;;  %v578_v51 = vmul.f32 0.5, %v3521_v3  ;;  %v3247_v3 = vld [vmem:[%s3945_s1 + $0x8] sm:$0xff]  }
 0x22e   : > { %v626_v55 = vadd.f32 -0.28449672, %v622_v50  ;;  %v620_v57 = vmul.f32 %v3278_v36, %v616_v53  ;;  %v619_v58 = vadd.f32 1.4214138, %v615_v54  ;;  %v3290_v35 = vpop.eup %3289  ;;  %v577_v50 = vmul.f32 0.5, %v3538_v15  ;;  %v3252_v15 = vld [vmem:[%s3945_s1 + $0x48] sm:$0xff]  }
 0x22f   : > { %v613_v61 = vmul.f32 %v3282_v47, %v609_v56 }
 0x230   : > { %v630_v59 = vmul.f32 %v3276_v30, %v626_v55  ;;  %v624_v63 = vadd.f32 -0.28449672, %v620_v57  ;;  %v623_v2 = vmul.f32 %v3280_v40, %v619_v58  ;;  %v3253_v57 = vld [vmem:[%s3945_s1 + $0x30] sm:$0xff]   ;;  %v3254_v58 = vld [vmem:[%s3945_s1 + $0x40] sm:$0xff]  }
 0x231   : > { %v617_v7 = vadd.f32 1.4214138, %v613_v61  ;;  %v3256_v61 = vld [vmem:[%s3945_s1 + $0x20] sm:$0xff]  }
 0x232   : > { %v634_v4 = vadd.f32 0.2548296, %v630_v59  ;;  %v628_v8 = vmul.f32 %v3278_v36, %v624_v63  ;;  %v627_v11 = vadd.f32 -0.28449672, %v623_v2  ;;  %v3255_v59 = vld [vmem:[%s3945_s1 + $0x28] sm:$0xff]   ;;  %v3387_v63 = vmov 0.0  }
 0x233   : > { %v621_v13 = vmul.f32 %v3282_v47, %v617_v7 }
 0x234   : > { %v638_v12 = vmul.f32 %v3276_v30, %v634_v4  ;;  %v632_v17 = vadd.f32 0.2548296, %v628_v8  ;;  %v631_v18 = vmul.f32 %v3280_v40, %v627_v11 }
 0x235   : > { %v625_v21 = vadd.f32 -0.28449672, %v621_v13 }
 0x236   : > { %v658_v20 = vmul.f32 %v3284_v16, %v638_v12  ;;  %v636_v22 = vmul.f32 %v3278_v36, %v632_v17  ;;  %v635_v23 = vadd.f32 0.2548296, %v631_v18 }
 0x237   : > { %v629_v25 = vmul.f32 %v3282_v47, %v625_v21 }
 0x238   : > { %v662_v26 = vsub.f32 1.0, %v658_v20  ;;  %v656_v27 = vmul.f32 %v3286_v24, %v636_v22  ;;  %v639_v28 = vmul.f32 %v3280_v40, %v635_v23 }
 0x239   : > { %v633_v31 = vadd.f32 0.2548296, %v629_v25 }
 0x23a   : > { %v660_v32 = vsub.f32 1.0, %v656_v27  ;;  %v659_v33 = vmul.f32 %v3288_v29, %v639_v28  ;;  %v670_v30 = vsub.f32 0.0, %v662_v26 }
 0x23b   : > { %v637_v34 = vmul.f32 %v3282_v47, %v633_v31  ;;  %v2881_v31 = vld [vmem:[%s3946_s2 + $0x2] ss:$0 sm:$0xff] }
 0x23c   : > { %v668_v37 = vsub.f32 0.0, %v660_v32  ;;  %v663_v38 = vsub.f32 1.0, %v659_v33  ;;  %v674_v40 = vsel %vm666_vm3, %v662_v26, %v670_v30 }
 0x23d   : > { %v657_v39 = vmul.f32 %v3290_v35, %v637_v34  ;;  %v678_v47 = vadd.f32 1.0, %v674_v40 }
 0x23e   : > { %v671_v41 = vsub.f32 0.0, %v663_v38  ;;  %v672_v36 = vsel %vm664_vm2, %v660_v32, %v668_v37 }
 0x23f   : > { %v661_v42 = vsub.f32 1.0, %v657_v39  ;;  %v676_v46 = vadd.f32 1.0, %v672_v36  ;;  %v682_v54 = vmul.f32 %v678_v47, %v578_v51  ;;  %v2860_v36 = vld [vmem:[%s3946_s2 + $0x1] ss:$0 sm:$0xff] }
 0x240   : > { %v675_v43 = vsel %vm667_vm4, %v663_v38, %v671_v41 }
 0x241   : > { %v679_v44 = vadd.f32 1.0, %v675_v43  ;;  %v669_v45 = vsub.f32 0.0, %v661_v42  ;;  %v680_v52 = vmul.f32 %v676_v46, %v576_v9  ;;  %v2839_v9 = vld [vmem:[%s3946_s2] ss:$0 sm:$0xff] }
 0x243   : > { %v673_v49 = vsel %vm665_vm5, %v661_v42, %v669_v45  ;;  %v683_v14 = vmul.f32 %v679_v44, %v579_v48 }
 0x244   : > { %v677_v5 = vadd.f32 1.0, %v673_v49 }
 0x245   : > { %v685_v56 = vpack.c.bf16 %v683_v14, %v682_v54 }
 0x246   : > { %v681_v53 = vmul.f32 %v677_v5, %v577_v50 }
 0x248   : > { %v684_v55 = vpack.c.bf16 %v681_v53, %v680_v52 }
 0x24a   : > { %3029 = vmatprep.mubr.msk.bf16.mxu1 %vm701_vm6, %v684_v55  ;;  %3047 = vmatprep.mubr.msk.bf16.mxu0 %vm701_vm6, %v684_v55 }
 0x24b   : > { %3030 = vmatmul.mubr.msk.bf16.vlgmr.msra.gmra.mxu1 %vm701_vm6, %v685_v56  ;;  %3048 = vmatmul.mubr.msk.bf16.vlgmr.msra.gmra.mxu0 %vm701_vm6, %v685_v56 }
 0x24c   : > { %3034 = vmatpush3.bf16.msra.mxu1 %v3510_v60  ;;  %3065 = vmatprep.mubr.msk.bf16.mxu0 %vm701_vm6, %v684_v55  ;;  %v3250_v60 = vld [vmem:[%s3945_s1 + $0x50] sm:$0xff]  }
 0x24d   : > { %3035 = vmatprep.subr.bf16.mxu1 %v3245_v19  ;;  %3064 = vmatpush3.bf16.msra.mxu0 %v3516_v62  ;;  %v3251_v62 = vld [vmem:[%s3945_s1 + $0x38] sm:$0xff]  }
 0x24e   : > { %3069 = vmatprep.subr.bf16.mxu0 %v3248_v6  ;;  %3041 = vmatprep.mubr.msk.bf16.mxu1 %vm426_vm0, %v3471_v0 }
 0x250   : > { %3036 = vmatpush3.bf16.msra.mxu1 %v3245_v19 }
 0x251   : > { %3037 = vmatprep.subr.bf16.mxu1 %v3247_v3 }
 0x253   : > { %3066 = vmatmul.mubr.msk.bf16.vlgmr.msra.gmra.mxu0 %vm701_vm6, %v685_v56 }
 0x254   : > { %3038 = vmatpush3.bf16.msra.mxu1 %v3247_v3  ;;  %3070 = vmatpush3.bf16.msra.mxu0 %v3248_v6 }
 0x255   : > { %3039 = vmatprep.subr.bf16.mxu1 %v3249_v10  ;;  %3071 = vmatprep.subr.bf16.mxu0 %v3250_v60 }
 0x256   : > { %3077 = vmatprep.mubr.msk.bf16.mxu0 %vm426_vm0, %v3471_v0 }
 0x258   : > { %3040 = vmatpush3.bf16.msra.mxu1 %v3249_v10  ;;  %3072 = vmatpush3.bf16.msra.mxu0 %v3250_v60 }
 0x259   : > { %3051 = vmatprep.subr.bf16.mxu1 %v3251_v62  ;;  %3073 = vmatprep.subr.bf16.mxu0 %v3252_v15 }
 0x25b   : > { %3042 = vmatmul.mubr.msk.bf16.vlgmr.msra.gmra.mxu1 %vm426_vm0, %v3473_v1 }
 0x25c   : > { %3052 = vmatpush3.bf16.msra.mxu1 %v3251_v62  ;;  %3074 = vmatpush3.bf16.msra.mxu0 %v3252_v15 }
 0x25d   : > { %3053 = vmatprep.subr.bf16.mxu1 %v3253_v57  ;;  %3075 = vmatprep.subr.bf16.mxu0 %v3254_v58 }
 0x25e   : > { %3059 = vmatprep.mubr.msk.bf16.mxu1 %vm426_vm0, %v3471_v0 }
 0x260   : > { %3054 = vmatpush3.bf16.msra.mxu1 %v3253_v57  ;;  %3076 = vmatpush3.bf16.msra.mxu0 %v3254_v58 }
 0x261   : > { %3055 = vmatprep.subr.bf16.mxu1 %v3255_v59  ;;  %3093 = vmatprep.subr.bf16.mxu0 %v3387_v63 }
 0x263   : > { %3078 = vmatmul.mubr.msk.bf16.vlgmr.msra.gmra.mxu0 %vm426_vm0, %v3473_v1 }
 0x264   : > { %3056 = vmatpush3.bf16.msra.mxu1 %v3255_v59  ;;  %3095 = vmatprep.mubr.msk.bf16.mxu0 %vm3388_vm7, %v3387_v63 }
 0x265   : > { %3057 = vmatprep.subr.bf16.mxu1 %v3256_v61 }
 0x268   : > { %3058 = vmatpush3.bf16.msra.mxu1 %v3256_v61 }
 0x269   : > { %3081 = vmatprep.subr.bf16.mxu1 %v3387_v63 }
 0x26b   : > { %3060 = vmatmul.mubr.msk.bf16.vlgmr.msra.gmra.mxu1 %vm426_vm0, %v3473_v1 }
 0x26c   : > { %3083 = vmatprep.mubr.msk.bf16.mxu1 %vm3388_vm7, %v3387_v63 }
 0x30b   : > { %v3049_v0 = vpop.f32.mrf.mxu0  ;;  %v3031_v4 = vpop.f32.mrf.mxu1 }
 0x30d   : > { %v917_v2 = vpop.f32.mrf.mxu0  ;;  %v746_v11 = vpop.f32.mrf.mxu1 }
 0x30f   : > { %v3050_v7 = vpop.f32.mrf.mxu0  ;;  %v3032_v1 = vpop.f32.mrf.mxu1 }
 0x311   : > { %v920_v8 = vpop.f32.mrf.mxu0  ;;  %v749_v16 = vpop.f32.mrf.mxu1 }
 0x313   : > { %v3067_v12 = vpop.f32.mrf.mxu0 }
 0x315   : > { %v1073_v13 = vpop.f32.mrf.mxu0 }
 0x317   : > { %v3068_v17 = vpop.f32.mrf.mxu0 }
 0x319   : > { %v1076_v20 = vpop.f32.mrf.mxu0 }
 0x31b   : > { %v3043_v18 = vpop.f32.mrf.mxu1 }
 0x31c   : > { %v844_v55 = vadd.f32 %v3043_v18, %v3031_v4 }
 0x31d   : > { %v835_v21 = vpop.f32.mrf.mxu1 }
 0x31e   : > { %v836_v47 = vadd.f32 %v835_v21, %v746_v11  ;;  %v859_v10 = vadd.f32 %v2839_v9, %v844_v55 }
 0x31f   : > { %v3044_v23 = vpop.f32.mrf.mxu1 }
 0x320   : > { %v857_v51 = vadd.f32 %v2839_v9, %v836_v47  ;;  %v847_v52 = vadd.f32 %v3044_v23, %v3032_v1 }
 0x321   : > { %v838_v27 = vpop.f32.mrf.mxu1 }
 0x322   : > { %v839_v44 = vadd.f32 %v838_v27, %v749_v16  ;;  %v860_v6 = vadd.f32 %v2839_v9, %v847_v52 }
 0x323   : > { %v3079_v22 = vpop.f32.mrf.mxu0 }
 0x324   : > { %v858_v50 = vadd.f32 %v2839_v9, %v839_v44  ;;  %v1155_v19 = vadd.f32 %v3079_v22, %v3067_v12  ;;  %v3641_v62 = vpack.c.bf16 %v860_v6, %v859_v10 }
 0x325   : > { %v1146_v24 = vpop.f32.mrf.mxu0 }
 0x326   : > { %v1147_v26 = vadd.f32 %v1146_v24, %v1073_v13  ;;  %v3632_v53 = vpack.c.bf16 %v858_v50, %v857_v51  ;;  %v1171_v60 = vadd.f32 %v2881_v31, %v1155_v19 }
 0x327   : > { %v3080_v25 = vpop.f32.mrf.mxu0 }
 0x328   : > { %v1169_v33 = vadd.f32 %v2881_v31, %v1147_v26  ;;  %v1158_v54 = vadd.f32 %v3080_v25, %v3068_v17 }
 0x329   : > { %v1149_v28 = vpop.f32.mrf.mxu0 }
 0x32a   : > { %v1150_v29 = vadd.f32 %v1149_v28, %v1076_v20  ;;  %v1172_v3 = vadd.f32 %v2881_v31, %v1158_v54 }
 0x32b   : > { %v3061_v32 = vpop.f32.mrf.mxu1 }
 0x32c   : > { %v1170_v34 = vadd.f32 %v2881_v31, %v1150_v29  ;;  %v999_v45 = vadd.f32 %v3061_v32, %v3049_v0  ;;  %v3643_v15 = vpack.c.bf16 %v1172_v3, %v1171_v60 }
 0x32d   : > { %v990_v35 = vpop.f32.mrf.mxu1 }
 0x32e   : > { %v3615_v30 = vpack.c.bf16 %v1170_v34, %v1169_v33  ;;  %v991_v38 = vadd.f32 %v990_v35, %v917_v2  ;;  %v1015_v5 = vadd.f32 %v2860_v36, %v999_v45 }
 0x32f   : > { %v3062_v37 = vpop.f32.mrf.mxu1 }
 0x330   : > { %3094 = vmatpush3.bf16.msra.mxu0 %v3615_v30  ;;  %v1013_v42 = vadd.f32 %v2860_v36, %v991_v38  ;;  %v1002_v40 = vadd.f32 %v3062_v37, %v3050_v7 }
 0x331   : > { %v993_v39 = vpop.f32.mrf.mxu1  ;;  %3105 = vmatprep.subr.bf16.mxu0 %v3387_v63 }
 0x332   : > { %v994_v41 = vadd.f32 %v993_v39, %v920_v8  ;;  %v1016_v48 = vadd.f32 %v2860_v36, %v1002_v40 }
 0x334   : > { %v1014_v43 = vadd.f32 %v2860_v36, %v994_v41  ;;  %v3630_v14 = vpack.c.bf16 %v1016_v48, %v1015_v5 }
 0x336   : > { %v3622_v46 = vpack.c.bf16 %v1014_v43, %v1013_v42  ;;  %v1227_v56 = vsel %vm1175_vm8, %v3630_v14, 0 }
 0x338   : > { %v1180_v49 = vsel %vm1175_vm8, %v3622_v46, 0 }
 0x339   : > { %3082 = vmatpush3.bf16.xpose.msra.mxu1 %v1180_v49 }
 0x33a   : > { %3087 = vmatprep.subr.bf16.mxu1 %v3387_v63 }
 0x340   : > { %3084 = vmatmul.mubr.msk.bf16.vlgmr.msra.gmra.mxu1 %vm1175_vm8, %v3632_v53 }
 0x341   : > { %3088 = vmatpush3.bf16.xpose.msra.mxu1 %v1227_v56  ;;  %3089 = vmatprep.mubr.msk.bf16.mxu1 %vm3388_vm7, %v3387_v63 }
 0x342   : > { %3099 = vmatprep.subr.bf16.mxu1 %v3387_v63 }
 0x348   : > { %3090 = vmatmul.mubr.msk.bf16.vlgmr.msra.gmra.mxu1 %vm1175_vm8, %v3641_v62 }
 0x349   : > { %3100 = vmatpush3.bf16.msra.mxu1 %v3643_v15  ;;  %3101 = vmatprep.mubr.msk.bf16.mxu1 %vm3388_vm7, %v3387_v63 }
 0x34a   : > { %3111 = vmatprep.subr.bf16.mxu1 %v3387_v63 }
 0x400   : > { %v1216_v57 = vpop.f32.mrf.mxu1 }
 0x401   : > { %v1270_v58 = vsel %vm1175_vm8, %v1216_v57, -inf }
 0x402   : > { %1271 = vmax.xlane.f32.xlu0 %v1270_v58  ;;  %v3085_v59 = vpop.f32.mrf.mxu1 }
 0x404   : > { %v1219_v61 = vpop.f32.mrf.mxu1 }
 0x405   : > { %v1273_v0 = vsel %vm1175_vm8, %v1219_v61, -inf }
 0x406   : > { %1274 = vmax.xlane.f32.xlu1 %v1273_v0  ;;  %v3086_v2 = vpop.f32.mrf.mxu1 }
 0x408   : > { %v1263_v4 = vpop.f32.mrf.mxu1 }
 0x409   : > { %v1276_v7 = vsel %vm1175_vm8, %v1263_v4, -inf }
 0x40a   : > { %1277 = vmax.xlane.f32.xlu0 %v1276_v7  ;;  %v3091_v8 = vpop.f32.mrf.mxu1 }
 0x40c   : > { %v1266_v11 = vpop.f32.mrf.mxu1 }
 0x40d   : > { %v1279_v12 = vsel %vm1175_vm8, %v1266_v11, -inf }
 0x40e   : > { %1280 = vmax.xlane.f32.xlu1 %v1279_v12  ;;  %v3092_v1 = vpop.f32.mrf.mxu1 }
 0x48b   : > { %v1272_v13 = vpop.xlane.xlu0 %1271 }
 0x48c   : > { %v1282_v16 = vsub.f32 %v1216_v57, %v1272_v13 }
 0x48e   : > { %v1286_v17 = vmul.f32 1.442695, %v1282_v16 }
 0x48f   : > { %v1275_v18 = vpop.xlane.xlu1 %1274 }
 0x490   : > { %3291 = vpow2.f32 %v1286_v17  ;;  %v1283_v20 = vsub.f32 %v1219_v61, %v1275_v18 }
 0x492   : > { %v1288_v21 = vmul.f32 1.442695, %v1283_v20 }
 0x493   : > { %v1278_v22 = vpop.xlane.xlu0 %1277 }
 0x494   : > { %3293 = vpow2.f32 %v1288_v21  ;;  %v1284_v23 = vsub.f32 %v1263_v4, %v1278_v22 }
 0x496   : > { %v1290_v24 = vmul.f32 1.442695, %v1284_v23 }
 0x497   : > { %v1281_v32 = vpop.xlane.xlu1 %1280 }
 0x498   : > { %3295 = vpow2.f32 %v1290_v24  ;;  %v1285_v33 = vsub.f32 %v1266_v11, %v1281_v32 }
 0x49a   : > { %v1292_v34 = vmul.f32 1.442695, %v1285_v33 }
 0x49c   : > { %3297 = vpow2.f32 %v1292_v34 }
 0x49d   : > { %v3292_v25 = vpop.eup %3291 }
 0x49e   : > { %v1294_v26 = vsel %vm1175_vm8, %v3292_v25, 0.0 }
 0x49f   : > { %1295 = vadd.xlane.f32.xlu0 %v1294_v26 }
 0x4a1   : > { %v3294_v27 = vpop.eup %3293 }
 0x4a2   : > { %v1297_v28 = vsel %vm1175_vm8, %v3294_v27, 0.0 }
 0x4a3   : > { %1298 = vadd.xlane.f32.xlu1 %v1297_v28 }
 0x4a5   : > { %v3296_v29 = vpop.eup %3295 }
 0x4a6   : > { %v1300_v31 = vsel %vm1175_vm8, %v3296_v29, 0.0 }
 0x4a7   : > { %1301 = vadd.xlane.f32.xlu0 %v1300_v31 }
 0x4a9   : > { %v3298_v35 = vpop.eup %3297 }
 0x4aa   : > { %v1303_v37 = vsel %vm1175_vm8, %v3298_v35, 0.0 }
 0x4b4   : > { %1465 = vrot.lane.b32.xlu1 %v3630_v14, %s3389_s26 }
 0x4bd   : > { %1412 = vrot.lane.b32.xlu0 %v3622_v46, %s3389_s26 }
 0x4d8   : > { %1304 = vadd.xlane.f32.xlu1 %v1303_v37 }
 0x4e9   : > { %1409 = vrot.lane.b32.xlu1 %v3632_v53, %s3389_s26 }
 0x4ed   : > { %1462 = vrot.lane.b32.xlu1 %v3641_v62, %s3389_s26 }
 0x528   : > { %v1296_v38 = vpop.xlane.xlu0 %1295 }
 0x529   : > { %3299 = vrcp.f32 %v1296_v38 }
 0x52c   : > { %v1299_v39 = vpop.xlane.xlu1 %1298 }
 0x52d   : > { %3301 = vrcp.f32 %v1299_v39 }
 0x530   : > { %v1302_v41 = vpop.xlane.xlu0 %1301  ;;  %v1466_v48 = vpop.permute.xlu1 %1465 }
 0x531   : > { %3303 = vrcp.f32 %v1302_v41  ;;  %v1471_v55 = vsel %vm1175_vm8, %v1466_v48, 0 }
 0x534   : > { %v1413_v44 = vpop.permute.xlu0 %1412 }
 0x535   : > { %v1418_v47 = vsel %vm1175_vm8, %v1413_v44, 0 }
 0x536   : > { %v3300_v36 = vpop.eup %3299 }
 0x537   : > { %v1310_v40 = vmul.f32 %v3300_v36, %v3292_v25 }
 0x53a   : > { %v3302_v42 = vpop.eup %3301 }
 0x53b   : > { %v1311_v43 = vmul.f32 %v3302_v42, %v3294_v27 }
 0x53d   : > { %v1314_v45 = vpack.c.bf16 %v1311_v43, %v1310_v40 }
 0x53e   : > { %v3304_v50 = vpop.eup %3303 }
 0x53f   : > { %3096 = vmatmul.mubr.msk.bf16.vlgmr.msra.gmra.mxu0 %vm1175_vm8, %v1314_v45  ;;  %v1312_v51 = vmul.f32 %v3304_v50, %v3296_v29 }
 0x540   : > { %3106 = vmatpush3.bf16.xpose.msra.mxu0 %v1418_v47  ;;  %3107 = vmatprep.mubr.msk.bf16.mxu0 %vm3388_vm7, %v3387_v63 }
 0x541   : > { %3117 = vmatprep.subr.bf16.mxu0 %v3387_v63 }
 0x561   : > { %v1305_v49 = vpop.xlane.xlu1 %1304 }
 0x562   : > { %3305 = vrcp.f32 %v1305_v49 }
 0x565   : > { %v1410_v9 = vpop.permute.xlu1 %1409 }
 0x566   : > { %3108 = vmatmul.mubr.msk.bf16.vlgmr.msra.gmra.mxu0 %vm1175_vm8, %v1410_v9 }
 0x567   : > { %3119 = vmatprep.mubr.msk.bf16.mxu0 %vm3388_vm7, %v3387_v63 }
 0x569   : > { %v1463_v56 = vpop.permute.xlu1 %1462 }
 0x56f   : > { %v3306_v5 = vpop.eup %3305 }
 0x570   : > { %v1313_v52 = vmul.f32 %v3306_v5, %v3298_v35 }
 0x572   : > { %v1315_v54 = vpack.c.bf16 %v1313_v52, %v1312_v51  ;;  %v3257_v51 = vld [vmem:[%s3950_s6] sm:$0xff]  }
 0x574   : > { %3102 = vmatmul.mubr.msk.bf16.vlgmr.msra.gmra.mxu1 %vm1175_vm8, %v1315_v54 }
 0x575   : > { %3112 = vmatpush3.bf16.xpose.msra.mxu1 %v1471_v55  ;;  %3113 = vmatprep.mubr.msk.bf16.mxu1 %vm3388_vm7, %v3387_v63 }
 0x576   : > { %3123 = vmatprep.subr.bf16.mxu1 %v3387_v63 }
 0x57c   : > { %3114 = vmatmul.mubr.msk.bf16.vlgmr.msra.gmra.mxu1 %vm1175_vm8, %v1463_v56 }
 0x57d   : > { %3125 = vmatprep.mubr.msk.bf16.mxu1 %vm3388_vm7, %v3387_v63 }
 0x5ff   : > { %v3683_v19 = vpop.f32.mrf.mxu0 }
 0x601   : > { %v3097_v6 = vpop.f32.mrf.mxu0 }
 0x603   : > { %v3685_v3 = vpop.f32.mrf.mxu0 }
 0x604   : > { %v1404_v10 = vpack.c.bf16 %v3685_v3, %v3683_v19  ;;  %v3258_v3 = vld [vmem:[%s3950_s6 + $0x8] sm:$0xff]  }
 0x605   : > { %v3098_v60 = vpop.f32.mrf.mxu0 }
 0x626   : > { %v1454_v57 = vpop.f32.mrf.mxu0 }
 0x627   : > { %v1514_v58 = vsel %vm1175_vm8, %v1454_v57, -inf }
 0x628   : > { %1515 = vmax.xlane.f32.xlu0 %v1514_v58  ;;  %v3109_v59 = vpop.f32.mrf.mxu0 }
 0x62a   : > { %v1457_v61 = vpop.f32.mrf.mxu0 }
 0x62b   : > { %v1517_v0 = vsel %vm1175_vm8, %v1457_v61, -inf }
 0x62c   : > { %1518 = vmax.xlane.f32.xlu1 %v1517_v0  ;;  %v3110_v2 = vpop.f32.mrf.mxu0 }
 0x634   : > { %v3691_v4 = vpop.f32.mrf.mxu1 }
 0x636   : > { %v3103_v7 = vpop.f32.mrf.mxu1 }
 0x638   : > { %v3693_v8 = vpop.f32.mrf.mxu1 }
 0x639   : > { %v1405_v11 = vpack.c.bf16 %v3693_v8, %v3691_v4 }
 0x63a   : > { %v3104_v12 = vpop.f32.mrf.mxu1 }
 0x63c   : > { %v1507_v1 = vpop.f32.mrf.mxu1 }
 0x63d   : > { %v1520_v13 = vsel %vm1175_vm8, %v1507_v1, -inf }
 0x63e   : > { %1521 = vmax.xlane.f32.xlu0 %v1520_v13  ;;  %v3115_v16 = vpop.f32.mrf.mxu1 }
 0x640   : > { %v1510_v17 = vpop.f32.mrf.mxu1 }
 0x641   : > { %v1523_v18 = vsel %vm1175_vm8, %v1510_v17, -inf }
 0x642   : > { %1524 = vmax.xlane.f32.xlu0 %v1523_v18  ;;  %v3116_v20 = vpop.f32.mrf.mxu1 }
 0x6b1   : > { %v1516_v21 = vpop.xlane.xlu0 %1515 }
 0x6b2   : > { %v1526_v22 = vsub.f32 %v1454_v57, %v1516_v21 }
 0x6b4   : > { %v1530_v23 = vmul.f32 1.442695, %v1526_v22 }
 0x6b5   : > { %v1519_v24 = vpop.xlane.xlu1 %1518 }
 0x6b6   : > { %3307 = vpow2.f32 %v1530_v23  ;;  %v1527_v25 = vsub.f32 %v1457_v61, %v1519_v24 }
 0x6b8   : > { %v1532_v26 = vmul.f32 1.442695, %v1527_v25 }
 0x6ba   : > { %3309 = vpow2.f32 %v1532_v26 }
 0x6c3   : > { %v3308_v27 = vpop.eup %3307 }
 0x6c4   : > { %v1538_v28 = vsel %vm1175_vm8, %v3308_v27, 0.0 }
 0x6c5   : > { %1539 = vadd.xlane.f32.xlu0 %v1538_v28 }
 0x6c7   : > { %v3310_v29 = vpop.eup %3309  ;;  %v1522_v31 = vpop.xlane.xlu0 %1521 }
 0x6c8   : > { %v1528_v32 = vsub.f32 %v1507_v1, %v1522_v31  ;;  %v1541_v33 = vsel %vm1175_vm8, %v3310_v29, 0.0 }
 0x6c9   : > { %1542 = vadd.xlane.f32.xlu1 %v1541_v33 }
 0x6ca   : > { %v1534_v34 = vmul.f32 1.442695, %v1528_v32 }
 0x6cb   : > { %v1525_v35 = vpop.xlane.xlu0 %1524 }
 0x6cc   : > { %3311 = vpow2.f32 %v1534_v34  ;;  %v1529_v37 = vsub.f32 %v1510_v17, %v1525_v35 }
 0x6ce   : > { %v1536_v38 = vmul.f32 1.442695, %v1529_v37 }
 0x6d0   : > { %3313 = vpow2.f32 %v1536_v38 }
 0x6d9   : > { %v3312_v39 = vpop.eup %3311 }
 0x6da   : > { %v1544_v41 = vsel %vm1175_vm8, %v3312_v39, 0.0 }
 0x6db   : > { %1545 = vadd.xlane.f32.xlu0 %v1544_v41 }
 0x6dd   : > { %v3314_v36 = vpop.eup %3313 }
 0x6de   : > { %v1547_v42 = vsel %vm1175_vm8, %v3314_v36, 0.0 }
 0x6df   : > { %1548 = vadd.xlane.f32.xlu1 %v1547_v42 }
 0x6f0   : > { %1609 = vrot.lane.b32.xlu1 %v3643_v15, %s3389_s26 }
 0x6f1   : > { %1561 = vrot.lane.b32.xlu0 %v3615_v30, %s3389_s26 }
 0x6f4   : > { %1785 = vrot.lane.b32.xlu1 %v3622_v46, %s3390_s27 }
 0x6f5   : > { %1783 = vrot.lane.b32.xlu0 %v3632_v53, %s3390_s27 }
 0x6f8   : > { %1836 = vrot.lane.b32.xlu1 %v3630_v14, %s3390_s27 }
 0x6fc   : > { %1834 = vrot.lane.b32.xlu1 %v3641_v62, %s3390_s27 }
 0x74e   : > { %v1540_v43 = vpop.xlane.xlu0 %1539 }
 0x752   : > { %v1543_v40 = vpop.xlane.xlu1 %1542 }
 0x753   : > { %3315 = vrcp.f32 %v1543_v40 }
 0x754   : > { %3317 = vrcp.f32 %v1540_v43 }
 0x760   : > { %v3316_v44 = vpop.eup %3315 }
 0x761   : > { %v3318_v47 = vpop.eup %3317  ;;  %v1555_v48 = vmul.f32 %v3316_v44, %v3310_v29 }
 0x762   : > { %v1554_v50 = vmul.f32 %v3318_v47, %v3308_v27 }
 0x764   : > { %v1546_v45 = vpop.xlane.xlu0 %1545  ;;  %v1558_v5 = vpack.c.bf16 %v1555_v48, %v1554_v50 }
 0x765   : > { %3319 = vrcp.f32 %v1546_v45 }
 0x768   : > { %v1549_v49 = vpop.xlane.xlu1 %1548  ;;  %v1562_v9 = vpop.permute.xlu0 %1561 }
 0x769   : > { %3321 = vrcp.f32 %v1549_v49  ;;  %3118 = vmatpush3.bf16.msra.mxu0 %v1562_v9 }
 0x76a   : > { %3129 = vmatprep.subr.bf16.mxu0 %v3258_v3 }
 0x76c   : > { %v1610_v52 = vpop.permute.xlu1 %1609  ;;  %3120 = vmatmul.mubr.msk.bf16.vlgmr.msra.gmra.mxu0 %vm1175_vm8, %v1558_v5  ;;  %v1784_v20 = vpop.permute.xlu0 %1783 }
 0x76d   : > { %3124 = vmatpush3.bf16.msra.mxu1 %v1610_v52  ;;  %3130 = vmatpush3.bf16.msra.mxu0 %v3258_v3 }
 0x76e   : > { %3135 = vmatprep.subr.bf16.mxu1 %v3257_v51  ;;  %3141 = vmatprep.subr.bf16.mxu0 %v3387_v63 }
 0x770   : > { %v1786_v57 = vpop.permute.xlu1 %1785 }
 0x771   : > { %v1791_v13 = vsel %vm1175_vm8, %v1786_v57, 0 }
 0x772   : > { %v3320_v54 = vpop.eup %3319 }
 0x773   : > { %v1556_v56 = vmul.f32 %v3320_v54, %v3312_v39 }
 0x774   : > { %v1837_v58 = vpop.permute.xlu1 %1836 }
 0x775   : > { %v1842_v59 = vsel %vm1175_vm8, %v1837_v58, 0 }
 0x776   : > { %v3322_v55 = vpop.eup %3321 }
 0x777   : > { %v1557_v6 = vmul.f32 %v3322_v55, %v3314_v36 }
 0x778   : > { %v1835_v19 = vpop.permute.xlu1 %1834 }
 0x779   : > { %v1559_v60 = vpack.c.bf16 %v1557_v6, %v1556_v56 }
 0x77b   : > { %3126 = vmatmul.mubr.msk.bf16.vlgmr.msra.gmra.mxu1 %vm1175_vm8, %v1559_v60 }
 0x77c   : > { %3137 = vmatprep.mubr.msk.bf16.mxu1 %vm1175_vm8, %v1404_v10  ;;  %3136 = vmatpush3.bf16.msra.mxu1 %v3257_v51 }
 0x77d   : > { %3147 = vmatprep.subr.bf16.mxu1 %v3387_v63 }
 0x783   : > { %3138 = vmatmul.mubr.msk.bf16.vlgmr.msra.gmra.mxu1 %vm1175_vm8, %v1405_v11 }
 0x784   : > { %3148 = vmatpush3.bf16.xpose.msra.mxu1 %v1842_v59  ;;  %3149 = vmatprep.mubr.msk.bf16.mxu1 %vm3388_vm7, %v3387_v63 }
 0x785   : > { %3159 = vmatprep.subr.bf16.mxu1 %v3387_v63 }
 0x78b   : > { %3150 = vmatmul.mubr.msk.bf16.vlgmr.msra.gmra.mxu1 %vm1175_vm8, %v1835_v19 }
 0x78c   : > { %3161 = vmatprep.mubr.msk.bf16.mxu1 %vm3388_vm7, %v3387_v63 }
 0x82c   : > { %v1601_v10 = vpop.f32.mrf.mxu0 }
 0x82e   : > { %v3121_v61 = vpop.f32.mrf.mxu0 }
 0x830   : > { %v1604_v0 = vpop.f32.mrf.mxu0 }
 0x831   : > { %v1656_v2 = vpack.c.bf16 %v1604_v0, %v1601_v10 }
 0x832   : > { %v3122_v4 = vpop.f32.mrf.mxu0 }
 0x833   : > { %3131 = vmatprep.mubr.msk.bf16.mxu0 %vm1175_vm8, %v1656_v2 }
 0x83b   : > { %v1649_v7 = vpop.f32.mrf.mxu1 }
 0x83d   : > { %v3127_v8 = vpop.f32.mrf.mxu1 }
 0x83f   : > { %v1652_v11 = vpop.f32.mrf.mxu1 }
 0x840   : > { %v1657_v12 = vpack.c.bf16 %v1652_v11, %v1649_v7 }
 0x841   : > { %v3128_v1 = vpop.f32.mrf.mxu1 }
 0x842   : > { %3132 = vmatmul.mubr.msk.bf16.vlgmr.msra.gmra.mxu0 %vm1175_vm8, %v1657_v12 }
 0x843   : > { %3142 = vmatpush3.bf16.xpose.msra.mxu0 %v1791_v13  ;;  %v3743_v16 = vpop.f32.mrf.mxu1  ;;  %3143 = vmatprep.mubr.msk.bf16.mxu0 %vm3388_vm7, %v3387_v63  ;;  %v3259_v13 = vld [vmem:[%s3950_s6 + $0x10] sm:$0xff]  }
 0x844   : > { %3153 = vmatprep.subr.bf16.mxu0 %v3387_v63 }
 0x845   : > { %v3748_v17 = vpop.f32.mrf.mxu1 }
 0x847   : > { %v3750_v18 = vpop.f32.mrf.mxu1 }
 0x849   : > { %v3752_v21 = vpop.f32.mrf.mxu1 }
 0x84a   : > { %3144 = vmatmul.mubr.msk.bf16.vlgmr.msra.gmra.mxu0 %vm1175_vm8, %v1784_v20 }
 0x84b   : > { %v1878_v22 = vpop.f32.mrf.mxu1  ;;  %3155 = vmatprep.mubr.msk.bf16.mxu0 %vm3388_vm7, %v3387_v63 }
 0x84c   : > { %v1891_v37 = vsel %vm1175_vm8, %v1878_v22, -inf }
 0x84d   : > { %v3151_v23 = vpop.f32.mrf.mxu1 }
 0x84f   : > { %v1881_v24 = vpop.f32.mrf.mxu1 }
 0x850   : > { %v1894_v39 = vsel %vm1175_vm8, %v1881_v24, -inf }
 0x851   : > { %v3152_v25 = vpop.f32.mrf.mxu1 }
 0x902   : > { %v3757_v26 = vpop.f32.mrf.mxu0 }
 0x904   : > { %v3759_v27 = vpop.f32.mrf.mxu0 }
 0x906   : > { %v3761_v28 = vpop.f32.mrf.mxu0 }
 0x908   : > { %v3763_v29 = vpop.f32.mrf.mxu0 }
 0x90a   : > { %v1827_v31 = vpop.f32.mrf.mxu0 }
 0x90b   : > { %v1885_v32 = vsel %vm1175_vm8, %v1827_v31, -inf }
 0x90c   : > { %1886 = vmax.xlane.f32.xlu0 %v1885_v32  ;;  %v3145_v33 = vpop.f32.mrf.mxu0 }
 0x90e   : > { %v1830_v34 = vpop.f32.mrf.mxu0 }
 0x90f   : > { %v1888_v35 = vsel %vm1175_vm8, %v1830_v34, -inf }
 0x910   : > { %1889 = vmax.xlane.f32.xlu1 %v1888_v35  ;;  %v3146_v38 = vpop.f32.mrf.mxu0  ;;  %1892 = vmax.xlane.f32.xlu0 %v1891_v37 }
 0x914   : > { %1895 = vmax.xlane.f32.xlu0 %v1894_v39 }
 0x995   : > { %v1887_v41 = vpop.xlane.xlu0 %1886 }
 0x996   : > { %v1897_v36 = vsub.f32 %v1827_v31, %v1887_v41 }
 0x998   : > { %v1901_v47 = vmul.f32 1.442695, %v1897_v36 }
 0x999   : > { %v1890_v42 = vpop.xlane.xlu1 %1889  ;;  %v1893_v40 = vpop.xlane.xlu0 %1892 }
 0x99a   : > { %v1899_v43 = vsub.f32 %v1878_v22, %v1893_v40  ;;  %v1898_v44 = vsub.f32 %v1830_v34, %v1890_v42 }
 0x99c   : > { %v1905_v45 = vmul.f32 1.442695, %v1899_v43  ;;  %v1903_v9 = vmul.f32 1.442695, %v1898_v44 }
 0x99d   : > { %v1896_v48 = vpop.xlane.xlu0 %1895 }
 0x99e   : > { %v1900_v49 = vsub.f32 %v1881_v24, %v1896_v48  ;;  %3323 = vpow2.f32 %v1905_v45 }
 0x99f   : > { %3325 = vpow2.f32 %v1901_v47 }
 0x9a0   : > { %v1907_v50 = vmul.f32 1.442695, %v1900_v49 }
 0x9a2   : > { %3327 = vpow2.f32 %v1907_v50 }
 0x9a3   : > { %3329 = vpow2.f32 %v1903_v9 }
 0x9ab   : > { %v3324_v5 = vpop.eup %3323 }
 0x9ac   : > { %v1915_v51 = vsel %vm1175_vm8, %v3324_v5, 0.0  ;;  %v3326_v52 = vpop.eup %3325 }
 0x9ad   : > { %1916 = vadd.xlane.f32.xlu0 %v1915_v51  ;;  %v1909_v6 = vsel %vm1175_vm8, %v3326_v52, 0.0 }
 0x9af   : > { %v3328_v54 = vpop.eup %3327 }
 0x9b0   : > { %v1918_v55 = vsel %vm1175_vm8, %v3328_v54, 0.0  ;;  %v3330_v56 = vpop.eup %3329 }
 0x9b1   : > { %1919 = vadd.xlane.f32.xlu1 %v1918_v55  ;;  %1910 = vadd.xlane.f32.xlu0 %v1909_v6  ;;  %v1912_v60 = vsel %vm1175_vm8, %v3330_v56, 0.0  ;;  %v1769_v55 = vadd.f32 %v3748_v17, %v3759_v27  ;;  %v1780_v6 = vadd.f32 %v3750_v18, %v3761_v28 }
 0x9b5   : > { %1913 = vadd.xlane.f32.xlu1 %v1912_v60 }
 0x9c6   : > { %1978 = vrot.lane.b32.xlu1 %v3643_v15, %s3390_s27 }
 0x9c7   : > { %1931 = vrot.lane.b32.xlu0 %v3615_v30, %s3390_s27 }
 0x9ca   : > { %2097 = vrot.lane.b32.xlu1 %v3622_v46, %s3391_s14 }
 0x9cb   : > { %2095 = vrot.lane.b32.xlu0 %v3632_v53, %s3391_s14 }
 0x9ce   : > { %2148 = vrot.lane.b32.xlu1 %v3630_v14, %s3391_s14 }
 0x9d2   : > { %2146 = vrot.lane.b32.xlu1 %v3641_v62, %s3391_s14 }
 0xa36   : > { %v1917_v57 = vpop.xlane.xlu0 %1916 }
 0xa37   : > { %3331 = vrcp.f32 %v1917_v57 }
 0xa3a   : > { %v1920_v58 = vpop.xlane.xlu1 %1919  ;;  %v1911_v59 = vpop.xlane.xlu0 %1910 }
 0xa3b   : > { %3333 = vrcp.f32 %v1920_v58  ;;  %v1772_v58 = vadd.f32 %v3752_v21, %v3763_v29 }
 0xa3c   : > { %3335 = vrcp.f32 %v1911_v59 }
 0xa3e   : > { %v1914_v19 = vpop.xlane.xlu1 %1913  ;;  %v1932_v3 = vpop.permute.xlu0 %1931 }
 0xa3f   : > { %3337 = vrcp.f32 %v1914_v19  ;;  %3154 = vmatpush3.bf16.msra.mxu0 %v1932_v3 }
 0xa40   : > { %3165 = vmatprep.subr.bf16.mxu0 %v3259_v13 }
 0xa42   : > { %v1979_v46 = vpop.permute.xlu1 %1978  ;;  %v2096_v1 = vpop.permute.xlu0 %2095 }
 0xa43   : > { %3160 = vmatpush3.bf16.msra.mxu1 %v1979_v46 }
 0xa44   : > { %3171 = vmatprep.subr.bf16.mxu1 %v3387_v63  ;;  %v3332_v53 = vpop.eup %3331 }
 0xa45   : > { %v1927_v14 = vmul.f32 %v3332_v53, %v3324_v5 }
 0xa46   : > { %v2098_v62 = vpop.permute.xlu1 %2097 }
 0xa47   : > { %v2103_v7 = vsel %vm1175_vm8, %v2098_v62, 0 }
 0xa48   : > { %v3334_v10 = vpop.eup %3333 }
 0xa49   : > { %v1928_v61 = vmul.f32 %v3334_v10, %v3328_v54  ;;  %v3336_v0 = vpop.eup %3335 }
 0xa4a   : > { %v1925_v8 = vmul.f32 %v3336_v0, %v3326_v52  ;;  %v2149_v34 = vpop.permute.xlu1 %2148  ;;  %v1777_v52 = vadd.f32 %v3743_v16, %v3757_v26 }
 0xa4b   : > { %v1930_v2 = vpack.c.bf16 %v1928_v61, %v1927_v14  ;;  %v2154_v36 = vsel %vm1175_vm8, %v2149_v34, 0 }
 0xa4c   : > { %v3338_v4 = vpop.eup %3337 }
 0xa4d   : > { %3162 = vmatmul.mubr.msk.bf16.vlgmr.msra.gmra.mxu1 %vm1175_vm8, %v1930_v2  ;;  %v1926_v11 = vmul.f32 %v3338_v4, %v3330_v56 }
 0xa4e   : > { %3172 = vmatpush3.bf16.xpose.msra.mxu1 %v2103_v7  ;;  %3173 = vmatprep.mubr.msk.bf16.mxu1 %vm3388_vm7, %v3387_v63  ;;  %v2147_v44 = vpop.permute.xlu1 %2146 }
 0xa4f   : > { %v1929_v12 = vpack.c.bf16 %v1926_v11, %v1925_v8  ;;  %3183 = vmatprep.subr.bf16.mxu1 %v3387_v63 }
 0xa51   : > { %3156 = vmatmul.mubr.msk.bf16.vlgmr.msra.gmra.mxu0 %vm1175_vm8, %v1929_v12 }
 0xa52   : > { %3166 = vmatpush3.bf16.msra.mxu0 %v3259_v13 }
 0xa53   : > { %3177 = vmatprep.subr.bf16.mxu0 %v3387_v63 }
 0xa55   : > { %3174 = vmatmul.mubr.msk.bf16.vlgmr.msra.gmra.mxu1 %vm1175_vm8, %v2096_v1 }
 0xa56   : > { %3185 = vmatprep.mubr.msk.bf16.mxu1 %vm3388_vm7, %v3387_v63 }
 0xb0d   : > { %v2018_v20 = vpop.f32.mrf.mxu1 }
 0xb0f   : > { %v3163_v22 = vpop.f32.mrf.mxu1 }
 0xb11   : > { %v1971_v23 = vpop.f32.mrf.mxu0  ;;  %v2021_v24 = vpop.f32.mrf.mxu1 }
 0xb12   : > { %v2026_v38 = vpack.c.bf16 %v2021_v24, %v2018_v20 }
 0xb13   : > { %v3157_v25 = vpop.f32.mrf.mxu0  ;;  %v3164_v31 = vpop.f32.mrf.mxu1 }
 0xb15   : > { %v1974_v32 = vpop.f32.mrf.mxu0  ;;  %v2139_v33 = vpop.f32.mrf.mxu1 }
 0xb16   : > { %v2025_v35 = vpack.c.bf16 %v1974_v32, %v1971_v23  ;;  %v2197_v37 = vsel %vm1175_vm8, %v2139_v33, -inf }
 0xb17   : > { %v3158_v39 = vpop.f32.mrf.mxu0  ;;  %2198 = vmax.xlane.f32.xlu0 %v2197_v37  ;;  %v3175_v41 = vpop.f32.mrf.mxu1 }
 0xb18   : > { %3167 = vmatprep.mubr.msk.bf16.mxu0 %vm1175_vm8, %v2025_v35  ;;  %v3260_v35 = vld [vmem:[%s3950_s6 + $0x18] sm:$0xff]  }
 0xb19   : > { %3168 = vmatmul.mubr.msk.bf16.vlgmr.msra.gmra.mxu0 %vm1175_vm8, %v2026_v38  ;;  %v2142_v42 = vpop.f32.mrf.mxu1 }
 0xb1a   : > { %3178 = vmatpush3.bf16.xpose.msra.mxu0 %v2154_v36  ;;  %v2200_v40 = vsel %vm1175_vm8, %v2142_v42, -inf  ;;  %3179 = vmatprep.mubr.msk.bf16.mxu0 %vm3388_vm7, %v3387_v63 }
 0xb1b   : > { %2201 = vmax.xlane.f32.xlu1 %v2200_v40  ;;  %v3176_v43 = vpop.f32.mrf.mxu1  ;;  %3189 = vmatprep.subr.bf16.mxu0 %v3387_v63 }
 0xb21   : > { %3180 = vmatmul.mubr.msk.bf16.vlgmr.msra.gmra.mxu0 %vm1175_vm8, %v2147_v44 }
 0xb22   : > { %3191 = vmatprep.mubr.msk.bf16.mxu0 %vm3388_vm7, %v3387_v63 }
 0xba0   : > { %v2199_v50 = vpop.xlane.xlu0 %2198 }
 0xba1   : > { %v2209_v5 = vsub.f32 %v2139_v33, %v2199_v50 }
 0xba3   : > { %v2213_v51 = vmul.f32 1.442695, %v2209_v5 }
 0xba4   : > { %v2202_v45 = vpop.xlane.xlu1 %2201 }
 0xba5   : > { %v2210_v47 = vsub.f32 %v2142_v42, %v2202_v45 }
 0xba7   : > { %v2215_v48 = vmul.f32 1.442695, %v2210_v47 }
 0xba9   : > { %3339 = vpow2.f32 %v2215_v48 }
 0xbaa   : > { %3341 = vpow2.f32 %v2213_v51 }
 0xbb6   : > { %v3340_v49 = vpop.eup %3339 }
 0xbb7   : > { %v2224_v9 = vsel %vm1175_vm8, %v3340_v49, 0.0  ;;  %v3342_v18 = vpop.eup %3341 }
 0xbb8   : > { %2225 = vadd.xlane.f32.xlu1 %v2224_v9  ;;  %v2221_v53 = vsel %vm1175_vm8, %v3342_v18, 0.0  ;;  %v2916_v9 = vld [vmem:[%s3951_s7] ss:$0 sm:$0xff] }
 0xbd9   : > { %v3169_v54 = vpop.f32.mrf.mxu0 }
 0xbda   : > { %v3815_v63 = vadd.f32 %v3169_v54, %v1777_v52 }
 0xbdb   : > { %v2076_v56 = vpop.f32.mrf.mxu0 }
 0xbdc   : > { %v3819_v60 = vadd.f32 %v2076_v56, %v1769_v55 }
 0xbdd   : > { %v3170_v57 = vpop.f32.mrf.mxu0 }
 0xbde   : > { %v3823_v59 = vadd.f32 %v3170_v57, %v1780_v6 }
 0xbdf   : > { %v2079_v16 = vpop.f32.mrf.mxu0 }
 0xbe0   : > { %v3825_v26 = vadd.f32 %v2079_v16, %v1772_v58 }
 0xbe1   : > { %v2190_v19 = vpop.f32.mrf.mxu0 }
 0xbe2   : > { %v2203_v17 = vsel %vm1175_vm8, %v2190_v19, -inf }
 0xbe3   : > { %v3181_v27 = vpop.f32.mrf.mxu0  ;;  %2204 = vmax.xlane.f32.xlu0 %v2203_v17 }
 0xbe5   : > { %v2193_v3 = vpop.f32.mrf.mxu0 }
 0xbe6   : > { %v2206_v46 = vsel %vm1175_vm8, %v2193_v3, -inf }
 0xbe7   : > { %v3182_v28 = vpop.f32.mrf.mxu0  ;;  %2207 = vmax.xlane.f32.xlu0 %v2206_v46 }
 0xbeb   : > { %2222 = vadd.xlane.f32.xlu0 %v2221_v53 }
 0xc41   : > { %v2226_v11 = vpop.xlane.xlu1 %2225 }
 0xc6c   : > { %v2205_v21 = vpop.xlane.xlu0 %2204 }
 0xc6d   : > { %v2211_v29 = vsub.f32 %v2190_v19, %v2205_v21 }
 0xc6f   : > { %v2217_v10 = vmul.f32 1.442695, %v2211_v29 }
 0xc70   : > { %v2208_v14 = vpop.xlane.xlu0 %2207 }
 0xc71   : > { %3343 = vpow2.f32 %v2217_v10  ;;  %v2212_v61 = vsub.f32 %v2193_v3, %v2208_v14 }
 0xc73   : > { %v2219_v0 = vmul.f32 1.442695, %v2212_v61 }
 0xc74   : > { %v2223_v8 = vpop.xlane.xlu0 %2222 }
 0xc75   : > { %3345 = vpow2.f32 %v2219_v0 }
 0xc76   : > { %3347 = vrcp.f32 %v2223_v8  ;;  %v3261_v8 = vld [vmem:[%s3952_s8 + $0x18] sm:$0xff]  }
 0xc77   : > { %3349 = vrcp.f32 %v2226_v11  ;;  %v3262_v11 = vld [vmem:[%s3952_s8 + $0x10] sm:$0xff]  }
 0xc7e   : > { %v3344_v62 = vpop.eup %3343 }
 0xc7f   : > { %v2227_v2 = vsel %vm1175_vm8, %v3344_v62, 0.0 }
 0xc80   : > { %2228 = vadd.xlane.f32.xlu0 %v2227_v2 }
 0xc82   : > { %v3346_v4 = vpop.eup %3345 }
 0xc83   : > { %v2230_v7 = vsel %vm1175_vm8, %v3346_v4, 0.0  ;;  %v3348_v12 = vpop.eup %3347 }
 0xc84   : > { %2231 = vadd.xlane.f32.xlu1 %v2230_v7  ;;  %v3350_v13 = vpop.eup %3349  ;;  %v2237_v20 = vmul.f32 %v3348_v12, %v3342_v18  ;;  %v3263_v12 = vld [vmem:[%s3952_s8 + $0x8] sm:$0xff]  }
 0xc85   : > { %v2238_v24 = vmul.f32 %v3350_v13, %v3340_v49 }
 0xc87   : > { %v2241_v25 = vpack.c.bf16 %v2238_v24, %v2237_v20 }
 0xc95   : > { %2290 = vrot.lane.b32.xlu1 %v3643_v15, %s3391_s14 }
 0xc96   : > { %2243 = vrot.lane.b32.xlu0 %v3615_v30, %s3391_s14 }
 0xd09   : > { %v2229_v1 = vpop.xlane.xlu0 %2228 }
 0xd0a   : > { %3351 = vrcp.f32 %v2229_v1  ;;  %v3264_v1 = vld [vmem:[%s3952_s8] sm:$0xff]  }
 0xd0d   : > { %v2244_v22 = vpop.permute.xlu0 %2243  ;;  %v2232_v23 = vpop.xlane.xlu1 %2231 }
 0xd0e   : > { %3353 = vrcp.f32 %v2232_v23  ;;  %3184 = vmatpush3.bf16.msra.mxu1 %v2244_v22 }
 0xd0f   : > { %3195 = vmatprep.subr.bf16.mxu1 %v3260_v35 }
 0xd11   : > { %3186 = vmatmul.mubr.msk.bf16.vlgmr.msra.gmra.mxu1 %vm1175_vm8, %v2241_v25  ;;  %v2291_v15 = vpop.permute.xlu1 %2290 }
 0xd12   : > { %3190 = vmatpush3.bf16.msra.mxu0 %v2291_v15  ;;  %3196 = vmatpush3.bf16.msra.mxu1 %v3260_v35 }
 0xd13   : > { %3201 = vmatprep.subr.bf16.mxu0 %v3261_v8 }
 0xd17   : > { %v3352_v30 = vpop.eup %3351 }
 0xd18   : > { %v2239_v32 = vmul.f32 %v3352_v30, %v3344_v62 }
 0xd1b   : > { %v3354_v31 = vpop.eup %3353 }
 0xd1c   : > { %v2240_v33 = vmul.f32 %v3354_v31, %v3346_v4 }
 0xd1e   : > { %v2242_v34 = vpack.c.bf16 %v2240_v33, %v2239_v32 }
 0xd20   : > { %3192 = vmatmul.mubr.msk.bf16.vlgmr.msra.gmra.mxu0 %vm1175_vm8, %v2242_v34 }
 0xd21   : > { %3202 = vmatpush3.bf16.msra.mxu0 %v3261_v8 }
 0xd22   : > { %3203 = vmatprep.subr.bf16.mxu0 %v3262_v11 }
 0xd25   : > { %3204 = vmatpush3.bf16.msra.mxu0 %v3262_v11 }
 0xd26   : > { %3205 = vmatprep.subr.bf16.mxu0 %v3263_v12 }
 0xd29   : > { %3206 = vmatpush3.bf16.msra.mxu0 %v3263_v12 }
 0xd2a   : > { %3207 = vmatprep.subr.bf16.mxu0 %v3264_v1 }
 0xd2d   : > { %3208 = vmatpush3.bf16.msra.mxu0 %v3264_v1 }
 0xdd1   : > { %v2283_v37 = vpop.f32.mrf.mxu1 }
 0xdd3   : > { %v3187_v38 = vpop.f32.mrf.mxu1 }
 0xdd5   : > { %v2286_v39 = vpop.f32.mrf.mxu1 }
 0xdd6   : > { %v2337_v41 = vpack.c.bf16 %v2286_v39, %v2283_v37 }
 0xdd7   : > { %v3188_v36 = vpop.f32.mrf.mxu1 }
 0xdd8   : > { %3197 = vmatprep.mubr.msk.bf16.mxu1 %vm1175_vm8, %v2337_v41 }
 0xde0   : > { %v2330_v42 = vpop.f32.mrf.mxu0 }
 0xde2   : > { %v3193_v40 = vpop.f32.mrf.mxu0 }
 0xde4   : > { %v2333_v43 = vpop.f32.mrf.mxu0 }
 0xde5   : > { %v2338_v44 = vpack.c.bf16 %v2333_v43, %v2330_v42 }
 0xde6   : > { %v3194_v45 = vpop.f32.mrf.mxu0 }
 0xde7   : > { %3198 = vmatmul.mubr.msk.bf16.vlgmr.msra.gmra.mxu1 %vm1175_vm8, %v2338_v44  ;;  %v2676_v45 = vld [vmem:[%s3954_s10] sm:$0x3] }
 0xde8   : > { %3222 = vmatprep.subr.msk.bf16.mxu1 %vm2684_vm9, %v2676_v45 }
 0xea7   : > { %v3199_v47 = vpop.f32.mrf.mxu1 }
 0xea8   : > { %v2405_v54 = vadd.f32 %v3199_v47, %v3815_v63  ;;  %v2686_v47 = vsel %vm2684_vm9, %v2676_v45, 0 }
 0xea9   : > { %v2388_v48 = vpop.f32.mrf.mxu1  ;;  %3214 = vmatpush3.bf16.msra.mxu1 %v2686_v47 }
 0xeaa   : > { %v2403_v49 = vadd.f32 %v2388_v48, %v3819_v60  ;;  %v3858_v57 = vadd.f32 %v2916_v9, %v2405_v54  ;;  %v2917_v48 = vld [vmem:[%s3953_s9] ss:$0 sm:$0xff] }
 0xeab   : > { %v3200_v50 = vpop.f32.mrf.mxu1 }
 0xeac   : > { %v3847_v5 = vadd.f32 %v2916_v9, %v2403_v49  ;;  %v2406_v51 = vadd.f32 %v3200_v50, %v3823_v59  ;;  %v2424_v63 = vsel %vm426_vm0, %v3858_v57, 0.0 }
 0xead   : > { %v2391_v52 = vpop.f32.mrf.mxu1 }
 0xeae   : > { %v3851_v55 = vadd.f32 %v2916_v9, %v2406_v51  ;;  %v2404_v56 = vadd.f32 %v2391_v52, %v3825_v26  ;;  %v2418_v6 = vsel %vm426_vm0, %v3847_v5, 0.0 }
 0xeaf   : > { %2419 = vadd.xlane.f32.xlu1 %v2418_v6 }
 0xeb0   : > { %v3856_v60 = vadd.f32 %v2916_v9, %v2404_v56  ;;  %v2427_v59 = vsel %vm426_vm0, %v3851_v55, 0.0 }
 0xeb2   : > { %v2421_v58 = vsel %vm426_vm0, %v3856_v60, 0.0 }
 0xeb3   : > { %2422 = vadd.xlane.f32.xlu0 %v2421_v58  ;;  %2428 = vadd.xlane.f32.xlu1 %v2427_v59 }
 0xeb7   : > { %2425 = vadd.xlane.f32.xlu0 %v2424_v63 }
 0xf38   : > { %v2420_v16 = vpop.xlane.xlu1 %2419 }
 0xf39   : > { %v2430_v26 = vmul.f32 0.015625, %v2420_v16 }
 0xf3b   : > { %v2434_v19 = vsub.f32 %v3847_v5, %v2430_v26 }
 0xf3c   : > { %v2423_v17 = vpop.xlane.xlu0 %2422  ;;  %v2429_v27 = vpop.xlane.xlu1 %2428 }
 0xf3d   : > { %v2431_v3 = vmul.f32 0.015625, %v2423_v17  ;;  %v2433_v46 = vmul.f32 0.015625, %v2429_v27  ;;  %v2438_v18 = vmul.f32 %v2434_v19, %v2434_v19 }
 0xf3f   : > { %v2435_v28 = vsub.f32 %v3856_v60, %v2431_v3  ;;  %v2437_v53 = vsub.f32 %v3851_v55, %v2433_v46  ;;  %v2442_v21 = vsel %vm426_vm0, %v2438_v18, 0.0 }
 0xf40   : > { %v2426_v29 = vpop.xlane.xlu0 %2425  ;;  %2443 = vadd.xlane.f32.xlu0 %v2442_v21 }
 0xf41   : > { %v2432_v10 = vmul.f32 0.015625, %v2426_v29  ;;  %v2439_v14 = vmul.f32 %v2435_v28, %v2435_v28  ;;  %v2441_v62 = vmul.f32 %v2437_v53, %v2437_v53 }
 0xf43   : > { %v2436_v61 = vsub.f32 %v3858_v57, %v2432_v10  ;;  %v2445_v0 = vsel %vm426_vm0, %v2439_v14, 0.0  ;;  %v2451_v7 = vsel %vm426_vm0, %v2441_v62, 0.0 }
 0xf44   : > { %2446 = vadd.xlane.f32.xlu1 %v2445_v0 }
 0xf45   : > { %v2440_v2 = vmul.f32 %v2436_v61, %v2436_v61 }
 0xf47   : > { %v2448_v4 = vsel %vm426_vm0, %v2440_v2, 0.0 }
 0xf48   : > { %2449 = vadd.xlane.f32.xlu0 %v2448_v4  ;;  %2452 = vadd.xlane.f32.xlu1 %v2451_v7 }
 0xfc9   : > { %v2444_v13 = vpop.xlane.xlu0 %2443 }
 0xfca   : > { %v2454_v20 = vmul.f32 0.015625, %v2444_v13 }
 0xfcc   : > { %v2458_v22 = vadd.f32 1e-05, %v2454_v20 }
 0xfcd   : > { %v2447_v23 = vpop.xlane.xlu1 %2446 }
 0xfce   : > { %v2455_v24 = vmul.f32 0.015625, %v2447_v23  ;;  %3355 = vrsqrt.f32 %v2458_v22 }
 0xfd0   : > { %v2459_v25 = vadd.f32 1e-05, %v2455_v24 }
 0xfd1   : > { %v2450_v15 = vpop.xlane.xlu0 %2449  ;;  %v2453_v30 = vpop.xlane.xlu1 %2452 }
 0xfd2   : > { %3357 = vrsqrt.f32 %v2459_v25  ;;  %v2456_v31 = vmul.f32 0.015625, %v2450_v15  ;;  %v2457_v32 = vmul.f32 0.015625, %v2453_v30 }
 0xfd4   : > { %v2460_v33 = vadd.f32 1e-05, %v2456_v31  ;;  %v2461_v34 = vadd.f32 1e-05, %v2457_v32 }
 0xfd6   : > { %3359 = vrsqrt.f32 %v2460_v33 }
 0xfd7   : > { %3361 = vrsqrt.f32 %v2461_v34 }
 0xfdb   : > { %v3356_v35 = vpop.eup %3355 }
 0xfdc   : > { %v2466_v38 = vmul.f32 %v3356_v35, %v2434_v19 }
 0xfdf   : > { %v3358_v37 = vpop.eup %3357 }
 0xfe0   : > { %v2467_v39 = vmul.f32 %v3358_v37, %v2435_v28 }
 0xfe2   : > { %v2470_v41 = vpack.c.bf16 %v2467_v39, %v2466_v38 }
 0xfe3   : > { %v3360_v36 = vpop.eup %3359 }
 0xfe4   : > { %v3362_v42 = vpop.eup %3361  ;;  %3209 = vmatprep.mubr.msk.bf16.mxu0 %vm426_vm0, %v2470_v41  ;;  %v2468_v40 = vmul.f32 %v3360_v36, %v2436_v61 }
 0xfe5   : > { %v2469_v43 = vmul.f32 %v3362_v42, %v2437_v53 }
 0xfe7   : > { %v2471_v44 = vpack.c.bf16 %v2469_v43, %v2468_v40 }
 0xfe9   : > { %3210 = vmatmul.mubr.msk.bf16.vlgmr.msra.gmra.mxu0 %vm426_vm0, %v2471_v44 }
0x10a9   : > { %v3211_v49 = vpop.f32.mrf.mxu0 }
0x10aa   : > { %v3894_v9 = vadd.f32 %v3211_v49, %v2917_v48 }
0x10ab   : > { %v2551_v50 = vpop.f32.mrf.mxu0 }
0x10ac   : > { %v3897_v51 = vmul.f32 0.70710677, %v3894_v9  ;;  %v3899_v52 = vadd.f32 %v2917_v48, %v2551_v50 }
0x10ad   : > { %v3212_v54 = vpop.f32.mrf.mxu0 }
0x10ae   : > { %v2576_v56 = vand.u32 2147483647, %v3897_v51  ;;  %v3903_v6 = vmul.f32 0.70710677, %v3899_v52  ;;  %v3905_v58 = vadd.f32 %v3212_v54, %v2917_v48  ;;  %vm2656_vm11 = vcmp.ge.f32.partialorder %v3897_v51, 0.0 }
0x10af   : > { %v2554_v59 = vpop.f32.mrf.mxu0 }
0x10b0   : > { %v2580_v63 = vmul.f32 0.3275911, %v2576_v56  ;;  %v2574_v16 = vand.u32 2147483647, %v3903_v6  ;;  %v3909_v26 = vmul.f32 0.70710677, %v3905_v58  ;;  %v3911_v19 = vadd.f32 %v2917_v48, %v2554_v59 }
0x10b1   : > { %v2632_v14 = vsub.f32 0.0, %v2576_v56  ;;  %vm2654_vm10 = vcmp.ge.f32.partialorder %v3903_v6, 0.0  ;;  %v2566_v6 = vmul.f32 0.5, %v3899_v52  ;;  %v2926_v52 = vld [vmem:[%s3955_s11] ss:$0 sm:$0xff] }
0x10b2   : > { %v2584_v17 = vadd.f32 1.0, %v2580_v63  ;;  %v2578_v27 = vmul.f32 0.3275911, %v2574_v16  ;;  %v2577_v3 = vand.u32 2147483647, %v3909_v26  ;;  %v2630_v61 = vsub.f32 0.0, %v2574_v16 }
0x10b3   : > { %v3915_v46 = vmul.f32 0.70710677, %v3911_v19  ;;  %v2636_v0 = vmul.f32 %v2632_v14, %v2576_v56  ;;  %vm2657_vm12 = vcmp.ge.f32.partialorder %v3909_v26, 0.0  ;;  %v2567_v51 = vmul.f32 0.5, %v3911_v19 }
0x10b4   : > { %3363 = vrcp.f32 %v2584_v17  ;;  %v2582_v18 = vadd.f32 1.0, %v2578_v27  ;;  %v2581_v28 = vmul.f32 0.3275911, %v2577_v3  ;;  %v2633_v62 = vsub.f32 0.0, %v2577_v3 }
0x10b5   : > { %v2575_v53 = vand.u32 2147483647, %v3915_v46  ;;  %v2634_v4 = vmul.f32 %v2630_v61, %v2574_v16  ;;  %v2642_v8 = vmul.f32 1.442695, %v2636_v0  ;;  %vm2655_vm13 = vcmp.ge.f32.partialorder %v3915_v46, 0.0 }
0x10b6   : > { %3365 = vrcp.f32 %v2582_v18  ;;  %v2585_v21 = vadd.f32 1.0, %v2581_v28  ;;  %v2637_v12 = vmul.f32 %v2633_v62, %v2577_v3  ;;  %v2568_v26 = vmul.f32 0.5, %v3894_v9 }
0x10b7   : > { %v2579_v29 = vmul.f32 0.3275911, %v2575_v53  ;;  %v2631_v11 = vsub.f32 0.0, %v2575_v53  ;;  %v2638_v22 = vmul.f32 1.442695, %v2634_v4 }
0x10b8   : > { %3367 = vrcp.f32 %v2585_v21  ;;  %v2644_v31 = vmul.f32 1.442695, %v2637_v12 }
0x10b9   : > { %v2583_v10 = vadd.f32 1.0, %v2579_v29  ;;  %v2635_v25 = vmul.f32 %v2631_v11, %v2575_v53 }
0x10bb   : > { %3369 = vrcp.f32 %v2583_v10  ;;  %v2640_v39 = vmul.f32 1.442695, %v2635_v25 }
0x10bc   : > { %3371 = vpow2.f32 %v2642_v8 }
0x10bd   : > { %3373 = vpow2.f32 %v2638_v22 }
0x10be   : > { %3375 = vpow2.f32 %v2644_v31 }
0x10bf   : > { %3377 = vpow2.f32 %v2640_v39 }
0x10c1   : > { %v3364_v2 = vpop.eup %3363 }
0x10c2   : > { %v2596_v7 = vmul.f32 1.0614054, %v3364_v2 }
0x10c3   : > { %v3366_v1 = vpop.eup %3365 }
0x10c4   : > { %v2600_v13 = vadd.f32 -1.4531521, %v2596_v7  ;;  %v2594_v20 = vmul.f32 1.0614054, %v3366_v1 }
0x10c5   : > { %v3368_v23 = vpop.eup %3367 }
0x10c6   : > { %v2604_v24 = vmul.f32 %v3364_v2, %v2600_v13  ;;  %v2598_v15 = vadd.f32 -1.4531521, %v2594_v20  ;;  %v2597_v30 = vmul.f32 1.0614054, %v3368_v23 }
0x10c8   : > { %v2608_v32 = vadd.f32 1.4214138, %v2604_v24  ;;  %v3370_v33 = vpop.eup %3369  ;;  %v2602_v34 = vmul.f32 %v3366_v1, %v2598_v15  ;;  %v2601_v35 = vadd.f32 -1.4531521, %v2597_v30 }
0x10c9   : > { %v2595_v38 = vmul.f32 1.0614054, %v3370_v33  ;;  %v3372_v17 = vpop.eup %3371 }
0x10ca   : > { %v2612_v37 = vmul.f32 %v3364_v2, %v2608_v32  ;;  %v2606_v41 = vadd.f32 1.4214138, %v2602_v34  ;;  %v2605_v36 = vmul.f32 %v3368_v23, %v2601_v35  ;;  %v3374_v29 = vpop.eup %3373  ;;  %v2569_v34 = vmul.f32 0.5, %v3905_v58 }
0x10cb   : > { %v2599_v40 = vadd.f32 -1.4531521, %v2595_v38  ;;  %v3376_v62 = vpop.eup %3375 }
0x10cc   : > { %v2616_v42 = vadd.f32 -0.28449672, %v2612_v37  ;;  %v2610_v43 = vmul.f32 %v3366_v1, %v2606_v41  ;;  %v2609_v44 = vadd.f32 1.4214138, %v2605_v36  ;;  %v3378_v12 = vpop.eup %3377 }
0x10cd   : > { %v2603_v47 = vmul.f32 %v3370_v33, %v2599_v40 }
0x10ce   : > { %v2620_v45 = vmul.f32 %v3364_v2, %v2616_v42  ;;  %v2614_v48 = vadd.f32 -0.28449672, %v2610_v43  ;;  %v2613_v49 = vmul.f32 %v3368_v23, %v2609_v44 }
0x10cf   : > { %v2607_v54 = vadd.f32 1.4214138, %v2603_v47 }
0x10d0   : > { %v2624_v50 = vadd.f32 0.2548296, %v2620_v45  ;;  %v2618_v56 = vmul.f32 %v3366_v1, %v2614_v48  ;;  %v2617_v59 = vadd.f32 -0.28449672, %v2613_v49 }
0x10d1   : > { %v2611_v16 = vmul.f32 %v3370_v33, %v2607_v54 }
0x10d2   : > { %v2628_v63 = vmul.f32 %v3364_v2, %v2624_v50  ;;  %v2622_v27 = vadd.f32 0.2548296, %v2618_v56  ;;  %v2621_v3 = vmul.f32 %v3368_v23, %v2617_v59 }
0x10d3   : > { %v2615_v28 = vadd.f32 -0.28449672, %v2611_v16 }
0x10d4   : > { %v2648_v18 = vmul.f32 %v3372_v17, %v2628_v63  ;;  %v2626_v53 = vmul.f32 %v3366_v1, %v2622_v27  ;;  %v2625_v21 = vadd.f32 0.2548296, %v2621_v3 }
0x10d5   : > { %v2619_v10 = vmul.f32 %v3370_v33, %v2615_v28 }
0x10d6   : > { %v2652_v14 = vsub.f32 1.0, %v2648_v18  ;;  %v2646_v61 = vmul.f32 %v3374_v29, %v2626_v53  ;;  %v2629_v0 = vmul.f32 %v3368_v23, %v2625_v21 }
0x10d7   : > { %v2623_v4 = vadd.f32 0.2548296, %v2619_v10 }
0x10d8   : > { %v2650_v7 = vsub.f32 1.0, %v2646_v61  ;;  %v2649_v8 = vmul.f32 %v3376_v62, %v2629_v0  ;;  %v2660_v2 = vsub.f32 0.0, %v2652_v14 }
0x10d9   : > { %v2627_v11 = vmul.f32 %v3370_v33, %v2623_v4 }
0x10da   : > { %v2658_v13 = vsub.f32 0.0, %v2650_v7  ;;  %v2653_v20 = vsub.f32 1.0, %v2649_v8  ;;  %v2664_v23 = vsel %vm2656_vm11, %v2652_v14, %v2660_v2 }
0x10db   : > { %v2647_v22 = vmul.f32 %v3378_v12, %v2627_v11  ;;  %v2668_v33 = vadd.f32 1.0, %v2664_v23 }
0x10dc   : > { %v2661_v24 = vsub.f32 0.0, %v2653_v20  ;;  %v2662_v1 = vsel %vm2654_vm10, %v2650_v7, %v2658_v13 }
0x10dd   : > { %v2651_v25 = vsub.f32 1.0, %v2647_v22  ;;  %v2666_v32 = vadd.f32 1.0, %v2662_v1  ;;  %v2672_v36 = vmul.f32 %v2668_v33, %v2568_v26 }
0x10de   : > { %v2665_v15 = vsel %vm2657_vm12, %v2653_v20, %v2661_v24 }
0x10df   : > { %v2669_v30 = vadd.f32 1.0, %v2665_v15  ;;  %v2659_v31 = vsub.f32 0.0, %v2651_v25  ;;  %v2670_v39 = vmul.f32 %v2666_v32, %v2566_v6 }
0x10e1   : > { %v2663_v35 = vsel %vm2655_vm13, %v2651_v25, %v2659_v31  ;;  %v2673_v38 = vmul.f32 %v2669_v30, %v2569_v34 }
0x10e2   : > { %v2667_v37 = vadd.f32 1.0, %v2663_v35 }
0x10e3   : > { %v2675_v40 = vpack.c.bf16 %v2673_v38, %v2672_v36 }
0x10e4   : > { %v2671_v41 = vmul.f32 %v2667_v37, %v2567_v51 }
0x10e6   : > { %v2674_v42 = vpack.c.bf16 %v2671_v41, %v2670_v39 }
0x10e8   : > { %3215 = vmatprep.mubr.msk.bf16.mxu1 %vm2677_vm14, %v2674_v42 }
0x10e9   : > { %3216 = vmatmul.mubr.msk.bf16.vlgmr.msra.gmra.mxu1 %vm2677_vm14, %v2675_v40 }
0x11a9   : > { %v3217_v46 = vpop.f32.mrf.mxu1 }
0x11aa   : > { %v2739_v58 = vadd.f32 %v3217_v46, %v3858_v57 }
0x11ab   : > { %v2722_v9 = vpop.f32.mrf.mxu1 }
0x11ac   : > { %v2750_v19 = vadd.f32 %v2926_v52, %v2739_v58  ;;  %v2737_v43 = vadd.f32 %v2722_v9, %v3847_v5 }
0x11ad   : > { %v3218_v44 = vpop.f32.mrf.mxu1 }
0x11ae   : > { %2754 = vst.msk [vmem:[%s415_s24 + $0x10] sm:$0xff] %vm426_vm0, %v2750_v19  ;;  %v2748_v45 = vadd.f32 %v2926_v52, %v2737_v43  ;;  %v2740_v47 = vadd.f32 %v3218_v44, %v3851_v55 }
0x11af   : > { %v2725_v48 = vpop.f32.mrf.mxu1 }
0x11b0   : > { %2752 = vst.msk [vmem:[%s415_s24] sm:$0xff] %vm426_vm0, %v2748_v45  ;;  %v2751_v49 = vadd.f32 %v2926_v52, %v2740_v47  ;;  %v2738_v57 = vadd.f32 %v2725_v48, %v3856_v60 }
0x11b2   : > { %2755 = vst.msk [vmem:[%s415_s24 + $0x18] sm:$0xff] %vm426_vm0, %v2751_v49  ;;  %v2749_v50 = vadd.f32 %v2926_v52, %v2738_v57 }
0x11b4   : > { %2753 = vst.msk [vmem:[%s415_s24 + $0x8] sm:$0xff] %vm426_vm0, %v2749_v50 }
0x11b5 PF: > { %s22_s21 = sadd.s32 1, %s3385_s21  }
0x11b6   : > { %p19_p4 = scmp.ge.s32.totalorder %s22_s21, 6  }
0x11b8   :  { %21 = sbr.rel (!%p19_p4) target bundleno = 1 (0x1), region = 107 }

</bundles_post_ra>
